<compile_context>
chip_gen: v7x
topology: tpu7x:2x2x1
jax: 0.10.0
libtpu: 0.0.40
codegen_flags: <defaults>
</compile_context>

<pallas_src>
import functools

import jax
import jax.numpy as jnp
from jax.experimental import pallas as pl
from jax.experimental.pallas import tpu as pltpu


_CPAD = 128                   # lane-padded channel / K width (one full vreg of lanes)
_GROUP = 16                   # stem-channel group size used for replication / tap packing
_NGROUPS = _CPAD // _GROUP    # 8 taps packed into one body-conv dot
_NCLS_PAD = 128               # lane-padded number of classes


# ----------------------------------------------------------------------------
# Fused Pallas kernel (one grid step == one image)
# ----------------------------------------------------------------------------
def _sknet_kernel(x_ref, ws_ref, bs_ref, wb8_ref, wb1_ref, bb_ref, wf_ref, bf_ref,
                  out_ref, stem_buf, *, h, w, pad):
    """Refs (per grid step / image):
      x_ref   : (1, mp, 128) bf16  im2col'd stem input (9 taps x Cin packed into lanes)
      ws_ref  : (128, 128)  bf16   packed stem weight (BN folded, channels replicated x8)
      bs_ref  : (1, 128)    f32    stem folded-BN bias (replicated x8)
      wb8_ref : (128, 128)  bf16   body weight, taps 0..7 packed along K (BN folded)
      wb1_ref : (128, 128)  bf16   body weight, residual tap 8 (BN folded)
      bb_ref  : (1, 128)    f32    body folded-BN bias
      wf_ref  : (128, 128)  bf16   FC weight (pre-transposed, padded)
      bf_ref  : (1, 128)    f32    FC bias
      out_ref : (1, 1, 128) f32    padded logits for this image
      stem_buf: (2*pad + mp, 128) bf16 VMEM scratch (stem activation + shift guard rows)
    """
    hp, wp = h + 2, w + 2
    mp = hp * wp

    # Interior-pixel predicate of the padded (hp, wp) grid, built in-kernel from an iota
    # (no (m,1) f32 mask array, no DMA).  Division-free: row -> (h,w) decomposition via
    # multiply-by-reciprocal + floor, exact at these magnitudes.
    rid = jax.lax.broadcasted_iota(jnp.int32, (mp, _CPAD), 0).astype(jnp.float32)
    hrow = jnp.floor((rid + 0.5) * (1.0 / wp))
    wcol = rid - hrow * wp
    interior = ((hrow >= 1.0) & (hrow <= float(h)) &
                (wcol >= 1.0) & (wcol <= float(w)))

    # Zero ONLY the guard-row regions; the middle mp rows are fully overwritten below.
    stem_buf[pl.ds(0, pad), :] = jnp.zeros((pad, _CPAD), stem_buf.dtype)
    stem_buf[pl.ds(pad + mp, pad), :] = jnp.zeros((pad, _CPAD), stem_buf.dtype)

    # ---- stem: ONE tap-packed MXU dot; output channels arrive replicated across the
    #      eight 16-lane groups (done by the weight packing), bias + ReLU + border mask
    #      in the f32 epilogue; border rows become the body conv's zero padding.
    s = jnp.dot(x_ref[0], ws_ref[...], preferred_element_type=jnp.float32)
    s = jnp.maximum(s + bs_ref[...], 0.0)
    s = jnp.where(interior, s, 0.0)
    stem_buf[pl.ds(pad, mp), :] = s.astype(stem_buf.dtype)

    # ---- backbone body: pack 8 of the 9 taps into the 128 lanes (lane-group select over
    #      shifted rows of the replicated stem buffer) -> one dot, plus one residual-tap
    #      dot.  2 MXU dots instead of 9.
    offs = [(kh - 1) * wp + (kw - 1) for kh in range(3) for kw in range(3)]
    lane = jax.lax.broadcasted_iota(jnp.int32, (mp, _CPAD), 1)
    lhs = stem_buf[pl.ds(pad + offs[0], mp), :]
    for t in range(1, _NGROUPS):
        sel = (lane >= t * _GROUP) & (lane < (t + 1) * _GROUP)
        lhs = jnp.where(sel, stem_buf[pl.ds(pad + offs[t], mp), :], lhs)
    b = jnp.dot(lhs, wb8_ref[...], preferred_element_type=jnp.float32)
    b = b + jnp.dot(stem_buf[pl.ds(pad + offs[8], mp), :], wb1_ref[...],
                    preferred_element_type=jnp.float32)
    b = jnp.maximum(b + bb_ref[...], 0.0)

    # ---- global average pool: masked per-image reduction (no O(N^2) pool matrix).
    pooled = jnp.sum(jnp.where(interior, b, 0.0), axis=0, keepdims=True) * (1.0 / (h * w))

    # ---- classifier head (lane-dense padded logits).
    logits = jnp.dot(pooled.astype(wf_ref.dtype), wf_ref[...],
                     preferred_element_type=jnp.float32) + bf_ref[...]
    out_ref[...] = logits.reshape(1, 1, _NCLS_PAD)


def _run_fused(xcol, packed, *, n, h, w):
    hp, wp = h + 2, w + 2
    mp = hp * wp
    # Guard rows must cover the largest body-conv row shift (wp + 1); keep them
    # sublane-aligned (multiple of 16 rows for bf16).  Static guard against silent OOB.
    pad = max(32, ((wp + 1 + 15) // 16) * 16)
    assert pad >= wp + 1
    r = 2 * pad + mp

    kern = functools.partial(_sknet_kernel, h=h, w=w, pad=pad)
    flops = n * (3 * 2 * mp * _CPAD * _CPAD + 2 * _CPAD * _NCLS_PAD)
    bytes_accessed = (xcol.size * 2 + 4 * _CPAD * _CPAD * 2 + 3 * _CPAD * 4
                      + n * _NCLS_PAD * 4)

    return pl.pallas_call(
        kern,
        out_shape=jax.ShapeDtypeStruct((n, 1, _NCLS_PAD), jnp.float32),
        grid=(n,),
        in_specs=[
            pl.BlockSpec((1, mp, _CPAD), lambda i: (i, 0, 0)),      # per-image im2col input
            pl.BlockSpec((_CPAD, _CPAD), lambda i: (0, 0)),         # stem weight (resident)
            pl.BlockSpec((1, _CPAD), lambda i: (0, 0)),
            pl.BlockSpec((_CPAD, _CPAD), lambda i: (0, 0)),         # body weight (8 taps)
            pl.BlockSpec((_CPAD, _CPAD), lambda i: (0, 0)),         # body weight (tap 8)
            pl.BlockSpec((1, _CPAD), lambda i: (0, 0)),
            pl.BlockSpec((_CPAD, _NCLS_PAD), lambda i: (0, 0)),     # FC weight
            pl.BlockSpec((1, _NCLS_PAD), lambda i: (0, 0)),
        ],
        out_specs=pl.BlockSpec((1, 1, _NCLS_PAD), lambda i: (i, 0, 0)),
        scratch_shapes=[pltpu.VMEM((r, _CPAD), jnp.bfloat16)],
        compiler_params=pltpu.CompilerParams(
            dimension_semantics=("parallel",)),
        cost_estimate=pl.CostEstimate(flops=flops, transcendentals=0,
                                      bytes_accessed=bytes_accessed),
    )(xcol, packed["stem_w"], packed["stem_b"], packed["body_w8"],
      packed["body_w1"], packed["body_b"], packed["fc_w"], packed["fc_b"])


# ----------------------------------------------------------------------------
# One-time parameter packing (BN folding, tap packing, lane padding, bf16 cast)
# ----------------------------------------------------------------------------
def _fold_bn(gamma, beta, mean, var, eps=1e-5):
    scale = gamma / jnp.sqrt(var + eps)
    return scale, beta - mean * scale


def _pack_stem(w_oihw, gamma, beta, mean, var, eps=1e-5):
    cout, cin, kh, kw = w_oihw.shape
    assert (kh, kw) == (3, 3) and 9 * cin <= _CPAD and cout <= _GROUP
    scale, bias = _fold_bn(gamma, beta, mean, var, eps)
    # K rows: k = (kh*3+kw)*cin + c  (matches the im2col lane layout).
    w_k = jnp.transpose(w_oihw, (2, 3, 1, 0)).reshape(9 * cin, cout) * scale[None, :]
    w_pad = jnp.zeros((_CPAD, _CPAD), jnp.float32)
    b_pad = jnp.zeros((1, _CPAD), jnp.float32)
    for g in range(_NGROUPS):   # replicate output channels across the 8 lane groups
        w_pad = w_pad.at[:9 * cin, g * _GROUP:g * _GROUP + cout].set(w_k)
        b_pad = b_pad.at[0, g * _GROUP:g * _GROUP + cout].set(bias)
    return w_pad.astype(jnp.bfloat16), b_pad


def _pack_body(w_oihw, gamma, beta, mean, var, eps=1e-5):
    cout, cin, kh, kw = w_oihw.shape
    assert (kh, kw) == (3, 3) and cin <= _GROUP and cout <= _CPAD
    scale, bias = _fold_bn(gamma, beta, mean, var, eps)
    w_t = jnp.transpose(w_oihw, (2, 3, 1, 0)).reshape(9, cin, cout) * scale[None, None, :]
    w8 = jnp.zeros((_CPAD, _CPAD), jnp.float32)
    for t in range(_NGROUPS):   # K rows t*16 .. t*16+cin-1  <->  tap t
        w8 = w8.at[t * _GROUP:t * _GROUP + cin, :cout].set(w_t[t])
    w1 = jnp.zeros((_CPAD, _CPAD), jnp.float32).at[:cin, :cout].set(w_t[8])
    b = jnp.zeros((1, _CPAD), jnp.float32).at[0, :cout].set(bias)
    return w8.astype(jnp.bfloat16), w1.astype(jnp.bfloat16), b


def _pack_fc(w_oi, b_o):
    cout, cin = w_oi.shape
    assert cin <= _CPAD and cout <= _NCLS_PAD
    w_pad = jnp.zeros((_CPAD, _NCLS_PAD), jnp.float32).at[:cin, :cout].set(w_oi.T)
    b_pad = jnp.zeros((1, _NCLS_PAD), jnp.float32).at[0, :cout].set(b_o)
    return w_pad.astype(jnp.bfloat16), b_pad


def pack_params(params):
    """Done once at parameter-init time (not per forward call)."""
    assert params["body_w"].shape[1] == params["stem_w"].shape[0]
    stem_w, stem_b = _pack_stem(params["stem_w"], params["stem_gamma"],
                                params["stem_beta"], params["stem_mean"],
                                params["stem_var"])
    body_w8, body_w1, body_b = _pack_body(params["body_w"], params["body_gamma"],
                                          params["body_beta"], params["body_mean"],
                                          params["body_var"])
    fc_w, fc_b = _pack_fc(params["fc_w"], params["fc_b"])
    return {"stem_w": stem_w, "stem_b": stem_b,
            "body_w8": body_w8, "body_w1": body_w1, "body_b": body_b,
            "fc_w": fc_w, "fc_b": fc_b}


# ----------------------------------------------------------------------------
# Per-call layout glue: mini-im2col of the input (9 taps x Cin packed into lanes).
# Same (N*Hp*Wp, 128) bf16 footprint as the plain lane-padded input.
# ----------------------------------------------------------------------------
def _im2col_stem(images_nchw):
    n, c, h, w = images_nchw.shape
    hp, wp = h + 2, w + 2
    assert 9 * c <= _CPAD
    x = jnp.transpose(images_nchw, (0, 2, 3, 1)).astype(jnp.float32)   # NCHW -> NHWC
    xp = jnp.pad(x, ((0, 0), (2, 2), (2, 2), (0, 0)))   # conv pad (1) + window guard (1)
    taps = [xp[:, kh:kh + hp, kw:kw + wp, :] for kh in range(3) for kw in range(3)]
    xcol = jnp.concatenate(taps, axis=-1).reshape(n, hp * wp, 9 * c)
    xcol = jnp.pad(xcol, ((0, 0), (0, 0), (0, _CPAD - 9 * c)))
    return xcol.astype(jnp.bfloat16)


# ----------------------------------------------------------------------------
# SKNet eval forward ('clf' task path of _forward_val)
# ----------------------------------------------------------------------------
def sknet_forward_val(images_nchw, packed, *, n_classes):
    n, _, h, w = images_nchw.shape
    xcol = _im2col_stem(images_nchw)
    logits_pad = _run_fused(xcol, packed, n=n, h=h, w=w)   # (n, 1, 128)
    return {"outputs": logits_pad[:, 0, :n_classes]}


# ----------------------------------------------------------------------------
# Deterministic parameter init (mirrors init_weights: kaiming for conv/linear,
# BN gamma=1 / beta=0, zero biases; BN running stats mean=0, var=1).
# ----------------------------------------------------------------------------
def make_params(key, c_in, c_stem, c_body, n_classes):
    k1, k2, k3 = jax.random.split(key, 3)

    def kaiming_normal_conv(k, cout, cin, ks=3):
        fan_in = cin * ks * ks
        std = (2.0 / fan_in) ** 0.5
        return jax.random.normal(k, (cout, cin, ks, ks), jnp.float32) * std

    bound = (2.0 ** 0.5) * (3.0 / c_body) ** 0.5    # kaiming_uniform, relu

    return {
        "stem_w": kaiming_normal_conv(k1, c_stem, c_in),
        "stem_gamma": jnp.ones((c_stem,), jnp.float32),
        "stem_beta": jnp.zeros((c_stem,), jnp.float32),
        "stem_mean": jnp.zeros((c_stem,), jnp.float32),
        "stem_var": jnp.ones((c_stem,), jnp.float32),
        "body_w": kaiming_normal_conv(k2, c_body, c_stem),
        "body_gamma": jnp.ones((c_body,), jnp.float32),
        "body_beta": jnp.zeros((c_body,), jnp.float32),
        "body_mean": jnp.zeros((c_body,), jnp.float32),
        "body_var": jnp.ones((c_body,), jnp.float32),
        "fc_w": jax.random.uniform(k3, (n_classes, c_body), jnp.float32, -bound, bound),
        "fc_b": jnp.zeros((n_classes,), jnp.float32),
    }


# Pure-JAX f32 reference for a loose numerical check (bf16 MXU path differs slightly).
def _reference_forward(images_nchw, params, eps=1e-5):
    x = jnp.transpose(images_nchw, (0, 2, 3, 1)).astype(jnp.float32)

    def conv_bn_relu(x, w_oihw, g, b, mu, var):
        w_hwio = jnp.transpose(w_oihw, (2, 3, 1, 0))
        y = jax.lax.conv_general_dilated(
            x, w_hwio, window_strides=(1, 1), padding="SAME",
            dimension_numbers=("NHWC", "HWIO", "NHWC"))
        scale = g / jnp.sqrt(var + eps)
        return jnp.maximum(y * scale + (b - mu * scale), 0.0)

    x = conv_bn_relu(x, params["stem_w"], params["stem_gamma"],
                     params["stem_beta"], params["stem_mean"], params["stem_var"])
    x = conv_bn_relu(x, params["body_w"], params["body_gamma"],
                     params["body_beta"], params["body_mean"], params["body_var"])
    pooled = jnp.mean(x, axis=(1, 2))
    return pooled @ params["fc_w"].T + params["fc_b"]


if __name__ == "__main__":
    key = jax.random.PRNGKey(0)
    k_x, k_p = jax.random.split(key)

    N, C_IN, H, W = 2, 3, 16, 16
    C_STEM, C_BODY, N_CLASSES = 16, 32, 10

    images = jax.random.normal(k_x, (N, C_IN, H, W), jnp.float32)   # NCHW
    params = make_params(k_p, C_IN, C_STEM, C_BODY, N_CLASSES)
    packed = pack_params(params)                                    # one-time packing

    fwd = jax.jit(sknet_forward_val, static_argnames="n_classes")
    out = fwd(images, packed, n_classes=N_CLASSES)
    logits = jax.block_until_ready(out["outputs"])

    assert logits.shape == (N, N_CLASSES)
    assert bool(jnp.all(jnp.isfinite(logits)))
    ref = _reference_forward(images, params)
    assert bool(jnp.allclose(logits, ref, rtol=0.15, atol=0.15)), (
        float(jnp.max(jnp.abs(logits - ref))))
    print("KERNEL_OK")
</pallas_src>

<mosaic_0001>
module attributes {stable_mosaic.version = 11 : i64} {
  func.func @_sknet_kernel(%arg0: i32, %arg1: memref<1x324x128xbf16, #tpu.memory_space<vmem>>, %arg2: memref<128x128xbf16, #tpu.memory_space<vmem>>, %arg3: memref<1x128xf32, #tpu.memory_space<vmem>>, %arg4: memref<128x128xbf16, #tpu.memory_space<vmem>>, %arg5: memref<128x128xbf16, #tpu.memory_space<vmem>>, %arg6: memref<1x128xf32, #tpu.memory_space<vmem>>, %arg7: memref<128x128xbf16, #tpu.memory_space<vmem>>, %arg8: memref<1x128xf32, #tpu.memory_space<vmem>>, %arg9: memref<1x1x128xf32, #tpu.memory_space<vmem>>, %arg10: memref<388x128xbf16, #tpu.memory_space<vmem>>) attributes {dimension_semantics = [#tpu.dimension_semantics<parallel>], iteration_bounds = array<i64: 2>, scalar_prefetch = 0 : i64, scratch_operands = 1 : i64, tpu.core_type = #tpu.core_type<tc>, window_params = [{transform_indices = @transform_0, window_bounds = array<i64: 1, 324, 128>}, {pipeline_mode = #tpu.pipeline_mode<synchronous>, transform_indices = @transform_1, window_bounds = array<i64: 128, 128>}, {pipeline_mode = #tpu.pipeline_mode<synchronous>, transform_indices = @transform_2, window_bounds = array<i64: 1, 128>}, {pipeline_mode = #tpu.pipeline_mode<synchronous>, transform_indices = @transform_3, window_bounds = array<i64: 128, 128>}, {pipeline_mode = #tpu.pipeline_mode<synchronous>, transform_indices = @transform_4, window_bounds = array<i64: 128, 128>}, {pipeline_mode = #tpu.pipeline_mode<synchronous>, transform_indices = @transform_5, window_bounds = array<i64: 1, 128>}, {pipeline_mode = #tpu.pipeline_mode<synchronous>, transform_indices = @transform_6, window_bounds = array<i64: 128, 128>}, {pipeline_mode = #tpu.pipeline_mode<synchronous>, transform_indices = @transform_7, window_bounds = array<i64: 1, 128>}, {transform_indices = @transform_8, window_bounds = array<i64: 1, 1, 128>}]} {
    %0 = tpu.iota {dimensions = array<i32: 0>} : vector<324x128xi32>
    %1 = arith.sitofp %0 : vector<324x128xi32> to vector<324x128xf32>
    %cst = arith.constant 5.000000e-01 : f32
    %2 = vector.broadcast %cst : f32 to vector<324x128xf32>
    %3 = arith.addf %1, %2 : vector<324x128xf32>
    %cst_0 = arith.constant 0.055555556 : f32
    %4 = vector.broadcast %cst_0 : f32 to vector<324x128xf32>
    %5 = arith.mulf %3, %4 : vector<324x128xf32>
    %6 = math.floor %5 : vector<324x128xf32>
    %cst_1 = arith.constant 1.800000e+01 : f32
    %7 = vector.broadcast %cst_1 : f32 to vector<324x128xf32>
    %8 = arith.mulf %6, %7 : vector<324x128xf32>
    %9 = arith.subf %1, %8 : vector<324x128xf32>
    %cst_2 = arith.constant 1.000000e+00 : f32
    %10 = vector.broadcast %cst_2 : f32 to vector<324x128xf32>
    %11 = arith.cmpf oge, %6, %10 : vector<324x128xf32>
    %cst_3 = arith.constant 1.600000e+01 : f32
    %12 = vector.broadcast %cst_3 : f32 to vector<324x128xf32>
    %13 = arith.cmpf ole, %6, %12 : vector<324x128xf32>
    %14 = arith.andi %11, %13 : vector<324x128xi1>
    %cst_4 = arith.constant 1.000000e+00 : f32
    %15 = vector.broadcast %cst_4 : f32 to vector<324x128xf32>
    %16 = arith.cmpf oge, %9, %15 : vector<324x128xf32>
    %17 = arith.andi %14, %16 : vector<324x128xi1>
    %cst_5 = arith.constant 1.600000e+01 : f32
    %18 = vector.broadcast %cst_5 : f32 to vector<324x128xf32>
    %19 = arith.cmpf ole, %9, %18 : vector<324x128xf32>
    %20 = arith.andi %17, %19 : vector<324x128xi1>
    %cst_6 = arith.constant 0.000000e+00 : bf16
    %21 = vector.broadcast %cst_6 : bf16 to vector<32x128xbf16>
    %c0 = arith.constant 0 : index
    %c0_7 = arith.constant 0 : index
    %22 = vector.load %arg10[%c0, %c0_7] : memref<388x128xbf16, #tpu.memory_space<vmem>>, vector<32x128xbf16>
    tpu.vector_store %arg10[%c0, %c0_7], %21 {strides = array<i32>} : memref<388x128xbf16, #tpu.memory_space<vmem>>, vector<32x128xbf16>,
    %cst_8 = arith.constant 0.000000e+00 : bf16
    %23 = vector.broadcast %cst_8 : bf16 to vector<32x128xbf16>
    %c356 = arith.constant 356 : index
    %c0_9 = arith.constant 0 : index
    %24 = vector.load %arg10[%c356, %c0_9] : memref<388x128xbf16, #tpu.memory_space<vmem>>, vector<32x128xbf16>
    tpu.vector_store %arg10[%c356, %c0_9], %23 {strides = array<i32>} : memref<388x128xbf16, #tpu.memory_space<vmem>>, vector<32x128xbf16>,
    %c0_10 = arith.constant 0 : index
    %c0_11 = arith.constant 0 : index
    %c0_12 = arith.constant 0 : index
    %25 = vector.load %arg1[%c0_10, %c0_11, %c0_12] : memref<1x324x128xbf16, #tpu.memory_space<vmem>>, vector<1x324x128xbf16>
    %26 = vector.shape_cast %25 : vector<1x324x128xbf16> to vector<324x128xbf16>
    %c0_13 = arith.constant 0 : index
    %c0_14 = arith.constant 0 : index
    %27 = vector.load %arg2[%c0_13, %c0_14] : memref<128x128xbf16, #tpu.memory_space<vmem>>, vector<128x128xbf16>
    %cst_15 = arith.constant dense<0.000000e+00> : vector<324x128xf32>
    %28 = tpu.matmul %26, %27, %cst_15 {dimension_numbers = #tpu.dot_dimension_numbers<[1], [0], [0], [1], [0, 0, 1, 1], [], []>} : vector<324x128xbf16>, vector<128x128xbf16>, vector<324x128xf32> -> vector<324x128xf32>
    %c0_16 = arith.constant 0 : index
    %c0_17 = arith.constant 0 : index
    %29 = vector.load %arg3[%c0_16, %c0_17] : memref<1x128xf32, #tpu.memory_space<vmem>>, vector<1x128xf32>
    %30 = vector.broadcast %29 : vector<1x128xf32> to vector<324x128xf32>
    %31 = arith.addf %28, %30 : vector<324x128xf32>
    %cst_18 = arith.constant 0.000000e+00 : f32
    %32 = vector.broadcast %cst_18 : f32 to vector<324x128xf32>
    %33 = arith.maximumf %31, %32 : vector<324x128xf32>
    %cst_19 = arith.constant 0.000000e+00 : f32
    %34 = vector.broadcast %cst_19 : f32 to vector<324x128xf32>
    %35 = arith.select %20, %33, %34 : vector<324x128xi1>, vector<324x128xf32>
    %36 = arith.truncf %35 : vector<324x128xf32> to vector<324x128xbf16>
    %c32 = arith.constant 32 : index
    %c0_20 = arith.constant 0 : index
    %37 = vector.load %arg10[%c32, %c0_20] : memref<388x128xbf16, #tpu.memory_space<vmem>>, vector<324x128xbf16>
    tpu.vector_store %arg10[%c32, %c0_20], %36 {strides = array<i32>} : memref<388x128xbf16, #tpu.memory_space<vmem>>, vector<324x128xbf16>,
    %38 = tpu.iota {dimensions = array<i32: 1>} : vector<324x128xi32>
    %c13 = arith.constant 13 : index
    %c0_21 = arith.constant 0 : index
    %39 = vector.load %arg10[%c13, %c0_21] : memref<388x128xbf16, #tpu.memory_space<vmem>>, vector<324x128xbf16>
    %c16_i32 = arith.constant 16 : i32
    %40 = vector.broadcast %c16_i32 : i32 to vector<324x128xi32>
    %41 = arith.cmpi sge, %38, %40 : vector<324x128xi32>
    %c32_i32 = arith.constant 32 : i32
    %42 = vector.broadcast %c32_i32 : i32 to vector<324x128xi32>
    %43 = arith.cmpi slt, %38, %42 : vector<324x128xi32>
    %44 = arith.andi %41, %43 : vector<324x128xi1>
    %c14 = arith.constant 14 : index
    %c0_22 = arith.constant 0 : index
    %45 = vector.load %arg10[%c14, %c0_22] : memref<388x128xbf16, #tpu.memory_space<vmem>>, vector<324x128xbf16>
    %46 = arith.select %44, %45, %39 : vector<324x128xi1>, vector<324x128xbf16>
    %c32_i32_23 = arith.constant 32 : i32
    %47 = vector.broadcast %c32_i32_23 : i32 to vector<324x128xi32>
    %48 = arith.cmpi sge, %38, %47 : vector<324x128xi32>
    %c48_i32 = arith.constant 48 : i32
    %49 = vector.broadcast %c48_i32 : i32 to vector<324x128xi32>
    %50 = arith.cmpi slt, %38, %49 : vector<324x128xi32>
    %51 = arith.andi %48, %50 : vector<324x128xi1>
    %c15 = arith.constant 15 : index
    %c0_24 = arith.constant 0 : index
    %52 = vector.load %arg10[%c15, %c0_24] : memref<388x128xbf16, #tpu.memory_space<vmem>>, vector<324x128xbf16>
    %53 = arith.select %51, %52, %46 : vector<324x128xi1>, vector<324x128xbf16>
    %c48_i32_25 = arith.constant 48 : i32
    %54 = vector.broadcast %c48_i32_25 : i32 to vector<324x128xi32>
    %55 = arith.cmpi sge, %38, %54 : vector<324x128xi32>
    %c64_i32 = arith.constant 64 : i32
    %56 = vector.broadcast %c64_i32 : i32 to vector<324x128xi32>
    %57 = arith.cmpi slt, %38, %56 : vector<324x128xi32>
    %58 = arith.andi %55, %57 : vector<324x128xi1>
    %c31 = arith.constant 31 : index
    %c0_26 = arith.constant 0 : index
    %59 = vector.load %arg10[%c31, %c0_26] : memref<388x128xbf16, #tpu.memory_space<vmem>>, vector<324x128xbf16>
    %60 = arith.select %58, %59, %53 : vector<324x128xi1>, vector<324x128xbf16>
    %c64_i32_27 = arith.constant 64 : i32
    %61 = vector.broadcast %c64_i32_27 : i32 to vector<324x128xi32>
    %62 = arith.cmpi sge, %38, %61 : vector<324x128xi32>
    %c80_i32 = arith.constant 80 : i32
    %63 = vector.broadcast %c80_i32 : i32 to vector<324x128xi32>
    %64 = arith.cmpi slt, %38, %63 : vector<324x128xi32>
    %65 = arith.andi %62, %64 : vector<324x128xi1>
    %c32_28 = arith.constant 32 : index
    %c0_29 = arith.constant 0 : index
    %66 = vector.load %arg10[%c32_28, %c0_29] : memref<388x128xbf16, #tpu.memory_space<vmem>>, vector<324x128xbf16>
    %67 = arith.select %65, %66, %60 : vector<324x128xi1>, vector<324x128xbf16>
    %c80_i32_30 = arith.constant 80 : i32
    %68 = vector.broadcast %c80_i32_30 : i32 to vector<324x128xi32>
    %69 = arith.cmpi sge, %38, %68 : vector<324x128xi32>
    %c96_i32 = arith.constant 96 : i32
    %70 = vector.broadcast %c96_i32 : i32 to vector<324x128xi32>
    %71 = arith.cmpi slt, %38, %70 : vector<324x128xi32>
    %72 = arith.andi %69, %71 : vector<324x128xi1>
    %c33 = arith.constant 33 : index
    %c0_31 = arith.constant 0 : index
    %73 = vector.load %arg10[%c33, %c0_31] : memref<388x128xbf16, #tpu.memory_space<vmem>>, vector<324x128xbf16>
    %74 = arith.select %72, %73, %67 : vector<324x128xi1>, vector<324x128xbf16>
    %c96_i32_32 = arith.constant 96 : i32
    %75 = vector.broadcast %c96_i32_32 : i32 to vector<324x128xi32>
    %76 = arith.cmpi sge, %38, %75 : vector<324x128xi32>
    %c112_i32 = arith.constant 112 : i32
    %77 = vector.broadcast %c112_i32 : i32 to vector<324x128xi32>
    %78 = arith.cmpi slt, %38, %77 : vector<324x128xi32>
    %79 = arith.andi %76, %78 : vector<324x128xi1>
    %c49 = arith.constant 49 : index
    %c0_33 = arith.constant 0 : index
    %80 = vector.load %arg10[%c49, %c0_33] : memref<388x128xbf16, #tpu.memory_space<vmem>>, vector<324x128xbf16>
    %81 = arith.select %79, %80, %74 : vector<324x128xi1>, vector<324x128xbf16>
    %c112_i32_34 = arith.constant 112 : i32
    %82 = vector.broadcast %c112_i32_34 : i32 to vector<324x128xi32>
    %83 = arith.cmpi sge, %38, %82 : vector<324x128xi32>
    %c128_i32 = arith.constant 128 : i32
    %84 = vector.broadcast %c128_i32 : i32 to vector<324x128xi32>
    %85 = arith.cmpi slt, %38, %84 : vector<324x128xi32>
    %86 = arith.andi %83, %85 : vector<324x128xi1>
    %c50 = arith.constant 50 : index
    %c0_35 = arith.constant 0 : index
    %87 = vector.load %arg10[%c50, %c0_35] : memref<388x128xbf16, #tpu.memory_space<vmem>>, vector<324x128xbf16>
    %88 = arith.select %86, %87, %81 : vector<324x128xi1>, vector<324x128xbf16>
    %c0_36 = arith.constant 0 : index
    %c0_37 = arith.constant 0 : index
    %89 = vector.load %arg4[%c0_36, %c0_37] : memref<128x128xbf16, #tpu.memory_space<vmem>>, vector<128x128xbf16>
    %cst_38 = arith.constant dense<0.000000e+00> : vector<324x128xf32>
    %90 = tpu.matmul %88, %89, %cst_38 {dimension_numbers = #tpu.dot_dimension_numbers<[1], [0], [0], [1], [0, 0, 1, 1], [], []>} : vector<324x128xbf16>, vector<128x128xbf16>, vector<324x128xf32> -> vector<324x128xf32>
    %c51 = arith.constant 51 : index
    %c0_39 = arith.constant 0 : index
    %91 = vector.load %arg10[%c51, %c0_39] : memref<388x128xbf16, #tpu.memory_space<vmem>>, vector<324x128xbf16>
    %c0_40 = arith.constant 0 : index
    %c0_41 = arith.constant 0 : index
    %92 = vector.load %arg5[%c0_40, %c0_41] : memref<128x128xbf16, #tpu.memory_space<vmem>>, vector<128x128xbf16>
    %cst_42 = arith.constant dense<0.000000e+00> : vector<324x128xf32>
    %93 = tpu.matmul %91, %92, %cst_42 {dimension_numbers = #tpu.dot_dimension_numbers<[1], [0], [0], [1], [0, 0, 1, 1], [], []>} : vector<324x128xbf16>, vector<128x128xbf16>, vector<324x128xf32> -> vector<324x128xf32>
    %94 = arith.addf %90, %93 : vector<324x128xf32>
    %c0_43 = arith.constant 0 : index
    %c0_44 = arith.constant 0 : index
    %95 = vector.load %arg6[%c0_43, %c0_44] : memref<1x128xf32, #tpu.memory_space<vmem>>, vector<1x128xf32>
    %96 = vector.broadcast %95 : vector<1x128xf32> to vector<324x128xf32>
    %97 = arith.addf %94, %96 : vector<324x128xf32>
    %cst_45 = arith.constant 0.000000e+00 : f32
    %98 = vector.broadcast %cst_45 : f32 to vector<324x128xf32>
    %99 = arith.maximumf %97, %98 : vector<324x128xf32>
    %cst_46 = arith.constant 0.000000e+00 : f32
    %100 = vector.broadcast %cst_46 : f32 to vector<324x128xf32>
    %101 = arith.select %20, %99, %100 : vector<324x128xi1>, vector<324x128xf32>
    %cst_47 = arith.constant dense<0.000000e+00> : vector<128xf32>
    %102 = vector.multi_reduction <add>, %101, %cst_47 [0] : vector<324x128xf32> to vector<128xf32>
    %103 = vector.shape_cast %102 : vector<128xf32> to vector<1x128xf32>
    %cst_48 = arith.constant 3.906250e-03 : f32
    %104 = vector.broadcast %cst_48 : f32 to vector<1x128xf32>
    %105 = arith.mulf %103, %104 : vector<1x128xf32>
    %106 = arith.truncf %105 : vector<1x128xf32> to vector<1x128xbf16>
    %c0_49 = arith.constant 0 : index
    %c0_50 = arith.constant 0 : index
    %107 = vector.load %arg7[%c0_49, %c0_50] : memref<128x128xbf16, #tpu.memory_space<vmem>>, vector<128x128xbf16>
    %cst_51 = arith.constant dense<0.000000e+00> : vector<1x128xf32>
    %108 = tpu.matmul %106, %107, %cst_51 {dimension_numbers = #tpu.dot_dimension_numbers<[1], [0], [0], [1], [0, 0, 1, 1], [], []>} : vector<1x128xbf16>, vector<128x128xbf16>, vector<1x128xf32> -> vector<1x128xf32>
    %c0_52 = arith.constant 0 : index
    %c0_53 = arith.constant 0 : index
    %109 = vector.load %arg8[%c0_52, %c0_53] : memref<1x128xf32, #tpu.memory_space<vmem>>, vector<1x128xf32>
    %110 = arith.addf %108, %109 : vector<1x128xf32>
    %111 = vector.shape_cast %110 : vector<1x128xf32> to vector<1x1x128xf32>
    %c0_54 = arith.constant 0 : index
    %c0_55 = arith.constant 0 : index
    %c0_56 = arith.constant 0 : index
    %112 = vector.load %arg9[%c0_54, %c0_55, %c0_56] : memref<1x1x128xf32, #tpu.memory_space<vmem>>, vector<1x1x128xf32>
    tpu.vector_store %arg9[%c0_54, %c0_55, %c0_56], %111 {strides = array<i32>} : memref<1x1x128xf32, #tpu.memory_space<vmem>>, vector<1x1x128xf32>,
    return
  }
  func.func @transform_0(%arg0: i32) -> (i32, i32, i32) {
    %c0_i32 = arith.constant 0 : i32
    %c0_i32_0 = arith.constant 0 : i32
    %c0_i32_1 = arith.constant 0 : i32
    return %arg0, %c0_i32, %c0_i32_0 : i32, i32, i32
  }
  func.func @transform_1(%arg0: i32) -> (i32, i32) {
    %c0_i32 = arith.constant 0 : i32
    %c0_i32_0 = arith.constant 0 : i32
    %c0_i32_1 = arith.constant 0 : i32
    return %c0_i32, %c0_i32_0 : i32, i32
  }
  func.func @transform_2(%arg0: i32) -> (i32, i32) {
    %c0_i32 = arith.constant 0 : i32
    %c0_i32_0 = arith.constant 0 : i32
    %c0_i32_1 = arith.constant 0 : i32
    return %c0_i32, %c0_i32_0 : i32, i32
  }
  func.func @transform_3(%arg0: i32) -> (i32, i32) {
    %c0_i32 = arith.constant 0 : i32
    %c0_i32_0 = arith.constant 0 : i32
    %c0_i32_1 = arith.constant 0 : i32
    return %c0_i32, %c0_i32_0 : i32, i32
  }
  func.func @transform_4(%arg0: i32) -> (i32, i32) {
    %c0_i32 = arith.constant 0 : i32
    %c0_i32_0 = arith.constant 0 : i32
    %c0_i32_1 = arith.constant 0 : i32
    return %c0_i32, %c0_i32_0 : i32, i32
  }
  func.func @transform_5(%arg0: i32) -> (i32, i32) {
    %c0_i32 = arith.constant 0 : i32
    %c0_i32_0 = arith.constant 0 : i32
    %c0_i32_1 = arith.constant 0 : i32
    return %c0_i32, %c0_i32_0 : i32, i32
  }
  func.func @transform_6(%arg0: i32) -> (i32, i32) {
    %c0_i32 = arith.constant 0 : i32
    %c0_i32_0 = arith.constant 0 : i32
    %c0_i32_1 = arith.constant 0 : i32
    return %c0_i32, %c0_i32_0 : i32, i32
  }
  func.func @transform_7(%arg0: i32) -> (i32, i32) {
    %c0_i32 = arith.constant 0 : i32
    %c0_i32_0 = arith.constant 0 : i32
    %c0_i32_1 = arith.constant 0 : i32
    return %c0_i32, %c0_i32_0 : i32, i32
  }
  func.func @transform_8(%arg0: i32) -> (i32, i32, i32) {
    %c0_i32 = arith.constant 0 : i32
    %c0_i32_0 = arith.constant 0 : i32
    %c0_i32_1 = arith.constant 0 : i32
    return %arg0, %c0_i32, %c0_i32_0 : i32, i32, i32
  }
}

</mosaic_0001>

<bundles_post_ra>
// kernel: sknet_forward_val.1
= control target key start
LH: loop header
LB: loop body
LE: loop exit
PB: predicated region body
PF: predicated region fallthrough
CT: control target
= control target key end

     0   :  { %13 = vsyncpa [#allocation4], 0  ;;  %s11097_s0 = inlined_call_operand.vmem [shape: bf16[2,324,128], index: 0, kind: input, shape index: {}]   ;;  %s11098_s1 = inlined_call_operand.vmem [shape: bf16[128,128], index: 1, kind: input, shape index: {}]   ;;  %s11099_s2 = inlined_call_operand.vmem [shape: f32[1,128], index: 2, kind: input, shape index: {}]   ;;  %s11100_s3 = inlined_call_operand.vmem [shape: bf16[128,128], index: 3, kind: input, shape index: {}]   ;;  %s11101_s4 = inlined_call_operand.vmem [shape: bf16[128,128], index: 4, kind: input, shape index: {}]   ;;  %s11102_s5 = inlined_call_operand.vmem [shape: f32[1,128], index: 5, kind: input, shape index: {}]   ;;  %s11103_s6 = inlined_call_operand.vmem [shape: bf16[128,128], index: 6, kind: input, shape index: {}]   ;;  %s11104_s7 = inlined_call_operand.vmem [shape: f32[1,128], index: 7, kind: input, shape index: {}]   ;;  %s11105_s8 = inlined_call_operand.hbm [shape: f32[2,1,128], index: 8, kind: output, shape index: {}]  }
   0x1   :  { %15 = vsyncpa [#allocation4 + $0x1], 0  ;;  %s6410_s27 = smov 0   ;;  %s6412_s28 = smov 0  }
   0x2   :  { %s6414_s29 = smov 0   ;;  %s6416_s30 = smov 0  }
   0x3 LB: > { %s6431_s9 = sadd.s32 4294967295, %s6359_s30   ;;  %s5411_s10 = sadd.s32 4294967294, %s6359_s30   ;;  %s6359_s30 = sphi %s6416_s30, %s12018_s30   ;;  %s6355_s29 = sphi %s6414_s29, %s12017_s29   ;;  %s6351_s28 = sphi %s6412_s28, %s12016_s28   ;;  %s6347_s27 = sphi %s6410_s27, %s12015_s27  }
   0x4   : > { %s6435_s11 = sadd.s32 1, %s6359_s30   ;;  %s201_s12 = sadd.s32 1, %s6355_s29 }
   0x5   : > { %s198_s13 = ssub.s32 %s6359_s30, %s6435_s11  ;;  %p211_p0 = scmp.ne.s32.totalorder %s6355_s29, %s6351_s28 }
   0x6   : > { %p199_p1 = scmp.eq.s32.totalorder %s198_s13, 0  ;;  %p212_p2 = scmp.eq.s32.totalorder %s6431_s9, 1 }
   0x7   : > { %p217_p3 = scmp.ne.s32.totalorder %s6351_s28, %s6347_s27  ;;  %p218_p4 = scmp.eq.s32.totalorder %s5411_s10, 1 }
   0x8   : > { %s6446_s14 = scalar_select %p199_p1, %s6355_s29, %s201_s12  }
   0x9   : > { %p6448_p5 = por %p212_p2, %p211_p0  ;;  %p6452_p6 = por %p218_p4, %p217_p3 }
   0xa   : > { %p5414_p7 = scmp.ge.s32.totalorder %s6359_s30, 1  ;;  %p265_p8 = scmp.lt.s32.totalorder %s6359_s30, 3 }
   0xc   : > { %p266_p9 = pnand %p5414_p7, %p265_p8 }
   0xe   : > { %269 = sbr.rel (%p266_p9) target bundleno = 1313 (0x521), region = 52 }
  0x15   : > { %v6195_v0 = vld [vmem:[%s11098_s1] sm:$0xff]   ;;  %v11106_v1 = vmov 0.0   ;;  %v6196_v2 = vld [vmem:[%s11098_s1 + $0x8] sm:$0xff]   ;;  %vm11141_vm0 = vmmov 0   ;;  %p298_p10 = scmp.lt.s32.totalorder %s6431_s9, 1  ;;  %v6197_v3 = vld [vmem:[%s11098_s1 + $0x10] sm:$0xff]   ;;  %v304_v45 = vlaneseq }
  0x16   : > { %5816 = vmatprep.subr.bf16.mxu0 %v11106_v1  ;;  %6136 = vmatprep.subr.bf16.mxu1 %v11106_v1  ;;  %v6198_v4 = vld [vmem:[%s11098_s1 + $0x18] sm:$0xff]   ;;  %v6199_v5 = vld [vmem:[%s11098_s1 + $0x20] sm:$0xff]   ;;  %v6200_v6 = vld [vmem:[%s11098_s1 + $0x28] sm:$0xff]   ;;  %v6363_v35 = vmov 0   ;;  %vm1661_vm3 = vsmask.f32 256 }
  0x17   : > { %5817 = vmatpush3.bf16.msra.mxu0 %v6195_v0  ;;  %5832 = vmatprep.mubr.msk.bf16.mxu0 %vm11141_vm0, %v11106_v1  ;;  %s299_s21 = scalar_select %p298_p10, %s6431_s9, 1  ;;  %v6201_v7 = vld [vmem:[%s11098_s1 + $0x30] sm:$0xff]   ;;  %v6202_v8 = vld [vmem:[%s11098_s1 + $0x38] sm:$0xff]   ;;  %v6224_v11 = vld [vmem:[%s11100_s3] sm:$0xff]   ;;  %880 = vst [vmem:[#allocation2 + $0x4] sm:$0xf] %v6363_v35 }
  0x18   : > { %5818 = vmatprep.subr.bf16.mxu0 %v11106_v1  ;;  %6144 = vmatpush3.bf16.msra.mxu1 %v6195_v0  ;;  %v6225_v12 = vld [vmem:[%s11101_s4] sm:$0xff]   ;;  %v6226_v13 = vld [vmem:[%s11100_s3 + $0x8] sm:$0xff]   ;;  %v6228_v17 = vld [vmem:[%s11100_s3 + $0x10] sm:$0xff]   ;;  %881 = vst [vmem:[#allocation2 + $0x8] sm:$0xf] %v6363_v35  ;;  %v6633_v47 = vshrl.u32 %v304_v45, 7 }
  0x19   : > { %6137 = vmatprep.subr.bf16.mxu1 %v11106_v1  ;;  %5876 = vmatprep.mubr.msk.bf16.mxu1 %vm11141_vm0, %v11106_v1  ;;  %s6152_s24 = smul.u32 164, %s299_s21  ;;  %v6227_v14 = vld [vmem:[%s11101_s4 + $0x8] sm:$0xff]   ;;  %882 = vst [vmem:[#allocation2 + $0xc] sm:$0xf] %v6363_v35  ;;  %883 = vst [vmem:[#allocation2 + $0xb0] sm:$0xc] %v6363_v35 }
  0x1a   : > { %884 = vst [vmem:[#allocation2 + $0xb4] sm:$0xf] %v6363_v35  ;;  %885 = vst [vmem:[#allocation2 + $0xb8] sm:$0xf] %v6363_v35  ;;  %v6229_v36 = vld [vmem:[%s11101_s4 + $0x10] sm:$0xff]   ;;  %v6231_v37 = vld [vmem:[%s11101_s4 + $0x18] sm:$0xff]   ;;  %v346_v51 = vcvt.s32.f32 %v6633_v47 }
  0x1b   : > { %5819 = vmatpush3.bf16.msra.mxu0 %v6196_v2  ;;  %s6481_s10 = scalar_lea.vmem %s11097_s0, %s6152_s24  ;;  %v6230_v38 = vld [vmem:[%s11100_s3 + $0x18] sm:$0xff]   ;;  %v6233_v39 = vld [vmem:[%s11101_s4 + $0x20] sm:$0xff]   ;;  %v6234_v40 = vld [vmem:[%s11101_s4 + $0x28] sm:$0xff]   ;;  %11281 = vst [vmem:[#allocation6_spill] sm:$0xff] %v6633_v47  ;;  %v6637_v48 = vadd.s32 8, %v6633_v47  ;;  %v6640_v49 = vadd.s32 16, %v6633_v47 }
  0x1c   : > { %5820 = vmatprep.subr.bf16.mxu0 %v11106_v1  ;;  %6145 = vmatpush3.bf16.msra.mxu1 %v6196_v2  ;;  %v6203_v9 = vld [vmem:[%s6481_s10] sm:$0xff]   ;;  %v6209_v10 = vld [vmem:[%s6481_s10 + $0x58] sm:$0xff]   ;;  %v6204_v15 = vld [vmem:[%s6481_s10 + $0x8] sm:$0xff]   ;;  %v6649_v54 = vadd.s32 24, %v6633_v47  ;;  %v6652_v55 = vadd.s32 32, %v6633_v47  ;;  %v6655_v56 = vadd.s32 40, %v6633_v47 }
  0x1d   : > { %6138 = vmatprep.subr.bf16.mxu1 %v11106_v1  ;;  %v6211_v16 = vld [vmem:[%s6481_s10 + $0x60] sm:$0xff]   ;;  %v6205_v18 = vld [vmem:[%s6481_s10 + $0x10] sm:$0xff]   ;;  %v6213_v19 = vld [vmem:[%s6481_s10 + $0x68] sm:$0xff]   ;;  %v347_v52 = vcvt.s32.f32 %v6637_v48  ;;  %v348_v53 = vcvt.s32.f32 %v6640_v49  ;;  %v387_v59 = vadd.f32 0.5, %v346_v51  ;;  %v6664_v61 = vadd.s32 48, %v6633_v47  ;;  %s296_s17 = sand.u32 1, %s6351_s28  }
  0x1e   : > { %v6206_v20 = vld [vmem:[%s6481_s10 + $0x18] sm:$0xff]   ;;  %v6215_v21 = vld [vmem:[%s6481_s10 + $0x70] sm:$0xff]   ;;  %v6207_v22 = vld [vmem:[%s6481_s10 + $0x20] sm:$0xff]   ;;  %v349_v0 = vcvt.s32.f32 %v6649_v54  ;;  %v350_v2 = vcvt.s32.f32 %v6652_v55  ;;  %vm1662_vm4 = vsmask.f32 4368  ;;  %s5556_s20 = sshll.u32 %s6431_s9, 4 }
  0x1f   : > { %5821 = vmatpush3.bf16.msra.mxu0 %v6197_v3  ;;  %v6217_v23 = vld [vmem:[%s6481_s10 + $0x78] sm:$0xff]   ;;  %v6208_v24 = vld [vmem:[%s6481_s10 + $0x28] sm:$0xff]   ;;  %v6219_v25 = vld [vmem:[%s6481_s10 + $0x80] sm:$0xff]   ;;  %v388_v60 = vadd.f32 0.5, %v347_v52  ;;  %v389_v63 = vadd.f32 0.5, %v348_v53  ;;  %s297_s21 = scalar_lea.vmem [#allocation3], %s296_s17  ;;  %s11055_s25 = scalar_lea.hbm %s11105_s8, %s5556_s20 }
  0x20   : > { %5822 = vmatprep.subr.bf16.mxu0 %v11106_v1  ;;  %6146 = vmatpush3.bf16.msra.mxu1 %v6197_v3  ;;  %v6210_v26 = vld [vmem:[%s6481_s10 + $0x30] sm:$0xff]   ;;  %v6220_v27 = vld [vmem:[%s6481_s10 + $0x88] sm:$0xff]   ;;  %v6212_v28 = vld [vmem:[%s6481_s10 + $0x38] sm:$0xff]   ;;  %v351_v3 = vcvt.s32.f32 %v6655_v56  ;;  %s5356_s22 = sshll.u32 %s297_s21, 4  ;;  %s6364_s26 = smov [#allocation3]   ;;  %s11057_s22 = int_to_ptr.vmem [resolvable:$true] %s5356_s22 }
  0x21   : > { %6139 = vmatprep.subr.bf16.mxu1 %v11106_v1  ;;  %v6221_v29 = vld [vmem:[%s6481_s10 + $0x90] sm:$0xff]   ;;  %v6214_v30 = vld [vmem:[%s6481_s10 + $0x40] sm:$0xff]   ;;  %v6222_v31 = vld [vmem:[%s6481_s10 + $0x98] sm:$0xff]   ;;  %s6297_s9 = scalar_lea.vmem %s11057_s22, 16  ;;  %s6301_s12 = sshll.u32 %s6364_s26, 4  ;;  %s6302_s12 = int_to_ptr.vmem [resolvable:$false] %s6301_s12 }
  0x22   : > { %v6216_v32 = vld [vmem:[%s6481_s10 + $0x48] sm:$0xff]   ;;  %v6223_v33 = vld [vmem:[%s6481_s10 + $0xa0] ss:$0 sps:$4 sm:$0x33]   ;;  %v6218_v34 = vld [vmem:[%s6481_s10 + $0x50] sm:$0xff]   ;;  %s5344_s10 = scalar_lea.sflag [#allocation4], %s296_s17  ;;  %p6298_p11 = scmp.ne.s32.totalorder %s11057_s22, %s6297_s9 }
  0x23   : > { %5823 = vmatpush3.bf16.msra.mxu0 %v6198_v4  ;;  %v6232_v41 = vld [vmem:[%s11100_s3 + $0x20] sm:$0xff]   ;;  %v6236_v42 = vld [vmem:[%s11101_s4 + $0x30] sm:$0xff]   ;;  %v6235_v43 = vld [vmem:[%s11100_s3 + $0x28] sm:$0xff]   ;;  %s6303_s13 = scalar_lea.vmem %s6302_s12, 32  ;;  %p6304_p0 = scmp.lt.s32.totalorder %s11057_s22, %s6302_s12 }
  0x24   : > { %5824 = vmatprep.subr.bf16.mxu0 %v11106_v1  ;;  %6147 = vmatpush3.bf16.msra.mxu1 %v6198_v4  ;;  %v6237_v44 = vld [vmem:[%s11101_s4 + $0x38] sm:$0xff]   ;;  %v6240_v46 = vld [vmem:[%s11100_s3 + $0x30] sm:$0xff]   ;;  %v1614_v57 = vld [vmem:[#allocation2 + $0x4] sm:$0xc]  ;;  %v6673_v4 = vand.u32 127, %v304_v45  ;;  %p6299_p12 = pnand %p6298_p11, %p6448_p5  ;;  %p6305_p1 = scmp.lt.s32.totalorder %s6303_s13, %s6297_s9 }
  0x25   : > { %6140 = vmatprep.subr.bf16.mxu1 %v11106_v1  ;;  %v6242_v50 = vld [vmem:[%s11100_s3 + $0x38] sm:$0xff]   ;;  %v6657_v58 = vld [vmem:[#allocation2 + $0x8] sm:$0xf]  ;;  %v6666_v62 = vld [vmem:[#allocation2 + $0xc] sm:$0xf]  ;;  %v1668_v35 = vshll.u32 %v1614_v57, 16 }
  0x26   : > { %11282 = vst [vmem:[#allocation7_spill] sm:$0xff] %v6673_v4  ;;  %vm1656_vm1 = vcmp.ge.s32.totalorder %v6673_v4, 16  ;;  %vm1657_vm2 = vcmp.lt.s32.totalorder %v6673_v4, 32  ;;  %vm6716_vm6 = vmor %vm1661_vm3, %vm1662_vm4  ;;  %vm2120_vm8 = vcmp.ge.s32.totalorder %v6673_v4, 32  ;;  %vm2121_vm9 = vcmp.lt.s32.totalorder %v6673_v4, 48  ;;  %p6300_p13 = pneg %p6299_p12  ;;  %p6306_p2 = por %p6305_p1, %p6304_p0 }
  0x27   : > { %5825 = vmatpush3.bf16.msra.mxu0 %v6199_v5  ;;  %vm6707_vm5 = vmand %vm1656_vm1, %vm1657_vm2  ;;  %vm2584_vm12 = vcmp.ge.s32.totalorder %v6673_v4, 48  ;;  %vm2585_vm13 = vcmp.lt.s32.totalorder %v6673_v4, 64 }
  0x28   : > { %5826 = vmatprep.subr.bf16.mxu0 %v11106_v1  ;;  %6148 = vmatpush3.bf16.msra.mxu1 %v6199_v5  ;;  %v1665_v5 = vshrl.u32 %v1614_v57, 16  ;;  %vm6736_vm7 = vmpackc.low %vm6707_vm5, %vm6707_vm5  ;;  %p6307_p3 = pnand %p6306_p2, %p6300_p13 }
  0x29   : > { %6141 = vmatprep.subr.bf16.mxu1 %v11106_v1  ;;  %vm2122_vm10 = vmand %vm2120_vm8, %vm2121_vm9 }
  0x2a   : > { %vm6851_vm11 = vmpackc.low %vm2122_vm10, %vm2122_vm10 }
  0x2b   : > { %5827 = vmatpush3.bf16.msra.mxu0 %v6200_v6  ;;  %vm2586_vm14 = vmand %vm2584_vm12, %vm2585_vm13 }
  0x2c   : > { %5828 = vmatprep.subr.bf16.mxu0 %v11106_v1  ;;  %6149 = vmatpush3.bf16.msra.mxu1 %v6200_v6  ;;  %v1673_v6 = vshrl.u32 %v6657_v58, 16  ;;  %vm6912_vm15 = vmpackc.low %vm2586_vm14, %vm2586_vm14 }
  0x2d   : > { %6142 = vmatprep.subr.bf16.mxu1 %v11106_v1 }
  0x2f   : > { %5829 = vmatpush3.bf16.msra.mxu0 %v6201_v7 }
  0x30   : > { %5830 = vmatprep.subr.bf16.mxu0 %v11106_v1  ;;  %6150 = vmatpush3.bf16.msra.mxu1 %v6201_v7  ;;  %v1682_v7 = vshrl.u32 %v6666_v62, 16 }
  0x31   : > { %6143 = vmatprep.subr.bf16.mxu1 %v11106_v1 }
  0x33   : > { %5831 = vmatpush3.bf16.msra.mxu0 %v6202_v8 }
  0x34   : > { %6151 = vmatpush3.bf16.msra.mxu1 %v6202_v8  ;;  %6016 = vmatprep.subr.bf16.mxu0 %v11106_v1  ;;  %v428_v8 = vmul.f32 0.055555556, %v387_v59 }
  0x35   : > { %5916 = vmatprep.subr.bf16.mxu1 %v11106_v1 }
  0x36   : > { %5833 = vmatmul.mubr.bf16.vlgmr.msra.gmra.mrb[0].mxu0 %v6203_v9  ;;  %v429_v9 = vmul.f32 0.055555556, %v388_v60 }
  0x37   : > { %5836 = vmatprep.mubr.msk.bf16.mxu0 %vm11141_vm0, %v11106_v1  ;;  %5877 = vmatmul.mubr.bf16.vlgmr.msra.gmra.mrb[0].mxu1 %v6209_v10  ;;  %v352_v10 = vcvt.s32.f32 %v6664_v61  ;;  %v6822_v61 = vadd.s32 128, %v6633_v47 }
  0x38   : > { %5880 = vmatprep.mubr.msk.bf16.mxu1 %vm11141_vm0, %v11106_v1  ;;  %6017 = vmatpush3.bf16.msra.mxu0 %v6224_v11  ;;  %v6679_v11 = vadd.s32 56, %v6633_v47 }
  0x39   : > { %5917 = vmatpush3.bf16.msra.mxu1 %v6225_v12  ;;  %6018 = vmatprep.subr.bf16.mxu0 %v11106_v1  ;;  %v430_v12 = vmul.f32 0.055555556, %v389_v63 }
  0x3a   : > { %5918 = vmatprep.subr.bf16.mxu1 %v11106_v1 }
  0x3c   : > { %6019 = vmatpush3.bf16.msra.mxu0 %v6226_v13  ;;  %v390_v13 = vadd.f32 0.5, %v349_v0 }
  0x3d   : > { %5919 = vmatpush3.bf16.msra.mxu1 %v6227_v14  ;;  %6020 = vmatprep.subr.bf16.mxu0 %v11106_v1  ;;  %v391_v14 = vadd.f32 0.5, %v350_v2 }
  0x3e   : > { %5837 = vmatmul.mubr.bf16.gmra.mrb[4].mxu0 %v6204_v15  ;;  %5920 = vmatprep.subr.bf16.mxu1 %v11106_v1  ;;  %v392_v15 = vadd.f32 0.5, %v351_v3 }
  0x3f   : > { %5840 = vmatprep.mubr.msk.bf16.mxu0 %vm11141_vm0, %v11106_v1  ;;  %5881 = vmatmul.mubr.bf16.gmra.mrb[4].mxu1 %v6211_v16  ;;  %v1667_v16 = vrot.slane %v1665_v5, 7 }
  0x40   : > { %5884 = vmatprep.mubr.msk.bf16.mxu1 %vm11141_vm0, %v11106_v1  ;;  %6021 = vmatpush3.bf16.msra.mxu0 %v6228_v17  ;;  %v1675_v17 = vrot.slane %v1673_v6, 7 }
  0x41   : > { %6022 = vmatprep.subr.bf16.mxu0 %v11106_v1  ;;  %5921 = vmatpush3.bf16.msra.mxu1 %v6229_v36  ;;  %v1670_v60 = vor.u32 %v1668_v35, %v1667_v16 }
  0x42   : > { %5922 = vmatprep.subr.bf16.mxu1 %v11106_v1  ;;  %v1680_v36 = vrot.slane %v1675_v17, 4 }
  0x44   : > { %6023 = vmatpush3.bf16.msra.mxu0 %v6230_v38 }
  0x45   : > { %5923 = vmatpush3.bf16.msra.mxu1 %v6231_v37  ;;  %6024 = vmatprep.subr.bf16.mxu0 %v11106_v1 }
  0x46   : > { %5841 = vmatmul.mubr.bf16.gmra.mrb[8].mxu0 %v6205_v18  ;;  %5924 = vmatprep.subr.bf16.mxu1 %v11106_v1  ;;  %v1676_v18 = vshll.u32 %v6657_v58, 16 }
  0x47   : > { %5844 = vmatprep.mubr.msk.bf16.mxu0 %vm11141_vm0, %v11106_v1  ;;  %5885 = vmatmul.mubr.bf16.gmra.mrb[8].mxu1 %v6213_v19  ;;  %v6690_v19 = vrot.slane %v1682_v7, 7  ;;  %v6747_v7 = vld [vmem:[#allocation2 + $0x4] sm:$0x8] }
  0x48   : > { %5888 = vmatprep.mubr.msk.bf16.mxu1 %vm11141_vm0, %v11106_v1  ;;  %6025 = vmatpush3.bf16.msra.mxu0 %v6232_v41 }
  0x49   : > { %5925 = vmatpush3.bf16.msra.mxu1 %v6233_v39  ;;  %6026 = vmatprep.subr.bf16.mxu0 %v11106_v1  ;;  %11283 = vst [vmem:[#allocation8_spill] sm:$0xff] %v6690_v19 }
  0x4a   : > { %5926 = vmatprep.subr.bf16.mxu1 %v11106_v1 }
  0x4c   : > { %6027 = vmatpush3.bf16.msra.mxu0 %v6235_v43 }
  0x4d   : > { %5927 = vmatpush3.bf16.msra.mxu1 %v6234_v40  ;;  %6028 = vmatprep.subr.bf16.mxu0 %v11106_v1 }
  0x4e   : > { %5845 = vmatmul.mubr.bf16.gmra.mrb[12].mxu0 %v6206_v20  ;;  %5928 = vmatprep.subr.bf16.mxu1 %v11106_v1  ;;  %v393_v20 = vadd.f32 0.5, %v352_v10 }
  0x4f   : > { %5848 = vmatprep.mubr.msk.bf16.mxu0 %vm11141_vm0, %v11106_v1  ;;  %5889 = vmatmul.mubr.bf16.gmra.mrb[12].mxu1 %v6215_v21  ;;  %v353_v21 = vcvt.s32.f32 %v6679_v11  ;;  %v6849_v11 = vadd.s32 184, %v6633_v47 }
  0x50   : > { %5892 = vmatprep.mubr.msk.bf16.mxu1 %vm11141_vm0, %v11106_v1  ;;  %6029 = vmatpush3.bf16.msra.mxu0 %v6240_v46  ;;  %v434_v37 = vmul.f32 0.055555556, %v393_v20  ;;  %v6772_v20 = vadd.s32 80, %v6633_v47 }
  0x51   : > { %5929 = vmatpush3.bf16.msra.mxu1 %v6236_v42  ;;  %6030 = vmatprep.subr.bf16.mxu0 %v11106_v1  ;;  %v394_v38 = vadd.f32 0.5, %v353_v21 }
  0x52   : > { %5930 = vmatprep.subr.bf16.mxu1 %v11106_v1  ;;  %v6743_v63 = vfloor.f32 %v434_v37  ;;  %v11116_v54 = vcvt.s32.f32 %v6772_v20  ;;  %v6810_v37 = vadd.s32 96, %v6633_v47 }
  0x53   : > { %v435_v5 = vmul.f32 0.055555556, %v394_v38  ;;  %v6813_v38 = vadd.s32 104, %v6633_v47 }
  0x54   : > { %6031 = vmatpush3.bf16.msra.mxu0 %v6242_v50  ;;  %v11289_v50 = vmov 0 }
  0x55   : > { %5931 = vmatpush3.bf16.msra.mxu1 %v6237_v44  ;;  %v11290_v50 = vsel %vm6736_vm7, 4294967295, %v11289_v50 }
  0x56   : > { %5849 = vmatmul.mubr.bf16.gmra.mrb[16].mxu0 %v6207_v22  ;;  %6116 = vmatprep.subr.bf16.mxu1 %v11106_v1  ;;  %v6696_v22 = vadd.s32 64, %v6633_v47  ;;  %11291 = vst [vmem:[#allocation10_spill] sm:$0xff] %v11290_v50 }
  0x57   : > { %5852 = vmatprep.mubr.msk.bf16.mxu0 %vm11141_vm0, %v11106_v1  ;;  %5893 = vmatmul.mubr.bf16.gmra.mrb[16].mxu1 %v6217_v23  ;;  %v1685_v23 = vshll.u32 %v6666_v62, 16 }
  0x58   : > { %5896 = vmatprep.mubr.msk.bf16.mxu1 %vm11141_vm0, %v11106_v1  ;;  %v354_v39 = vcvt.s32.f32 %v6696_v22 }
  0x59   : > { %v1687_v40 = vor.u32 %v1685_v23, %v6690_v19  ;;  %v2078_v23 = vsel %vm6736_vm7, %v6747_v7, %v1670_v60  ;;  %v397_v60 = vadd.f32 0.5, %v11116_v54 }
  0x5a   : > { %v395_v6 = vadd.f32 0.5, %v354_v39  ;;  %v2128_v55 = vshrl.u32 %v2078_v23, 16 }
  0x5c   : > { %v436_v49 = vmul.f32 0.055555556, %v395_v6  ;;  %v5487_v6 = vrot.slane %v2128_v55, 11 }
  0x5e   : > { %5853 = vmatmul.mubr.bf16.gmra.mrb[20].mxu0 %v6208_v24  ;;  %v6699_v24 = vfloor.f32 %v428_v8  ;;  %v1688_v8 = vsel %vm6716_vm6, %v1680_v36, %v1687_v40  ;;  %v6816_v40 = vadd.s32 112, %v6633_v47 }
  0x5f   : > { %5856 = vmatprep.mubr.msk.bf16.mxu0 %vm11141_vm0, %v11106_v1  ;;  %5897 = vmatmul.mubr.bf16.gmra.mrb[20].mxu1 %v6219_v25  ;;  %v431_v25 = vmul.f32 0.055555556, %v390_v13  ;;  %v2080_v48 = vsel %vm6736_vm7, %v6666_v62, %v1688_v8 }
  0x60   : > { %5900 = vmatprep.mubr.msk.bf16.mxu1 %vm11141_vm0, %v11106_v1  ;;  %v510_v44 = vmul.f32 18.0, %v6699_v24  ;;  %vm592_vm1 = vcmp.ge.f32.partialorder %v6699_v24, 1.0  ;;  %vm633_vm2 = vcmp.le.f32.partialorder %v6699_v24, 16.0  ;;  %v11346_v24 = vmov 0 }
  0x61   : > { %v6724_v41 = vfloor.f32 %v431_v25  ;;  %vm7027_vm13 = vmand %vm592_vm1, %vm633_vm2 }
  0x66   : > { %5857 = vmatmul.mubr.bf16.gmra.mrb[24].mxu0 %v6210_v26  ;;  %v432_v26 = vmul.f32 0.055555556, %v391_v14 }
  0x67   : > { %5860 = vmatprep.mubr.msk.bf16.mxu0 %vm11141_vm0, %v11106_v1  ;;  %5901 = vmatmul.mubr.bf16.gmra.mrb[24].mxu1 %v6220_v27  ;;  %v433_v27 = vmul.f32 0.055555556, %v392_v15  ;;  %v6759_v15 = vsub.f32 %v346_v51, %v510_v44  ;;  %v516_v51 = vmul.f32 18.0, %v6743_v63 }
  0x68   : > { %5904 = vmatprep.mubr.msk.bf16.mxu1 %vm11141_vm0, %v11106_v1  ;;  %v6726_v42 = vfloor.f32 %v432_v26 }
  0x69   : > { %v6728_v43 = vfloor.f32 %v433_v27  ;;  %v6804_v56 = vsub.f32 %v352_v10, %v516_v51  ;;  %vm715_vm5 = vcmp.ge.f32.partialorder %v6759_v15, 1.0 }
  0x6b   : > { %v515_v13 = vmul.f32 18.0, %v6728_v43 }
  0x6d   : > { %v6793_v27 = vsub.f32 %v351_v3, %v515_v13  ;;  %v6807_v3 = vfloor.f32 %v436_v49  ;;  %v11110_v49 = vcvt.s32.f32 %v6822_v61 }
  0x6e   : > { %5861 = vmatmul.mubr.bf16.gmra.mrb[28].mxu0 %v6212_v28  ;;  %v6701_v28 = vfloor.f32 %v429_v9  ;;  %v513_v9 = vmul.f32 18.0, %v6724_v41 }
  0x6f   : > { %5864 = vmatprep.mubr.msk.bf16.mxu0 %vm11141_vm0, %v11106_v1  ;;  %5905 = vmatmul.mubr.bf16.gmra.mrb[28].mxu1 %v6221_v29  ;;  %v6703_v29 = vfloor.f32 %v430_v12  ;;  %v514_v12 = vmul.f32 18.0, %v6726_v42 }
  0x70   : > { %5908 = vmatprep.mubr.msk.bf16.mxu1 %vm11141_vm0, %v11106_v1  ;;  %v511_v45 = vmul.f32 18.0, %v6701_v28  ;;  %v6785_v25 = vsub.f32 %v349_v0, %v513_v9  ;;  %v6800_v0 = vadd.s32 88, %v6633_v47  ;;  %v518_v9 = vmul.f32 18.0, %v6807_v3 }
  0x71   : > { %v512_v46 = vmul.f32 18.0, %v6703_v29  ;;  %v6789_v26 = vsub.f32 %v350_v2, %v514_v12  ;;  %v6841_v12 = vadd.s32 176, %v6633_v47  ;;  %vm593_vm3 = vcmp.ge.f32.partialorder %v6701_v28, 1.0 }
  0x72   : > { %vm634_vm4 = vcmp.le.f32.partialorder %v6701_v28, 16.0  ;;  %vm635_vm10 = vcmp.le.f32.partialorder %v6703_v29, 16.0  ;;  %v7061_v28 = vadd.s32 240, %v6633_v47 }
  0x73   : > { %vm7043_vm1 = vmand %vm593_vm3, %vm634_vm4  ;;  %vm11336_vm4 = vcmp.ge.f32.partialorder %v6703_v29, 1.0 }
  0x74   : > { %vm7070_vm3 = vmand %vm7027_vm13, %vm715_vm5  ;;  %v11148_v29 = vcvt.s32.f32 %v7061_v28 }
  0x75   : > { %vm7100_vm9 = vmand %vm11336_vm4, %vm635_vm10 }
  0x76   : > { %5865 = vmatmul.mubr.bf16.gmra.mrb[32].mxu0 %v6214_v30 }
  0x77   : > { %5868 = vmatprep.mubr.msk.bf16.mxu0 %vm11141_vm0, %v11106_v1  ;;  %5909 = vmatmul.mubr.bf16.gmra.mrb[32].mxu1 %v6222_v31  ;;  %v1671_v31 = vrot.slane %v1667_v16, 4  ;;  %v6763_v16 = vsub.f32 %v347_v52, %v511_v45  ;;  %v6781_v52 = vfloor.f32 %v435_v5  ;;  %v6819_v45 = vadd.s32 120, %v6633_v47 }
  0x78   : > { %5912 = vmatprep.mubr.msk.bf16.mxu1 %vm11141_vm0, %v11106_v1  ;;  %v11115_v5 = vcvt.s32.f32 %v6800_v0 }
  0x79   : > { %v517_v2 = vmul.f32 18.0, %v6781_v52  ;;  %v11112_v51 = vcvt.s32.f32 %v6819_v45  ;;  %vm716_vm8 = vcmp.ge.f32.partialorder %v6763_v16, 1.0  ;;  %vm11345_vm13 = vcmp.le.f32.partialorder %v6763_v16, 16.0 }
  0x7a   : > { %v398_v55 = vadd.f32 0.5, %v11115_v5  ;;  %vm7086_vm5 = vmand %vm7043_vm1, %vm716_vm8  ;;  %vm11341_vm8 = vcmp.le.f32.partialorder %v6759_v15, 16.0  ;;  %v7284_v15 = vadd.s32 256, %v6633_v47 }
  0x7b   : > { %v6837_v8 = vsub.f32 %v353_v21, %v517_v2  ;;  %v11293_v21 = vmov 0  ;;  %vm7125_vm1 = vmand %vm7070_vm3, %vm11341_vm8 }
  0x7c   : > { %v11294_v21 = vsel %vm6851_vm11, 4294967295, %v11293_v21  ;;  %vm7133_vm10 = vmand %vm7086_vm5, %vm11345_vm13 }
  0x7d   : > { %11295 = vst [vmem:[#allocation12_spill] sm:$0xff] %v11294_v21  ;;  %v11347_v24 = vsel %vm7133_vm10, 4294967295, %v11346_v24 }
  0x7e   : > { %5869 = vmatmul.mubr.bf16.gmra.mrb[36].mxu0 %v6216_v32  ;;  %v1678_v32 = vor.u32 %v1676_v18, %v1675_v17  ;;  %v6767_v17 = vsub.f32 %v348_v53, %v512_v46  ;;  %v2145_v46 = vshll.u32 %v2080_v48, 16  ;;  %11348 = vst [vmem:[#allocation30_spill] sm:$0xff] %v11347_v24 }
  0x7f   : > { %5872 = vmatprep.mubr.msk.bf16.mxu0 %vm11141_vm0, %v11106_v1  ;;  %5913 = vmatmul.mubr.bf16.gmra.mrb[36].mxu1 %v6223_v33  ;;  %v6712_v33 = vadd.s32 72, %v6633_v47 }
  0x80   : > { %5932 = vmatprep.mubr.msk.bf16.mxu1 %vm11141_vm0, %v11106_v1  ;;  %v1679_v57 = vsel %vm6716_vm6, %v1671_v31, %v1678_v32  ;;  %v2126_v31 = vshll.u32 %v2078_v23, 16  ;;  %v2142_v32 = vshrl.u32 %v2080_v48, 16  ;;  %v11108_v23 = vcvt.s32.f32 %v6816_v40 }
  0x81   : > { %v355_v59 = vcvt.s32.f32 %v6712_v33  ;;  %v2079_v14 = vsel %vm6736_vm7, %v6657_v58, %v1679_v57  ;;  %v2587_v33 = vld [vmem:[#allocation2 + $0xc] sm:$0x8]  ;;  %vm11349_vm4 = vcmp.ge.f32.partialorder %v6767_v17, 1.0 }
  0x82   : > { %v2133_v53 = vshrl.u32 %v2079_v14, 16  ;;  %v2136_v44 = vshll.u32 %v2079_v14, 16  ;;  %v6824_v10 = vrot.slane %v2142_v32, 7  ;;  %v11114_v14 = vcvt.s32.f32 %v6810_v37  ;;  %vm7141_vm2 = vmand %vm7100_vm9, %vm11349_vm4 }
  0x83   : > { %v396_v18 = vadd.f32 0.5, %v355_v59  ;;  %v2542_v2 = vsel %vm6851_vm11, %v6747_v7, %v2126_v31  ;;  %v403_v7 = vadd.f32 0.5, %v11110_v49  ;;  %v11113_v31 = vcvt.s32.f32 %v6849_v11 }
  0x84   : > { %v2135_v36 = vrot.slane %v2133_v53, 7  ;;  %11292 = vst [vmem:[#allocation11_spill] sm:$0xff] %v6824_v10  ;;  %v2147_v53 = vor.u32 %v2145_v46, %v6824_v10  ;;  %v399_v46 = vadd.f32 0.5, %v11114_v14  ;;  %v6930_v14 = vadd.s32 144, %v6633_v47 }
  0x85   : > { %v437_v35 = vmul.f32 0.055555556, %v396_v18  ;;  %v11109_v18 = vcvt.s32.f32 %v6813_v38  ;;  %v410_v49 = vadd.f32 0.5, %v11113_v31  ;;  %v6927_v31 = vadd.s32 208, %v6633_v47 }
  0x86   : > { %5873 = vmatmul.mubr.bf16.gmra.mrb[40].mxu0 %v6218_v34  ;;  %v11286_v34 = vmov 0  ;;  %v2140_v13 = vrot.slane %v2135_v36, 4  ;;  %v2138_v48 = vor.u32 %v2136_v44, %v2135_v36  ;;  %v6864_v36 = vsub.f32 %v354_v39, %v518_v9 }
  0x87   : > { %6032 = vmatprep.mubr.msk.bf16.mxu0 %vm11141_vm0, %v11106_v1  ;;  %v11287_v34 = vsel %vm6716_vm6, 4294967295, %v11286_v34  ;;  %v6826_v57 = vfloor.f32 %v437_v35  ;;  %v438_v35 = vmul.f32 0.055555556, %v397_v60  ;;  %v11111_v44 = vcvt.s32.f32 %v6841_v12 }
  0x88   : > { %11288 = vst [vmem:[#allocation9_spill] sm:$0xff] %v11287_v34  ;;  %v400_v60 = vadd.f32 0.5, %v11109_v18  ;;  %v401_v1 = vadd.f32 0.5, %v11108_v23  ;;  %v2139_v22 = vsel %vm6716_vm6, %v5487_v6, %v2138_v48  ;;  %v402_v39 = vadd.f32 0.5, %v11112_v51 }
  0x89   : > { %v519_v32 = vmul.f32 18.0, %v6826_v57  ;;  %v6884_v9 = vsel %vm6716_vm6, %v2140_v13, %v2147_v53  ;;  %v6890_v23 = vfloor.f32 %v438_v35  ;;  %v439_v18 = vmul.f32 0.055555556, %v398_v55 }
  0x8a   : > { %11296 = vst [vmem:[#allocation13_spill] sm:$0xff] %v6884_v9  ;;  %v6893_v6 = vadd.s32 192, %v6633_v47  ;;  %v409_v48 = vadd.f32 0.5, %v11111_v44  ;;  %v6901_v13 = vsel %vm6851_vm11, %v6657_v58, %v2139_v22  ;;  %v440_v53 = vmul.f32 0.055555556, %v399_v46 }
  0x8b   : > { %v6888_v30 = vsub.f32 %v355_v59, %v519_v32  ;;  %v6904_v59 = vadd.s32 200, %v6633_v47  ;;  %v441_v32 = vmul.f32 0.055555556, %v400_v60  ;;  %v442_v35 = vmul.f32 0.055555556, %v401_v1 }
  0x8c   : > { %v443_v44 = vmul.f32 0.055555556, %v402_v39  ;;  %v444_v51 = vmul.f32 0.055555556, %v403_v7  ;;  %v11297_v58 = vmov 0  ;;  %v6917_v22 = vadd.s32 136, %v6633_v47 }
  0x8d   : > { %v11298_v58 = vsel %vm6912_vm15, 4294967295, %v11297_v58  ;;  %v520_v46 = vmul.f32 18.0, %v6890_v23  ;;  %v6920_v1 = vfloor.f32 %v439_v18  ;;  %v2592_v60 = vsel %vm6912_vm15, %v2587_v33, %v2542_v2 }
  0x8e   : > { %11299 = vst [vmem:[#allocation14_spill] sm:$0xff] %v11298_v58  ;;  %v450_v7 = vmul.f32 0.055555556, %v409_v48  ;;  %v6934_v18 = vfloor.f32 %v440_v53  ;;  %v6936_v5 = vfloor.f32 %v441_v32  ;;  %v6938_v2 = vfloor.f32 %v442_v35 }
  0x8f   : > { %11300 = vst [vmem:[#allocation15_spill] sm:$0xff] %v6920_v1  ;;  %v6941_v48 = vadd.s32 216, %v6633_v47  ;;  %v6945_v33 = vfloor.f32 %v443_v44  ;;  %v6947_v55 = vfloor.f32 %v444_v51  ;;  %v451_v39 = vmul.f32 0.055555556, %v410_v49 }
  0x90   : > { %11301 = vst [vmem:[#allocation16_spill] sm:$0xff] %v6934_v18  ;;  %11302 = vst [vmem:[#allocation17_spill] sm:$0xff] %v6936_v5  ;;  %v11306_v53 = vcvt.s32.f32 %v6772_v20  ;;  %v521_v35 = vmul.f32 18.0, %v6920_v1  ;;  %v6955_v10 = vshrl.u32 %v2592_v60, 16  ;;  %v11309_v50 = vcvt.s32.f32 %v6893_v6 }
  0x91   : > { %11303 = vst [vmem:[#allocation18_spill] sm:$0xff] %v6938_v2  ;;  %11304 = vst [vmem:[#allocation19_spill] sm:$0xff] %v6945_v33  ;;  %v6960_v44 = vfloor.f32 %v450_v7  ;;  %v11310_v51 = vcvt.s32.f32 %v6904_v59  ;;  %v523_v60 = vmul.f32 18.0, %v6936_v5  ;;  %v525_v7 = vmul.f32 18.0, %v6945_v33 }
  0x92   : > { %11305 = vst [vmem:[#allocation20_spill] sm:$0xff] %v6947_v55  ;;  %v6952_v32 = vsub.f32 %v11306_v53, %v520_v46  ;;  %11308 = vst [vmem:[#allocation22_spill] sm:$0xff] %v6955_v10  ;;  %v411_v34 = vadd.f32 0.5, %v11309_v50  ;;  %v522_v46 = vmul.f32 18.0, %v6934_v18  ;;  %v524_v53 = vmul.f32 18.0, %v6938_v2 }
  0x93   : > { %v412_v49 = vadd.f32 0.5, %v11310_v51  ;;  %v526_v51 = vmul.f32 18.0, %v6947_v55  ;;  %v6975_v54 = vfloor.f32 %v451_v39  ;;  %v11311_v20 = vcvt.s32.f32 %v6917_v22 }
  0x94   : > { %11307 = vst [vmem:[#allocation21_spill] sm:$0xff] %v6952_v32  ;;  %v11312_v18 = vcvt.s32.f32 %v6800_v0  ;;  %v452_v50 = vmul.f32 0.055555556, %v411_v34  ;;  %v6985_v1 = vadd.s32 152, %v6633_v47  ;;  %v532_v4 = vmul.f32 18.0, %v6960_v44 }
  0x95   : > { %v404_v19 = vadd.f32 0.5, %v11311_v20  ;;  %v453_v33 = vmul.f32 0.055555556, %v412_v49  ;;  %v11314_v55 = vcvt.s32.f32 %v6927_v31  ;;  %v11315_v32 = vcvt.s32.f32 %v6930_v14 }
  0x96   : > { %v6981_v5 = vsub.f32 %v11312_v18, %v521_v35  ;;  %v11316_v34 = vcvt.s32.f32 %v6810_v37  ;;  %v11317_v18 = vcvt.s32.f32 %v6813_v38  ;;  %v11318_v49 = vcvt.s32.f32 %v6816_v40 }
  0x97   : > { %v413_v39 = vadd.f32 0.5, %v11314_v55  ;;  %v405_v9 = vadd.f32 0.5, %v11315_v32  ;;  %v11319_v32 = vcvt.s32.f32 %v6941_v48  ;;  %v11320_v2 = vcvt.s32.f32 %v6819_v45 }
  0x98   : > { %11313 = vst [vmem:[#allocation23_spill] sm:$0xff] %v6981_v5  ;;  %v6997_v0 = vsub.f32 %v11316_v34, %v522_v46  ;;  %v7001_v35 = vsub.f32 %v11317_v18, %v523_v60  ;;  %v7005_v55 = vsub.f32 %v11318_v49, %v524_v53  ;;  %v11321_v5 = vcvt.s32.f32 %v6822_v61 }
  0x99   : > { %v414_v20 = vadd.f32 0.5, %v11319_v32  ;;  %v7011_v10 = vsub.f32 %v11320_v2, %v525_v7  ;;  %v533_v46 = vmul.f32 18.0, %v6975_v54  ;;  %v445_v38 = vmul.f32 0.055555556, %v404_v19 }
  0x9a   : > { %v7015_v37 = vsub.f32 %v11321_v5, %v526_v51  ;;  %vm614_vm0 = vcmp.ge.f32.partialorder %v6960_v44, 1.0  ;;  %vm655_vm14 = vcmp.le.f32.partialorder %v6960_v44, 16.0  ;;  %v7020_v40 = vfloor.f32 %v452_v50 }
  0x9b   : > { %v11143_v60 = vcvt.s32.f32 %v6985_v1  ;;  %v11325_v19 = vcvt.s32.f32 %v6841_v12  ;;  %v7037_v5 = vfloor.f32 %v453_v33  ;;  %v454_v2 = vmul.f32 0.055555556, %v413_v39  ;;  %vm7156_vm5 = vmand %vm614_vm0, %vm655_vm14 }
  0x9c   : > { %11322 = vst [vmem:[#allocation24_spill] sm:$0xff] %v7015_v37  ;;  %v446_v53 = vmul.f32 0.055555556, %v405_v9  ;;  %v455_v50 = vmul.f32 0.055555556, %v414_v20  ;;  %v7049_v7 = vadd.s32 224, %v6633_v47  ;;  %v11328_v12 = vcvt.s32.f32 %v6849_v11 }
  0x9d   : > { %v7035_v61 = vsub.f32 %v11325_v19, %v532_v4  ;;  %v7052_v4 = vadd.s32 232, %v6633_v47  ;;  %v7058_v33 = vfloor.f32 %v445_v38  ;;  %v7064_v51 = vadd.s32 160, %v6633_v47 }
  0x9e   : > { %v7056_v9 = vsub.f32 %v11328_v12, %v533_v46  ;;  %vm656_vm12 = vcmp.le.f32.partialorder %v6975_v54, 16.0  ;;  %v534_v11 = vmul.f32 18.0, %v7020_v40  ;;  %v406_v34 = vadd.f32 0.5, %v11143_v60 }
  0x9f   : > { %11329 = vst [vmem:[#allocation25_spill] sm:$0xff] %v7058_v33  ;;  %v7080_v18 = vadd.s32 248, %v6633_v47  ;;  %v535_v32 = vmul.f32 18.0, %v7037_v5  ;;  %v7092_v20 = vfloor.f32 %v454_v2  ;;  %v7094_v46 = vfloor.f32 %v446_v53 }
  0xa0   : > { %v7106_v45 = vfloor.f32 %v455_v50  ;;  %v527_v53 = vmul.f32 18.0, %v7058_v33  ;;  %v11340_v12 = vcvt.s32.f32 %v6893_v6  ;;  %v447_v60 = vmul.f32 0.055555556, %v406_v34 }
  0xa1   : > { %11334 = vst [vmem:[#allocation26_spill] sm:$0xff] %v7092_v20  ;;  %11335 = vst [vmem:[#allocation27_spill] sm:$0xff] %v7094_v46  ;;  %v11342_v2 = vmov 0  ;;  %v11352_v6 = vcvt.s32.f32 %v6904_v59  ;;  %v536_v16 = vmul.f32 18.0, %v7092_v20  ;;  %v11355_v59 = vcvt.s32.f32 %v7049_v7 }
  0xa2   : > { %11339 = vst [vmem:[#allocation28_spill] sm:$0xff] %v7106_v45  ;;  %v7118_v50 = vsub.f32 %v11340_v12, %v534_v11  ;;  %v11343_v2 = vsel %vm7125_vm1, 4294967295, %v11342_v2  ;;  %v528_v11 = vmul.f32 18.0, %v7094_v46  ;;  %v537_v49 = vmul.f32 18.0, %v7106_v45 }
  0xa3   : > { %11344 = vst [vmem:[#allocation29_spill] sm:$0xff] %v11343_v2  ;;  %v7148_v39 = vsub.f32 %v11352_v6, %v535_v32  ;;  %v415_v32 = vadd.f32 0.5, %v11355_v59  ;;  %v11356_v38 = vcvt.s32.f32 %v7052_v4  ;;  %v7169_v6 = vld [vmem:[%s11099_s2] ss:$0 sm:$0xff]  ;;  %vm11357_vm13 = vcmp.ge.f32.partialorder %v6975_v54, 1.0 }
  0xa4   : > { %vm7177_vm8 = vmand %vm11357_vm13, %vm656_vm12  ;;  %v11360_v59 = vcvt.s32.f32 %v6917_v22  ;;  %v417_v19 = vadd.f32 0.5, %v11148_v29  ;;  %v11362_v46 = vcvt.s32.f32 %v7064_v51  ;;  %vm11363_vm0 = vcmp.le.f32.partialorder %v6724_v41, 16.0 }
  0xa5   : > { %v416_v12 = vadd.f32 0.5, %v11356_v38  ;;  %vm11364_vm14 = vcmp.ge.f32.partialorder %v6724_v41, 1.0  ;;  %vm658_vm3 = vcmp.le.f32.partialorder %v7037_v5, 16.0  ;;  %v7200_v22 = vfloor.f32 %v447_v60 }
  0xa6   : > { %v7183_v38 = vsub.f32 %v11360_v59, %v527_v53  ;;  %v407_v45 = vadd.f32 0.5, %v11362_v46  ;;  %vm7194_vm12 = vmand %vm11364_vm14, %vm11363_vm0  ;;  %v11367_v53 = vcvt.s32.f32 %v7080_v18  ;;  %vm11368_vm4 = vcmp.ge.f32.partialorder %v7035_v61, 1.0 }
  0xa7   : > { %vm7208_vm9 = vmand %vm7156_vm5, %vm11368_vm4  ;;  %v11371_v46 = vcvt.s32.f32 %v6927_v31  ;;  %v7223_v33 = vadd.s32 168, %v6633_v47  ;;  %vm11374_vm4 = vcmp.ge.f32.partialorder %v7056_v9, 1.0  ;;  %vm11378_vm14 = vcmp.ge.f32.partialorder %v6785_v25, 1.0 }
  0xa8   : > { %11361 = vst [vmem:[#allocation31_spill] sm:$0xff] %v7183_v38  ;;  %v418_v59 = vadd.f32 0.5, %v11367_v53  ;;  %v11372_v38 = vcvt.s32.f32 %v6930_v14  ;;  %vm7231_vm0 = vmand %vm7177_vm8, %vm11374_vm4  ;;  %v11377_v14 = vcvt.s32.f32 %v6941_v48  ;;  %v448_v48 = vmul.f32 0.055555556, %v407_v45 }
  0xa9   : > { %v7216_v60 = vsub.f32 %v11371_v46, %v536_v16  ;;  %vm7243_vm5 = vmand %vm7194_vm12, %vm11378_vm14  ;;  %vm11381_vm14 = vcmp.le.f32.partialorder %v7035_v61, 16.0  ;;  %v7262_v45 = vmul.f32 18.0, %v7200_v22  ;;  %vm11385_vm8 = vcmp.le.f32.partialorder %v6767_v17, 16.0 }
  0xaa   : > { %v7220_v53 = vsub.f32 %v11372_v38, %v528_v11  ;;  %v7237_v16 = vsub.f32 %v11377_v14, %v537_v49  ;;  %v456_v11 = vmul.f32 0.055555556, %v415_v32  ;;  %v457_v38 = vmul.f32 0.055555556, %v416_v12  ;;  %vm7257_vm13 = vmand %vm7208_vm9, %vm11381_vm14 }
  0xab   : > { %v11157_v49 = vcvt.s32.f32 %v7223_v33  ;;  %v459_v54 = vmul.f32 0.055555556, %v418_v59  ;;  %vm7268_vm4 = vmand %vm7141_vm2, %vm11385_vm8  ;;  %vm11389_vm12 = vcmp.le.f32.partialorder %v7056_v9, 16.0  ;;  %v11390_v41 = vmov 0 }
  0xac   : > { %11373 = vst [vmem:[#allocation32_spill] sm:$0xff] %v7220_v53  ;;  %v458_v53 = vmul.f32 0.055555556, %v417_v19  ;;  %vm7276_vm9 = vmand %vm7231_vm0, %vm11389_vm12  ;;  %vm11393_vm8 = vcmp.le.f32.partialorder %v7020_v40, 16.0  ;;  %vm11394_vm14 = vcmp.ge.f32.partialorder %v7020_v40, 1.0  ;;  %v7295_v31 = vfloor.f32 %v456_v11 }
  0xad   : > { %v11391_v41 = vsel %vm7276_vm9, 4294967295, %v11390_v41  ;;  %v408_v17 = vadd.f32 0.5, %v11157_v49  ;;  %vm7291_vm0 = vmand %vm11394_vm14, %vm11393_vm8  ;;  %vm11398_vm12 = vcmp.le.f32.partialorder %v6785_v25, 16.0  ;;  %vm11405_vm14 = vcmp.ge.f32.partialorder %v7118_v50, 1.0 }
  0xae   : > { %11392 = vst [vmem:[#allocation35_spill] sm:$0xff] %v11391_v41  ;;  %vm7306_vm2 = vmand %vm7243_vm5, %vm11398_vm12  ;;  %vm11402_vm12 = vcmp.ge.f32.partialorder %v7037_v5, 1.0 }
  0xaf   : > { %vm7324_vm8 = vmand %vm11402_vm12, %vm658_vm3  ;;  %vm11408_vm12 = vcmp.le.f32.partialorder %v6726_v42, 16.0 }
  0xb0   : > { %vm7339_vm3 = vmand %vm7291_vm0, %vm11405_vm14  ;;  %vm11417_vm0 = vcmp.le.f32.partialorder %v7118_v50, 16.0  ;;  %vm11431_vm14 = vcmp.ge.f32.partialorder %v6728_v43, 1.0 }
 0x109   : > { %v1158_v29 = vpop.f32.mrb[0].mxu0 }
 0x10a   : > { %v1159_v34 = vadd.f32 %v7169_v6, %v1158_v29  ;;  %v5834_v20 = vpop.f32.mrb[1].mxu0  ;;  %v1246_v37 = vpop.f32.mrb[0].mxu1 }
 0x10b   : > { %v1161_v46 = vpop.f32.mrb[2].mxu0  ;;  %v1247_v29 = vadd.f32 %v7169_v6, %v1246_v37  ;;  %v5878_v44 = vpop.f32.mrb[1].mxu1  ;;  %v11382_v37 = vmov 0  ;;  %v11418_v20 = vmov 0 }
 0x10c   : > { %v1324_v32 = vmax.f32 %v1159_v34, 0.0  ;;  %v1162_v12 = vadd.f32 %v7169_v6, %v1161_v46  ;;  %v5835_v14 = vpop.f32.mrb[3].mxu0  ;;  %v11383_v37 = vsel %vm7257_vm13, 4294967295, %v11382_v37  ;;  %v1249_v19 = vpop.f32.mrb[2].mxu1  ;;  %v11386_v34 = vmov 0 }
 0x10d   : > { %11384 = vst [vmem:[#allocation33_spill] sm:$0xff] %v11383_v37  ;;  %v11387_v34 = vsel %vm7268_vm4, 4294967295, %v11386_v34  ;;  %v1346_v61 = vmax.f32 %v1247_v29, 0.0  ;;  %v1250_v46 = vadd.f32 %v7169_v6, %v1249_v19  ;;  %v5879_v59 = vpop.f32.mrb[3].mxu1  ;;  %v7297_v29 = vfloor.f32 %v457_v38 }
 0x10e   : > { %11388 = vst [vmem:[#allocation34_spill] sm:$0xff] %v11387_v34  ;;  %v1325_v44 = vmax.f32 %v1162_v12, 0.0  ;;  %v7300_v14 = vadd.s32 264, %v6633_v47  ;;  %v11399_v12 = vmov 0  ;;  %v449_v19 = vmul.f32 0.055555556, %v408_v17 }
 0x10f   : > { %v11400_v12 = vsel %vm7306_vm2, 4294967295, %v11399_v12  ;;  %v1387_v40 = vsel %vm7257_vm13, %v1346_v61, 0.0  ;;  %v1347_v11 = vmax.f32 %v1250_v46, 0.0  ;;  %v11159_v38 = vcvt.s32.f32 %v7284_v15 }
 0x110   : > { %11397 = vst [vmem:[#allocation36_spill] sm:$0xff] %v7300_v14  ;;  %11401 = vst [vmem:[#allocation37_spill] sm:$0xff] %v11400_v12  ;;  %v1365_v59 = vsel %vm7125_vm1, %v1324_v32, 0.0  ;;  %v1366_v25 = vsel %vm7133_vm10, %v1325_v44, 0.0  ;;  %v7328_v61 = vfloor.f32 %v458_v53  ;;  %v7343_v53 = vfloor.f32 %v448_v48 }
 0x111   : > { %v5603_v32 = vpack.c.bf16 %v1366_v25, %v1365_v59  ;;  %v1166_v17 = vpop.f32.mrb[4].mxu0  ;;  %v1388_v44 = vsel %vm7276_vm9, %v1347_v11, 0.0  ;;  %v419_v59 = vadd.f32 0.5, %v11159_v38  ;;  %vm11409_vm13 = vcmp.ge.f32.partialorder %v6726_v42, 1.0 }
 0x112   : > { %v1167_v25 = vadd.f32 %v7169_v6, %v1166_v17  ;;  %v5838_v49 = vpop.f32.mrb[5].mxu0  ;;  %vm7352_vm5 = vmand %vm11409_vm13, %vm11408_vm12  ;;  %v5658_v9 = vpack.c.bf16 %v1388_v44, %v1387_v40  ;;  %v1254_v46 = vpop.f32.mrb[4].mxu1  ;;  %v7357_v48 = vfloor.f32 %v459_v54  ;;  %v7359_v41 = vfloor.f32 %v449_v19 }
 0x113   : > { %5700 = vst [vmem:[#allocation2 + $0x10] sm:$0xff] %v5603_v32   ;;  %v1169_v38 = vpop.f32.mrb[6].mxu0  ;;  %v1255_v49 = vadd.f32 %v7169_v6, %v1254_v46  ;;  %v5882_v17 = vpop.f32.mrb[5].mxu1  ;;  %vm11413_vm13 = vcmp.ge.f32.partialorder %v7148_v39, 1.0  ;;  %v538_v54 = vmul.f32 18.0, %v7295_v31  ;;  %v539_v40 = vmul.f32 18.0, %v7297_v29 }
 0x114   : > { %11412 = vst [vmem:[#allocation38_spill] sm:$0xff] %v7359_v41  ;;  %vm7367_vm12 = vmand %vm7324_vm8, %vm11413_vm13  ;;  %v11416_v19 = vcvt.s32.f32 %v7300_v14  ;;  %v1326_v44 = vmax.f32 %v1167_v25, 0.0  ;;  %v1170_v37 = vadd.f32 %v7169_v6, %v1169_v38  ;;  %v5839_v46 = vpop.f32.mrb[7].mxu0  ;;  %v1257_v17 = vpop.f32.mrb[6].mxu1  ;;  %v540_v24 = vmul.f32 18.0, %v7328_v61 }
 0x115   : > { %5711 = vst [vmem:[#allocation2 + $0x68] sm:$0xff] %v5658_v9   ;;  %vm7381_vm8 = vmand %vm7339_vm3, %vm11417_vm0  ;;  %v460_v2 = vmul.f32 0.055555556, %v419_v59  ;;  %vm11421_vm13 = vcmp.ge.f32.partialorder %v6789_v26, 1.0  ;;  %v1348_v50 = vmax.f32 %v1255_v49, 0.0  ;;  %v1258_v5 = vadd.f32 %v7169_v6, %v1257_v17  ;;  %v5883_v25 = vpop.f32.mrb[7].mxu1 }
 0x116   : > { %v420_v32 = vadd.f32 0.5, %v11416_v19  ;;  %v11419_v20 = vsel %vm7381_vm8, 4294967295, %v11418_v20  ;;  %vm7390_vm9 = vmand %vm7352_vm5, %vm11421_vm13  ;;  %v11424_v9 = vcvt.s32.f32 %v6985_v1  ;;  %v530_v19 = vmul.f32 18.0, %v7343_v53 }
 0x117   : > { %11420 = vst [vmem:[#allocation39_spill] sm:$0xff] %v11419_v20  ;;  %v1327_v11 = vmax.f32 %v1170_v37, 0.0  ;;  %vm11425_vm3 = vcmp.le.f32.partialorder %v7148_v39, 16.0  ;;  %v11426_v46 = vmov 0  ;;  %v541_v49 = vmul.f32 18.0, %v7357_v48  ;;  %v11482_v20 = vld [vmem:[#allocation8_spill] sm:$0xff] }
 0x118   : > { %v7400_v59 = vsub.f32 %v11424_v9, %v7262_v45  ;;  %vm7408_vm0 = vmand %vm7367_vm12, %vm11425_vm3  ;;  %v531_v17 = vmul.f32 18.0, %v7359_v41  ;;  %v7414_v1 = vfloor.f32 %v460_v2  ;;  %vm11430_vm13 = vcmp.le.f32.partialorder %v6728_v43, 16.0 }
 0x119   : > { %v11427_v46 = vsel %vm7408_vm0, 4294967295, %v11426_v46  ;;  %vm7420_vm10 = vmand %vm11431_vm14, %vm11430_vm13  ;;  %v1389_v39 = vsel %vm7381_vm8, %v1348_v50, 0.0  ;;  %v1349_v45 = vmax.f32 %v1258_v5, 0.0  ;;  %v11434_v42 = vcvt.s32.f32 %v7049_v7 }
 0x11a   : > { %11428 = vst [vmem:[#allocation40_spill] sm:$0xff] %v11427_v46  ;;  %11429 = vst [vmem:[#allocation41_spill] sm:$0xff] %v7414_v1  ;;  %v461_v2 = vmul.f32 0.055555556, %v420_v32  ;;  %v1367_v9 = vsel %vm7268_vm4, %v1326_v44, 0.0  ;;  %v1368_v43 = vsel %vm7306_vm2, %v1327_v11, 0.0  ;;  %v11435_v47 = vcvt.s32.f32 %v7052_v4 }
 0x11b   : > { %v7429_v25 = vsub.f32 %v11434_v42, %v538_v54  ;;  %v11436_v50 = vcvt.s32.f32 %v7061_v28  ;;  %v5608_v7 = vpack.c.bf16 %v1368_v43, %v1367_v9  ;;  %vm11437_vm12 = vcmp.le.f32.partialorder %v6789_v26, 16.0  ;;  %v1174_v32 = vpop.f32.mrb[8].mxu0  ;;  %v7476_v38 = vld [vmem:[#allocation2 + $0x14] sm:$0xf]  ;;  %v1262_v11 = vpop.f32.mrb[8].mxu1 }
 0x11c   : > { %v7438_v14 = vsub.f32 %v11435_v47, %v539_v40  ;;  %vm7448_vm3 = vmand %vm7390_vm9, %vm11437_vm12  ;;  %v11438_v54 = vmov 0  ;;  %v1390_v47 = vsel %vm7408_vm0, %v1349_v45, 0.0  ;;  %v11441_v4 = vcvt.s32.f32 %v7064_v51  ;;  %v5842_v40 = vpop.f32.mrb[9].mxu0  ;;  %v7474_v51 = vld [vmem:[#allocation2 + $0x10] sm:$0xf] }
 0x11d   : > { %v7442_v5 = vsub.f32 %v11436_v50, %v540_v24  ;;  %v11439_v54 = vsel %vm7448_vm3, 4294967295, %v11438_v54  ;;  %v7461_v26 = vmul.f32 18.0, %v7414_v1  ;;  %v1175_v24 = vadd.f32 %v7169_v6, %v1174_v32  ;;  %5701 = vst [vmem:[#allocation2 + $0x18] sm:$0xff] %v5608_v7   ;;  %v1177_v43 = vpop.f32.mrb[10].mxu0  ;;  %v11469_v44 = vld [vmem:[#allocation7_spill] sm:$0xff] }
 0x11e   : > { %11440 = vst [vmem:[#allocation42_spill] sm:$0xff] %v11439_v54  ;;  %v7458_v28 = vsub.f32 %v11441_v4, %v530_v19  ;;  %vm11443_vm9 = vcmp.ge.f32.partialorder %v6793_v27, 1.0  ;;  %v5663_v19 = vpack.c.bf16 %v1390_v47, %v1389_v39  ;;  %v11446_v45 = vcvt.s32.f32 %v7080_v18  ;;  %v5843_v47 = vpop.f32.mrb[11].mxu0  ;;  %v11459_v4 = vld [vmem:[#allocation13_spill] sm:$0xff]  ;;  %v11477_v46 = vld [vmem:[#allocation15_spill] sm:$0xff] }
 0x11f   : > { %vm7468_vm12 = vmand %vm7420_vm10, %vm11443_vm9  ;;  %v11448_v37 = vcvt.s32.f32 %v7223_v33  ;;  %vm11450_vm10 = vcmp.le.f32.partialorder %v6743_v63, 16.0  ;;  %vm11451_vm9 = vcmp.ge.f32.partialorder %v6743_v63, 1.0  ;;  %v1691_v18 = vshrl.u32 %v7474_v51, 16 }
 0x120   : > { %11442 = vst [vmem:[#allocation43_spill] sm:$0xff] %v7458_v28  ;;  %v7480_v42 = vsub.f32 %v11446_v45, %v541_v49  ;;  %vm7490_vm13 = vmand %vm11451_vm9, %vm11450_vm10  ;;  %v1694_v49 = vshll.u32 %v7474_v51, 16  ;;  %v1700_v33 = vshrl.u32 %v7476_v38, 16  ;;  %v7498_v39 = vfloor.f32 %v461_v2 }
 0x121   : > { %v7484_v9 = vsub.f32 %v11448_v37, %v531_v17  ;;  %v5886_v17 = vpop.f32.mrb[9].mxu1  ;;  %v1328_v7 = vmax.f32 %v1175_v24, 0.0  ;;  %v1178_v32 = vadd.f32 %v7169_v6, %v1177_v43  ;;  %vm11455_vm10 = vcmp.le.f32.partialorder %v6781_v52, 16.0  ;;  %5712 = vst [vmem:[#allocation2 + $0x70] sm:$0xff] %v5663_v19  }
 0x122   : > { %11447 = vst [vmem:[#allocation44_spill] sm:$0xff] %v7480_v42  ;;  %11454 = vst [vmem:[#allocation46_spill] sm:$0xff] %v7498_v39  ;;  %vm11456_vm9 = vcmp.ge.f32.partialorder %v6781_v52, 1.0  ;;  %v2593_v2 = vsel %vm6912_vm15, %v7474_v51, %v6901_v13  ;;  %v11460_v24 = vsel %vm6851_vm11, %v6666_v62, %v11459_v4  ;;  %v1265_v40 = vpop.f32.mrb[10].mxu1  ;;  %v11462_v45 = vmov 0  ;;  %v11465_v13 = vld [vmem:[#allocation21_spill] sm:$0xff] }
 0x123   : > { %11449 = vst [vmem:[#allocation45_spill] sm:$0xff] %v7484_v9  ;;  %vm7505_vm5 = vmand %vm11456_vm9, %vm11455_vm10  ;;  %v7522_v52 = vsel %vm6912_vm15, %v7476_v38, %v11460_v24  ;;  %vm11461_vm10 = vcmp.le.f32.partialorder %v6793_v27, 16.0  ;;  %v1693_v37 = vrot.slane %v1691_v18, 7  ;;  %v7533_v43 = vrot.slane %v1700_v33, 7  ;;  %v5887_v47 = vpop.f32.mrb[11].mxu1  ;;  %v11500_v9 = vld [vmem:[#allocation23_spill] sm:$0xff] }
 0x124   : > { %vm7528_vm9 = vmand %vm7468_vm12, %vm11461_vm10  ;;  %v1703_v62 = vshll.u32 %v7476_v38, 16  ;;  %v2644_v17 = vshrl.u32 %v2593_v2, 16  ;;  %v1369_v19 = vsel %vm7448_vm3, %v1328_v7, 0.0  ;;  %v1329_v4 = vmax.f32 %v1178_v32, 0.0  ;;  %v1182_v47 = vpop.f32.mrb[12].mxu0 }
 0x125   : > { %v11463_v45 = vsel %vm7528_vm9, 4294967295, %v11462_v45  ;;  %vm11466_vm0 = vcmp.ge.f32.partialorder %v6804_v56, 1.0  ;;  %v2647_v18 = vshll.u32 %v2593_v2, 16  ;;  %v2653_v33 = vshrl.u32 %v7522_v52, 16  ;;  %v5846_v27 = vpop.f32.mrb[13].mxu0 }
 0x126   : > { %11464 = vst [vmem:[#allocation13_spill] sm:$0xff] %v11463_v45  ;;  %vm7542_vm12 = vmand %vm7490_vm13, %vm11466_vm0  ;;  %vm11470_vm8 = vcmp.ge.f32.partialorder %v6837_v8, 1.0  ;;  %v1696_v50 = vor.u32 %v1694_v49, %v1693_v37  ;;  %v1698_v32 = vrot.slane %v1693_v37, 4  ;;  %v1705_v24 = vor.u32 %v1703_v62, %v7533_v43  ;;  %v11495_v27 = vld [vmem:[#allocation17_spill] sm:$0xff] }
 0x127   : > { %vm7553_vm3 = vmand %vm7505_vm5, %vm11470_vm8  ;;  %v1370_v2 = vsel %vm7528_vm9, %v1329_v4, 0.0  ;;  %vm11473_vm13 = vcmp.le.f32.partialorder %v6807_v3, 16.0  ;;  %vm11474_vm10 = vcmp.ge.f32.partialorder %v6807_v3, 1.0  ;;  %v7574_v37 = vrot.slane %v2644_v17, 7 }
 0x128   : > { %vm7566_vm14 = vmand %vm11474_vm10, %vm11473_vm13  ;;  %v7576_v62 = vrot.slane %v2653_v33, 7  ;;  %v5613_v4 = vpack.c.bf16 %v1370_v2, %v1369_v19  ;;  %vm11478_vm9 = vcmp.le.f32.partialorder %v6804_v56, 16.0  ;;  %v11479_v3 = vmov 0  ;;  %v7595_v19 = vld [vmem:[#allocation2 + $0x1c] sm:$0xf] }
 0x129   : > { %vm7582_vm10 = vmand %vm7542_vm12, %vm11478_vm9  ;;  %v11483_v45 = vrot.slane %v11482_v20, 4  ;;  %v1706_v17 = vsel %vm6716_vm6, %v1698_v32, %v1705_v24  ;;  %v7593_v33 = vadd.f32 %v7169_v6, %v1262_v11  ;;  %v1183_v56 = vadd.f32 %v7169_v6, %v1182_v47  ;;  %v7619_v24 = vpop.f32.mrb[12].mxu1  ;;  %v1185_v47 = vpop.f32.mrb[14].mxu0 }
 0x12a   : > { %v11480_v3 = vsel %vm7582_vm10, 4294967295, %v11479_v3  ;;  %vm11485_vm9 = vcmp.le.f32.partialorder %v6837_v8, 16.0  ;;  %v11486_v20 = vmov 0  ;;  %v2082_v8 = vsel %vm6736_vm7, %v7476_v38, %v1706_v17  ;;  %11491 = vst [vmem:[#allocation15_spill] sm:$0xff] %v7619_v24  ;;  %5702 = vst [vmem:[#allocation2 + $0x20] sm:$0xff] %v5613_v4   ;;  %v5847_v39 = vpop.f32.mrb[15].mxu0 }
 0x12b   : > { %11481 = vst [vmem:[#allocation21_spill] sm:$0xff] %v11480_v3  ;;  %v1697_v12 = vsel %vm6716_vm6, %v11483_v45, %v1696_v50  ;;  %vm7602_vm12 = vmand %vm7553_vm3, %vm11485_vm9  ;;  %v7606_v45 = vld [vmem:[#allocation2 + $0x18] sm:$0xe]  ;;  %v7617_v7 = vadd.f32 %v7169_v6, %v1265_v40  ;;  %vm11492_vm3 = vcmp.ge.f32.partialorder %v6864_v36, 1.0  ;;  %v2160_v4 = vshrl.u32 %v2082_v8, 16  ;;  %v5890_v28 = vpop.f32.mrb[13].mxu1 }
 0x12c   : > { %v11487_v20 = vsel %vm7602_vm12, 4294967295, %v11486_v20  ;;  %v11489_v50 = vld [vmem:[#allocation16_spill] sm:$0xff]  ;;  %v2081_v32 = vsel %vm6736_vm7, %v7474_v51, %v1697_v12  ;;  %vm7625_vm9 = vmand %vm7566_vm14, %vm11492_vm3  ;;  %v5489_v12 = vcombine.low %v7606_v45, %v7595_v19  ;;  %v2649_v49 = vor.u32 %v2647_v18, %v7574_v37  ;;  %v7658_v42 = vpop.f32.mrb[14].mxu1  ;;  %v11517_v39 = vld [vmem:[#allocation11_spill] sm:$0xff] }
 0x12d   : > { %11488 = vst [vmem:[#allocation7_spill] sm:$0xff] %v11487_v20  ;;  %v7633_v40 = vld [vmem:[#allocation2 + $0x18] sm:$0xf]  ;;  %v2151_v17 = vshrl.u32 %v2081_v32, 16  ;;  %v1330_v34 = vmax.f32 %v1183_v56, 0.0  ;;  %v1186_v63 = vadd.f32 %v7169_v6, %v1185_v47  ;;  %vm11496_vm14 = vcmp.le.f32.partialorder %v6826_v57, 16.0 }
 0x12e   : > { %vm11497_vm3 = vcmp.ge.f32.partialorder %v6826_v57, 1.0  ;;  %v1709_v41 = vshrl.u32 %v7633_v40, 16  ;;  %v2154_v24 = vshll.u32 %v2081_v32, 16  ;;  %vm11501_vm5 = vcmp.le.f32.partialorder %v6890_v23, 16.0  ;;  %11506 = vst [vmem:[#allocation9_spill] sm:$0xff] %v7658_v42  ;;  %v11539_v3 = vld [vmem:[#allocation18_spill] sm:$0xff] }
 0x12f   : > { %vm7641_vm0 = vmand %vm11497_vm3, %vm11496_vm14  ;;  %vm11502_vm8 = vcmp.ge.f32.partialorder %v6890_v23, 1.0  ;;  %v4187_v18 = vshrl.u32 %v5489_v12, 16  ;;  %v4190_v57 = vshll.u32 %v5489_v12, 16  ;;  %v2153_v56 = vrot.slane %v2151_v17, 7  ;;  %v5891_v17 = vpop.f32.mrb[15].mxu1 }
 0x130   : > { %vm7651_vm2 = vmand %vm11502_vm8, %vm11501_vm5  ;;  %v7656_v47 = vrot.slane %v2160_v4, 7  ;;  %v1331_v11 = vmax.f32 %v1186_v63, 0.0  ;;  %vm11507_vm3 = vcmp.le.f32.partialorder %v6864_v36, 16.0  ;;  %v11508_v23 = vmov 0 }
 0x131   : > { %vm7664_vm13 = vmand %vm7625_vm9, %vm11507_vm3  ;;  %v7669_v28 = vrot.slane %v1709_v41, 7  ;;  %v1712_v32 = vshll.u32 %v7633_v40, 16  ;;  %v2163_v12 = vshll.u32 %v2082_v8, 16  ;;  %vm11511_vm5 = vcmp.ge.f32.partialorder %v6888_v30, 1.0  ;;  %v7724_v20 = vld [vmem:[#allocation2 + $0x24] sm:$0xf] }
 0x132   : > { %11505 = vst [vmem:[#allocation8_spill] sm:$0xff] %v7656_v47  ;;  %v11509_v23 = vsel %vm7664_vm13, 4294967295, %v11508_v23  ;;  %vm7676_vm14 = vmand %vm7641_vm0, %vm11511_vm5  ;;  %v7680_v2 = vrot.slane %v4187_v18, 1  ;;  %v7682_v4 = vrot.slane %v4190_v57, 2  ;;  %v2156_v63 = vor.u32 %v2154_v24, %v2153_v56  ;;  %v1190_v57 = vpop.f32.mrb[16].mxu0 }
 0x133   : > { %11510 = vst [vmem:[#allocation16_spill] sm:$0xff] %v11509_v23  ;;  %v2158_v42 = vrot.slane %v2153_v56, 4  ;;  %v1371_v41 = vsel %vm7582_vm10, %v1330_v34, 0.0  ;;  %v1372_v1 = vsel %vm7602_vm12, %v1331_v11, 0.0  ;;  %vm11514_vm0 = vcmp.ge.f32.partialorder %v11465_v13, 1.0 }
 0x134   : > { %vm7694_vm5 = vmand %vm7651_vm2, %vm11514_vm0  ;;  %v7700_v24 = vor.u32 %v1712_v32, %v7669_v28  ;;  %v2165_v18 = vor.u32 %v2163_v12, %v7656_v47  ;;  %v5618_v34 = vpack.c.bf16 %v1372_v1, %v1371_v41  ;;  %v11518_v56 = vrot.slane %v11517_v39, 4  ;;  %v11523_v12 = vld [vmem:[#allocation22_spill] sm:$0xff]  ;;  %v7722_v11 = vld [vmem:[#allocation2 + $0x20] sm:$0xf] }
 0x135   : > { %vm11519_vm2 = vcmp.lt.s32.totalorder %v11469_v44, 80  ;;  %vm11520_vm0 = vcmp.ge.s32.totalorder %v11469_v44, 64  ;;  %v11524_v41 = vrot.slane %v11523_v12, 11  ;;  %v1191_v39 = vadd.f32 %v7169_v6, %v1190_v57 }
 0x136   : > { %v2157_v17 = vsel %vm6716_vm6, %v11518_v56, %v2156_v63  ;;  %vm7714_vm4 = vmand %vm11520_vm0, %vm11519_vm2  ;;  %v5850_v63 = vpop.f32.mrb[17].mxu0  ;;  %vm11525_vm9 = vcmp.le.f32.partialorder %v6888_v30, 16.0  ;;  %v11526_v56 = vmov 0  ;;  %v2651_v57 = vrot.slane %v7574_v37, 4  ;;  %5703 = vst [vmem:[#allocation2 + $0x28] sm:$0xff] %v5618_v34  }
 0x137   : > { %v2650_v1 = vsel %vm6716_vm6, %v11524_v41, %v2649_v49  ;;  %vm7731_vm2 = vmand %vm7676_vm14, %vm11525_vm9  ;;  %v2166_v49 = vsel %vm6716_vm6, %v2158_v42, %v2165_v18  ;;  %v2545_v12 = vsel %vm6851_vm11, %v7474_v51, %v2157_v17  ;;  %v1193_v41 = vpop.f32.mrb[18].mxu0  ;;  %vm11529_vm8 = vcmp.le.f32.partialorder %v11465_v13, 16.0 }
 0x138   : > { %v11527_v56 = vsel %vm7731_vm2, 4294967295, %v11526_v56  ;;  %vm7746_vm14 = vmand %vm7694_vm5, %vm11529_vm8  ;;  %v11530_v30 = vmov 0  ;;  %vm11533_vm9 = vcmp.le.f32.partialorder %v11477_v46, 16.0  ;;  %vm11534_vm0 = vcmp.ge.f32.partialorder %v11477_v46, 1.0  ;;  %v7771_v46 = vpop.f32.mrb[16].mxu1  ;;  %v5851_v63 = vpop.f32.mrb[19].mxu0 }
 0x139   : > { %11528 = vst [vmem:[#allocation17_spill] sm:$0xff] %v11527_v56  ;;  %v11531_v30 = vsel %vm7746_vm14, 4294967295, %v11530_v30  ;;  %vm7754_vm3 = vmand %vm11534_vm0, %vm11533_vm9  ;;  %v5490_v37 = vcombine.low %v7722_v11, %v7724_v20  ;;  %v2546_v13 = vsel %vm6851_vm11, %v7476_v38, %v2166_v49  ;;  %v2595_v36 = vsel %vm6912_vm15, %v7633_v40, %v2545_v12  ;;  %v5894_v12 = vpop.f32.mrb[17].mxu1  ;;  %v11563_v63 = vld [vmem:[#allocation20_spill] sm:$0xff] }
 0x13a   : > { %11532 = vst [vmem:[#allocation23_spill] sm:$0xff] %v11531_v30  ;;  %v11537_v8 = vshll.u32 %v7522_v52, 16  ;;  %11538 = vst [vmem:[#allocation11_spill] sm:$0xff] %v7771_v46  ;;  %v1332_v34 = vmax.f32 %v1191_v39, 0.0  ;;  %v1194_v17 = vadd.f32 %v7169_v6, %v1193_v41  ;;  %v2596_v49 = vsel %vm6912_vm15, %v7595_v19, %v2546_v13  ;;  %v11547_v13 = vld [vmem:[#allocation19_spill] sm:$0xff]  ;;  %v11601_v30 = vld [vmem:[#allocation25_spill] sm:$0xff] }
 0x13b   : > { %vm7782_vm8 = vmpackc.low %vm7714_vm4, %vm7714_vm4  ;;  %v11540_v52 = vmov 0  ;;  %v2660_v39 = vrot.slane %v7576_v62, 4  ;;  %v4195_v41 = vshrl.u32 %v5490_v37, 16  ;;  %vm11543_vm0 = vcmp.le.f32.partialorder %v11489_v50, 16.0 }
 0x13c   : > { %v2658_v18 = vor.u32 %v11537_v8, %v7576_v62  ;;  %v11541_v52 = vsel %vm7782_vm8, 4294967295, %v11540_v52  ;;  %v4198_v8 = vshll.u32 %v5490_v37, 16  ;;  %vm11544_vm9 = vcmp.ge.f32.partialorder %v11489_v50, 1.0  ;;  %v7799_v62 = vpop.f32.mrb[18].mxu1 }
 0x13d   : > { %11542 = vst [vmem:[#allocation22_spill] sm:$0xff] %v11541_v52  ;;  %vm7791_vm5 = vmand %vm11544_vm9, %vm11543_vm0  ;;  %v2662_v46 = vshrl.u32 %v2595_v36, 16  ;;  %v1373_v37 = vsel %vm7664_vm13, %v1332_v34, 0.0  ;;  %v1333_v12 = vmax.f32 %v1194_v17, 0.0  ;;  %vm11549_vm10 = vcmp.le.f32.partialorder %v11495_v27, 16.0  ;;  %v5895_v47 = vpop.f32.mrb[19].mxu1 }
 0x13e   : > { %v2659_v32 = vsel %vm6716_vm6, %v2651_v57, %v2658_v18  ;;  %11548 = vst [vmem:[#allocation18_spill] sm:$0xff] %v7799_v62  ;;  %vm11550_vm0 = vcmp.ge.f32.partialorder %v11495_v27, 1.0  ;;  %v2665_v58 = vshll.u32 %v2595_v36, 16  ;;  %v2671_v21 = vshrl.u32 %v2596_v49, 16 }
 0x13f   : > { %vm7807_vm9 = vmand %vm11550_vm0, %vm11549_vm10  ;;  %vm11553_vm12 = vcmp.ge.f32.partialorder %v11500_v9, 1.0  ;;  %v4197_v18 = vrot.slane %v4195_v41, 1  ;;  %v4200_v34 = vrot.slane %v4198_v8, 2  ;;  %v2664_v27 = vrot.slane %v2662_v46, 7  ;;  %v1198_v41 = vpop.f32.mrb[20].mxu0 }
 0x140   : > { %vm7815_vm4 = vmand %vm7754_vm3, %vm11553_vm12  ;;  %v2674_v17 = vshll.u32 %v2596_v49, 16  ;;  %v1374_v23 = vsel %vm7731_vm2, %v1333_v12, 0.0  ;;  %vm11556_vm10 = vcmp.ge.f32.partialorder %v6997_v0, 1.0  ;;  %v7831_v42 = vrot.slane %v2671_v21, 7 }
 0x141   : > { %vm7826_vm0 = vmand %vm7791_vm5, %vm11556_vm10  ;;  %v3052_v36 = vsel %vm7782_vm8, %v7474_v51, %v2650_v1  ;;  %v7839_v46 = vsel %vm7782_vm8, %v7476_v38, %v2659_v32  ;;  %v5623_v49 = vpack.c.bf16 %v1374_v23, %v1373_v37  ;;  %v7841_v8 = vor.u32 %v4200_v34, %v4197_v18  ;;  %v5854_v23 = vpop.f32.mrb[21].mxu0  ;;  %v7854_v37 = vld [vmem:[#allocation2 + $0x28] sm:$0xf]  ;;  %v7856_v18 = vld [vmem:[#allocation2 + $0x2c] sm:$0xf] }
 0x142   : > { %11559 = vst [vmem:[#allocation19_spill] sm:$0xff] %v7831_v42  ;;  %vm11560_vm3 = vcmp.ge.f32.partialorder %v7001_v35, 1.0  ;;  %v2667_v1 = vor.u32 %v2665_v58, %v2664_v27  ;;  %v2669_v12 = vrot.slane %v2664_v27, 4  ;;  %v1199_v32 = vadd.f32 %v7169_v6, %v1198_v41  ;;  %11564 = vst [vmem:[#allocation20_spill] sm:$0xff] %v7854_v37  ;;  %v1201_v23 = vpop.f32.mrb[22].mxu0 }
 0x143   : > { %vm7847_vm5 = vmand %vm7807_vm9, %vm11560_vm3  ;;  %11565 = vst [vmem:[#allocation47_spill] sm:$0xff] %v7856_v18  ;;  %v2676_v50 = vor.u32 %v2674_v17, %v7831_v42  ;;  %vm11566_vm9 = vcmp.lt.s32.totalorder %v11469_v44, 96  ;;  %vm11567_vm3 = vcmp.ge.s32.totalorder %v11469_v44, 80  ;;  %v3099_v58 = vshrl.u32 %v3052_v36, 16  ;;  %v5855_v42 = vpop.f32.mrb[23].mxu0 }
 0x144   : > { %vm7864_vm10 = vmand %vm11567_vm3, %vm11566_vm9  ;;  %v11570_v27 = vrot.slane %v7533_v43, 4  ;;  %5704 = vst [vmem:[#allocation2 + $0x30] sm:$0xff] %v5623_v49   ;;  %vm11571_vm13 = vcmp.le.f32.partialorder %v11500_v9, 16.0  ;;  %v11572_v17 = vmov 0  ;;  %v11575_v56 = vor.u32 %v7682_v4, %v7680_v2  ;;  %v7893_v49 = vpop.f32.mrb[20].mxu1  ;;  %v11582_v4 = vld [vmem:[#allocation24_spill] sm:$0xff] }
 0x145   : > { %vm7879_vm12 = vmand %vm7815_vm4, %vm11571_vm13  ;;  %vm11576_vm9 = vsmask.f32 6400  ;;  %v2668_v9 = vsel %vm6716_vm6, %v2660_v39, %v2667_v1  ;;  %v3102_v57 = vshll.u32 %v3052_v36, 16  ;;  %11577 = vst [vmem:[#allocation49_spill] sm:$0xff] %v7893_v49  ;;  %v1202_v62 = vadd.f32 %v7169_v6, %v1201_v23  ;;  %v5898_v42 = vpop.f32.mrb[21].mxu1 }
 0x146   : > { %v7873_v41 = vsel %vm6716_vm6, %v11570_v27, %v7700_v24  ;;  %v11573_v17 = vsel %vm7879_vm12, 4294967295, %v11572_v17  ;;  %v4202_v43 = vsel %vm11576_vm9, %v11575_v56, %v7841_v8  ;;  %v5491_v24 = vcombine.low %v7854_v37, %v7856_v18 }
 0x147   : > { %11574 = vst [vmem:[#allocation48_spill] sm:$0xff] %v11573_v17  ;;  %v1334_v27 = vmax.f32 %v1199_v32, 0.0  ;;  %5933 = vmatmul.mubr.bf16.vlgmr.msra.gmra.mrb[40].mxu1 %v4202_v43  ;;  %vm11578_vm13 = vcmp.le.f32.partialorder %v6997_v0, 16.0  ;;  %v11579_v2 = vmov 0  ;;  %v2677_v56 = vsel %vm6716_vm6, %v2669_v12, %v2676_v50  ;;  %v7935_v32 = vpop.f32.mrb[22].mxu1  ;;  %v1206_v17 = vpop.f32.mrb[24].mxu0 }
 0x148   : > { %vm7900_vm4 = vmand %vm7826_vm0, %vm11578_vm13  ;;  %v7910_v39 = vsel %vm7782_vm8, %v7633_v40, %v2668_v9  ;;  %vm11583_vm3 = vcmp.le.f32.partialorder %v7001_v35, 16.0  ;;  %v11584_v0 = vmov 0  ;;  %v11587_v47 = vmov 0.0   ;;  %11591 = vst [vmem:[#allocation51_spill] sm:$0xff] %v7935_v32  ;;  %v5899_v9 = vpop.f32.mrb[23].mxu1  ;;  %v5858_v18 = vpop.f32.mrb[25].mxu0 }
 0x149   : > { %v11580_v2 = vsel %vm7900_vm4, 4294967295, %v11579_v2  ;;  %vm7916_vm2 = vmand %vm7847_vm5, %vm11583_vm3  ;;  %vm11588_vm0 = vmmov 0   ;;  %v4204_v36 = vshrl.u32 %v5491_v24, 16  ;;  %v4207_v1 = vshll.u32 %v5491_v24, 16 }
 0x14a   : > { %11581 = vst [vmem:[#allocation50_spill] sm:$0xff] %v11580_v2  ;;  %v11585_v0 = vsel %vm7916_vm2, 4294967295, %v11584_v0  ;;  %5936 = vmatprep.mubr.msk.bf16.mxu1 %vm11588_vm0, %v11587_v47  ;;  %v7925_v12 = vsel %vm7782_vm8, %v7595_v19, %v2677_v56  ;;  %vm7930_vm13 = vmpackc.low %vm7864_vm10, %vm7864_vm10  ;;  %v11589_v35 = vmov 0  ;;  %v3101_v21 = vrot.slane %v3099_v58, 7  ;;  %v11596_v58 = vld [vmem:[#allocation26_spill] sm:$0xff] }
 0x14b   : > { %11586 = vst [vmem:[#allocation24_spill] sm:$0xff] %v11585_v0  ;;  %v11590_v35 = vsel %vm7930_vm13, 4294967295, %v11589_v35  ;;  %v1375_v50 = vsel %vm7746_vm14, %v1334_v27, 0.0  ;;  %v1335_v23 = vmax.f32 %v1202_v62, 0.0  ;;  %v3107_v43 = vshrl.u32 %v7839_v46, 16 }
 0x14c   : > { %v3110_v24 = vshll.u32 %v7839_v46, 16  ;;  %vm11592_vm3 = vcmp.lt.s32.totalorder %v11469_v44, 112  ;;  %vm11593_vm10 = vcmp.ge.s32.totalorder %v11469_v44, 96  ;;  %v4206_v56 = vrot.slane %v4204_v36, 1 }
 0x14d   : > { %vm7945_vm9 = vmand %vm11593_vm10, %vm11592_vm3  ;;  %v4209_v27 = vrot.slane %v4207_v1, 2  ;;  %vm11597_vm14 = vcmp.le.f32.partialorder %v11539_v3, 16.0  ;;  %vm11598_vm8 = vcmp.ge.f32.partialorder %v11539_v3, 1.0  ;;  %v3104_v46 = vor.u32 %v3102_v57, %v3101_v21 }
 0x14e   : > { %vm7955_vm15 = vmand %vm11598_vm8, %vm11597_vm14  ;;  %v3105_v42 = vrot.slane %v3101_v21, 4  ;;  %v1376_v32 = vsel %vm7879_vm12, %v1335_v23, 0.0  ;;  %vm11602_vm5 = vcmp.le.f32.partialorder %v11547_v13, 16.0  ;;  %vm11603_vm1 = vcmp.ge.f32.partialorder %v11547_v13, 1.0  ;;  %v11606_v21 = vld [vmem:[#allocation28_spill] sm:$0xff] }
 0x14f   : > { %vm7967_vm11 = vmand %vm11603_vm1, %vm11602_vm5  ;;  %v3109_v3 = vrot.slane %v3107_v43, 7  ;;  %v3116_v1 = vshrl.u32 %v7910_v39, 16  ;;  %v3119_v57 = vshll.u32 %v7910_v39, 16  ;;  %v5628_v9 = vpack.c.bf16 %v1376_v32, %v1375_v50  ;;  %v7998_v50 = vld [vmem:[#allocation2 + $0x34] sm:$0xf] }
 0x150   : > { %v7975_v23 = vor.u32 %v4209_v27, %v4206_v56  ;;  %v3125_v49 = vshrl.u32 %v7925_v12, 16  ;;  %v3128_v13 = vshll.u32 %v7925_v12, 16  ;;  %vm7982_vm1 = vmpackc.low %vm7945_vm9, %vm7945_vm9  ;;  %v11607_v43 = vmov 0  ;;  %v7996_v12 = vld [vmem:[#allocation2 + $0x30] sm:$0xf]  ;;  %v1209_v27 = vpop.f32.mrb[26].mxu0 }
 0x151   : > { %v11608_v43 = vsel %vm7982_vm1, 4294967295, %v11607_v43  ;;  %v1207_v39 = vadd.f32 %v7169_v6, %v1206_v17  ;;  %vm11609_vm14 = vcmp.ge.f32.partialorder %v7005_v55, 1.0  ;;  %v3112_v34 = vor.u32 %v3110_v24, %v3109_v3  ;;  %v11612_v17 = vld [vmem:[#allocation31_spill] sm:$0xff]  ;;  %5705 = vst [vmem:[#allocation2 + $0x38] sm:$0xff] %v5628_v9   ;;  %v5859_v52 = vpop.f32.mrb[27].mxu0 }
 0x152   : > { %vm7992_vm8 = vmand %vm7955_vm15, %vm11609_vm14  ;;  %v3114_v56 = vrot.slane %v3109_v3, 4  ;;  %v3506_v18 = vsel %vm7930_vm13, %v7474_v51, %v3104_v46  ;;  %vm11613_vm15 = vsmask.f32 6400  ;;  %vm11614_vm14 = vcmp.ge.f32.partialorder %v7011_v10, 1.0  ;;  %v8021_v3 = vpop.f32.mrb[24].mxu1 }
 0x153   : > { %v4211_v62 = vsel %vm11613_vm15, %v7841_v8, %v7975_v23  ;;  %vm8012_vm3 = vmand %vm7967_vm11, %vm11614_vm14  ;;  %v5492_v24 = vcombine.low %v7996_v12, %v7998_v50  ;;  %v3118_v51 = vrot.slane %v3116_v1, 7  ;;  %v8018_v46 = vrot.slane %v3125_v49, 7 }
 0x154   : > { %v1336_v9 = vmax.f32 %v1207_v39, 0.0  ;;  %v1210_v8 = vadd.f32 %v7169_v6, %v1209_v27  ;;  %5937 = vmatmul.mubr.bf16.gmra.mrb[44].mxu1 %v4211_v62  ;;  %vm11617_vm11 = vcmp.le.f32.partialorder %v11563_v63, 16.0  ;;  %vm11618_vm15 = vcmp.ge.f32.partialorder %v11563_v63, 1.0  ;;  %v5902_v39 = vpop.f32.mrb[25].mxu1  ;;  %v11625_v62 = vld [vmem:[#allocation27_spill] sm:$0xff] }
 0x155   : > { %vm8028_vm14 = vmand %vm11618_vm15, %vm11617_vm11  ;;  %v3113_v49 = vsel %vm6716_vm6, %v3105_v42, %v3112_v34  ;;  %v3554_v1 = vsel %vm7982_vm1, %v7633_v40, %v3506_v18  ;;  %vm11621_vm9 = vcmp.le.f32.partialorder %v7005_v55, 16.0  ;;  %v11622_v52 = vmov 0  ;;  %5940 = vmatprep.mubr.msk.bf16.mxu1 %vm11588_vm0, %v11587_v47  ;;  %v8050_v18 = vpop.f32.mrb[26].mxu1 }
 0x156   : > { %vm8042_vm10 = vmand %vm7992_vm8, %vm11621_vm9  ;;  %v4213_v63 = vshrl.u32 %v5492_v24, 16  ;;  %v4216_v42 = vshll.u32 %v5492_v24, 16  ;;  %v3121_v34 = vor.u32 %v3119_v57, %v3118_v51  ;;  %v3123_v27 = vrot.slane %v3118_v51, 4  ;;  %v5903_v51 = vpop.f32.mrb[27].mxu1 }
 0x157   : > { %v11623_v52 = vsel %vm8042_vm10, 4294967295, %v11622_v52  ;;  %v1377_v55 = vsel %vm7900_vm4, %v1336_v9, 0.0  ;;  %v1337_v32 = vmax.f32 %v1210_v8, 0.0  ;;  %vm11626_vm8 = vcmp.le.f32.partialorder %v7011_v10, 16.0 }
 0x158   : > { %11624 = vst [vmem:[#allocation26_spill] sm:$0xff] %v11623_v52  ;;  %vm8058_vm9 = vmand %vm8012_vm3, %vm11626_vm8  ;;  %v11627_v39 = vmov 0  ;;  %v3130_v57 = vor.u32 %v3128_v13, %v8018_v46  ;;  %v3507_v24 = vsel %vm7930_vm13, %v7476_v38, %v3113_v49  ;;  %v4215_v2 = vrot.slane %v4213_v63, 1 }
 0x159   : > { %v11628_v39 = vsel %vm8058_vm9, 4294967295, %v11627_v39  ;;  %v4218_v9 = vrot.slane %v4216_v42, 2  ;;  %vm11630_vm15 = vcmp.ge.f32.partialorder %v11582_v4, 1.0  ;;  %v3122_v37 = vsel %vm6716_vm6, %v3114_v56, %v3121_v34  ;;  %v1214_v42 = vpop.f32.mrb[28].mxu0 }
 0x15a   : > { %11629 = vst [vmem:[#allocation25_spill] sm:$0xff] %v11628_v39  ;;  %vm8071_vm5 = vmand %vm8028_vm14, %vm11630_vm15  ;;  %v3555_v38 = vsel %vm7982_vm1, %v7595_v19, %v3507_v24  ;;  %v1378_v13 = vsel %vm7916_vm2, %v1337_v32, 0.0  ;;  %v3131_v8 = vsel %vm6716_vm6, %v3123_v27, %v3130_v57  ;;  %v3508_v36 = vsel %vm7930_vm13, %v7633_v40, %v3122_v37  ;;  %v5862_v57 = vpop.f32.mrb[29].mxu0 }
 0x15b   : > { %vm11633_vm14 = vcmp.ge.s32.totalorder %v11469_v44, 112  ;;  %v3601_v49 = vshrl.u32 %v3554_v1, 16  ;;  %v5633_v63 = vpack.c.bf16 %v1378_v13, %v1377_v55  ;;  %v8097_v34 = vor.u32 %v4218_v9, %v4215_v2  ;;  %v11640_v55 = vld [vmem:[#allocation32_spill] sm:$0xff]  ;;  %v1217_v37 = vpop.f32.mrb[30].mxu0 }
 0x15c   : > { %vm8092_vm15 = vmpackc.low %vm11633_vm14, %vm11633_vm14  ;;  %v3509_v27 = vsel %vm7930_vm13, %v7595_v19, %v3131_v8  ;;  %v3556_v44 = vsel %vm7982_vm1, %v7722_v11, %v3508_v36  ;;  %vm11636_vm14 = vcmp.le.f32.partialorder %v11596_v58, 16.0  ;;  %vm11637_vm8 = vcmp.ge.f32.partialorder %v11596_v58, 1.0 }
 0x15d   : > { %vm8109_vm11 = vmand %vm11637_vm8, %vm11636_vm14  ;;  %v1215_v2 = vadd.f32 %v7169_v6, %v1214_v42  ;;  %v8118_v24 = vsel %vm7982_vm1, %v7724_v20, %v3509_v27  ;;  %v3603_v51 = vrot.slane %v3601_v49, 7  ;;  %v3604_v9 = vshll.u32 %v3554_v1, 16  ;;  %5706 = vst [vmem:[#allocation2 + $0x40] sm:$0xff] %v5633_v63   ;;  %v5863_v42 = vpop.f32.mrb[31].mxu0  ;;  %v8143_v27 = vld [vmem:[#allocation2 + $0x38] sm:$0xf] }
 0x15e   : > { %vm11641_vm2 = vcmp.le.f32.partialorder %v11601_v30, 16.0  ;;  %vm11642_vm4 = vcmp.ge.f32.partialorder %v11601_v30, 1.0  ;;  %vm11645_vm3 = vsmask.f32 6400  ;;  %v3609_v8 = vshrl.u32 %v3555_v38, 16 }
 0x15f   : > { %vm8124_vm8 = vmand %vm11642_vm4, %vm11641_vm2  ;;  %v4220_v13 = vsel %vm11645_vm3, %v7975_v23, %v8097_v34  ;;  %v3612_v36 = vshll.u32 %v3555_v38, 16  ;;  %v3618_v49 = vshrl.u32 %v3556_v44, 16  ;;  %vm11646_vm12 = vcmp.le.f32.partialorder %v11606_v21, 16.0 }
 0x160   : > { %vm11647_vm1 = vcmp.ge.f32.partialorder %v11606_v21, 1.0  ;;  %v1338_v1 = vmax.f32 %v1215_v2, 0.0  ;;  %v1218_v63 = vadd.f32 %v7169_v6, %v1217_v37  ;;  %5941 = vmatmul.mubr.bf16.gmra.mrb[48].mxu1 %v4220_v13  ;;  %v3606_v23 = vor.u32 %v3604_v9, %v3603_v51  ;;  %v1222_v21 = vpop.f32.mrb[32].mxu0 }
 0x161   : > { %vm8136_vm13 = vmand %vm11647_vm1, %vm11646_vm12  ;;  %v3607_v38 = vrot.slane %v3603_v51, 4  ;;  %vm11650_vm3 = vcmp.ge.f32.partialorder %v7216_v60, 1.0  ;;  %vm11653_vm2 = vcmp.le.f32.partialorder %v11582_v4, 16.0  ;;  %v11654_v6 = vmov 0  ;;  %5944 = vmatprep.mubr.msk.bf16.mxu1 %vm11588_vm0, %v11587_v47  ;;  %v8173_v4 = vld [vmem:[#allocation2 + $0x3c] sm:$0xf] }
 0x162   : > { %vm8149_vm12 = vmand %vm8109_vm11, %vm11650_vm3  ;;  %v3611_v2 = vrot.slane %v3609_v8, 7  ;;  %v3620_v57 = vrot.slane %v3618_v49, 7  ;;  %v3621_v51 = vshll.u32 %v3556_v44, 16  ;;  %v3627_v9 = vshrl.u32 %v8118_v24, 16 }
 0x163   : > { %vm8158_vm4 = vmand %vm8071_vm5, %vm11653_vm2  ;;  %vm11657_vm11 = vcmp.ge.f32.partialorder %v11612_v17, 1.0  ;;  %v1379_v10 = vsel %vm8042_vm10, %v1338_v1, 0.0  ;;  %v1339_v44 = vmax.f32 %v1218_v63, 0.0  ;;  %v3630_v37 = vshll.u32 %v8118_v24, 16 }
 0x164   : > { %v11655_v6 = vsel %vm8158_vm4, 4294967295, %v11654_v6  ;;  %vm8167_vm3 = vmand %vm8124_vm8, %vm11657_vm11  ;;  %v4008_v58 = vsel %vm8092_vm15, %v7606_v45, %v3606_v23  ;;  %vm11660_vm8 = vcmp.ge.f32.partialorder %v7237_v16, 1.0  ;;  %v3614_v8 = vor.u32 %v3612_v36, %v3611_v2 }
 0x165   : > { %11656 = vst [vmem:[#allocation28_spill] sm:$0xff] %v11655_v6  ;;  %vm8186_vm2 = vmand %vm8136_vm13, %vm11660_vm8  ;;  %v3616_v49 = vrot.slane %v3611_v2, 4  ;;  %v3623_v1 = vor.u32 %v3621_v51, %v3620_v57  ;;  %v3625_v63 = vrot.slane %v3620_v57, 4  ;;  %vm11663_vm1 = vcmp.le.f32.partialorder %v7216_v60, 16.0  ;;  %v8235_v51 = vld [vmem:[%s11099_s2] ss:$0 sm:$0xff] }
 0x166   : > { %vm8195_vm14 = vmand %vm8149_vm12, %vm11663_vm1  ;;  %v11664_v45 = vmov 0  ;;  %v1380_v24 = vsel %vm8058_vm9, %v1339_v44, 0.0  ;;  %v8203_v36 = vrot.slane %v3627_v9, 7  ;;  %v5493_v30 = vcombine.low %v8143_v27, %v8173_v4  ;;  %v5866_v9 = vpop.f32.mrb[33].mxu0 }
 0x167   : > { %v11665_v45 = vsel %vm8195_vm14, 4294967295, %v11664_v45  ;;  %v1350_v60 = vmax.f32 %v7593_v33, 0.0  ;;  %vm11667_vm5 = vcmp.le.f32.partialorder %v11625_v62, 16.0  ;;  %vm11668_vm12 = vcmp.ge.f32.partialorder %v11625_v62, 1.0 }
 0x168   : > { %11666 = vst [vmem:[#allocation31_spill] sm:$0xff] %v11665_v45  ;;  %vm8212_vm1 = vmand %vm11668_vm12, %vm11667_vm5  ;;  %v5638_v23 = vpack.c.bf16 %v1380_v24, %v1379_v10  ;;  %v3615_v2 = vsel %vm6716_vm6, %v3607_v38, %v3614_v8  ;;  %v3624_v33 = vsel %vm6716_vm6, %v3616_v49, %v3623_v1  ;;  %vm11671_vm11 = vcmp.le.f32.partialorder %v7237_v16, 16.0 }
 0x169   : > { %vm8226_vm5 = vmand %vm8186_vm2, %vm11671_vm11  ;;  %v11672_v62 = vmov 0  ;;  %v1351_v57 = vmax.f32 %v7617_v7, 0.0  ;;  %v1223_v38 = vadd.f32 %v8235_v51, %v1222_v21  ;;  %v3632_v16 = vor.u32 %v3630_v37, %v8203_v36  ;;  %v8255_v37 = vpop.f32.mrb[28].mxu1 }
 0x16a   : > { %v11673_v62 = vsel %vm8226_vm5, 4294967295, %v11672_v62  ;;  %v4009_v10 = vsel %vm8092_vm15, %v7595_v19, %v3615_v2  ;;  %v4010_v7 = vsel %vm8092_vm15, %v7722_v11, %v3624_v33  ;;  %vm11675_vm2 = vcmp.le.f32.partialorder %v7200_v22, 16.0  ;;  %5707 = vst [vmem:[#allocation2 + $0x48] sm:$0xff] %v5638_v23   ;;  %v5906_v21 = vpop.f32.mrb[29].mxu1 }
 0x16b   : > { %11674 = vst [vmem:[#allocation27_spill] sm:$0xff] %v11673_v62  ;;  %vm11676_vm11 = vcmp.ge.f32.partialorder %v7200_v22, 1.0  ;;  %v5518_v13 = vcombine.low %v4008_v58, %v4009_v10  ;;  %vm11679_vm9 = vcmp.le.f32.partialorder %v11612_v17, 16.0  ;;  %v11680_v8 = vmov 0  ;;  %v1225_v22 = vpop.f32.mrb[34].mxu0 }
 0x16c   : > { %vm8249_vm12 = vmand %vm11676_vm11, %vm11675_vm2  ;;  %v4222_v49 = vshrl.u32 %v5493_v30, 16  ;;  %v4225_v1 = vshll.u32 %v5493_v30, 16  ;;  %v1391_v24 = vsel %vm8195_vm14, %v1350_v60, 0.0  ;;  %v1340_v2 = vmax.f32 %v1223_v38, 0.0  ;;  %v5867_v32 = vpop.f32.mrb[35].mxu0  ;;  %v8282_v60 = vpop.f32.mrb[30].mxu1 }
 0x16d   : > { %vm8261_vm10 = vmand %vm8167_vm3, %vm11679_vm9  ;;  %v3633_v58 = vsel %vm6716_vm6, %v3625_v63, %v3632_v16  ;;  %v1226_v17 = vadd.f32 %v8235_v51, %v1225_v22  ;;  %vm11683_vm9 = vcmp.ge.f32.partialorder %v11640_v55, 1.0  ;;  %v1392_v30 = vsel %vm8226_vm5, %v1351_v57, 0.0  ;;  %v5907_v16 = vpop.f32.mrb[31].mxu1  ;;  %v1230_v23 = vpop.f32.mrb[36].mxu0 }
 0x16e   : > { %v11681_v8 = vsel %vm8261_vm10, 4294967295, %v11680_v8  ;;  %vm8275_vm3 = vmand %vm8212_vm1, %vm11683_vm9  ;;  %v4011_v63 = vsel %vm8092_vm15, %v7724_v20, %v3633_v58  ;;  %v4224_v33 = vrot.slane %v4222_v49, 1  ;;  %v4227_v38 = vrot.slane %v4225_v1, 2  ;;  %v5870_v42 = vpop.f32.mrb[37].mxu0  ;;  %v11713_v1 = vld [vmem:[#allocation43_spill] sm:$0xff] }
 0x16f   : > { %11682 = vst [vmem:[#allocation32_spill] sm:$0xff] %v11681_v8  ;;  %vm11686_vm2 = vcmp.ge.f32.partialorder %v7400_v59, 1.0  ;;  %v11689_v57 = vcvt.s32.f32 %v7284_v15  ;;  %v1716_v10 = vrot.slane %v7669_v28, 4  ;;  %v8303_v22 = vcombine.low %v4010_v7, %v4011_v63 }
 0x170   : > { %vm8291_vm1 = vmand %vm8249_vm12, %vm11686_vm2  ;;  %v1341_v49 = vmax.f32 %v1226_v17, 0.0  ;;  %v5668_v44 = vpack.c.bf16 %v1392_v30, %v1391_v24  ;;  %vm11690_vm12 = vcmp.le.f32.partialorder %v7295_v31, 16.0  ;;  %vm11691_vm2 = vcmp.ge.f32.partialorder %v7295_v31, 1.0 }
 0x171   : > { %v8300_v9 = vsub.f32 %v11689_v57, %v7461_v26  ;;  %vm8309_vm13 = vmand %vm11691_vm2, %vm11690_vm12  ;;  %v4747_v15 = vrot.slane %v5518_v13, 1  ;;  %v8314_v26 = vor.u32 %v4227_v38, %v4224_v33  ;;  %vm11694_vm11 = vcmp.le.f32.partialorder %v11640_v55, 16.0  ;;  %v8358_v33 = vld [vmem:[#allocation2 + $0x40] sm:$0xf] }
 0x172   : > { %vm8320_vm8 = vmand %vm8275_vm3, %vm11694_vm11  ;;  %v11695_v28 = vmov 0  ;;  %v1718_v7 = vshrl.u32 %v7595_v19, 16  ;;  %v2083_v24 = vsel %vm6736_vm7, %v7633_v40, %v7873_v41  ;;  %v1381_v13 = vsel %vm8158_vm4, %v1340_v2, 0.0  ;;  %5713 = vst [vmem:[#allocation2 + $0x78] sm:$0xff] %v5668_v44   ;;  %v11703_v41 = vld [vmem:[#allocation44_spill] sm:$0xff]  ;;  %v11738_v44 = vld [vmem:[#allocation38_spill] sm:$0xff] }
 0x173   : > { %v11696_v28 = vsel %vm8320_vm8, 4294967295, %v11695_v28  ;;  %v11231_v55 = vrot.slane %v8303_v22, 1  ;;  %v1382_v21 = vsel %vm8261_vm10, %v1341_v49, 0.0  ;;  %v2169_v58 = vshrl.u32 %v2083_v24, 16  ;;  %v8366_v49 = vld [vmem:[#allocation2 + $0x44] sm:$0xf] }
 0x174   : > { %11697 = vst [vmem:[#allocation52_spill] sm:$0xff] %v11696_v28  ;;  %vm11699_vm3 = vcmp.le.f32.partialorder %v7400_v59, 16.0  ;;  %v11700_v17 = vmov 0  ;;  %v5643_v32 = vpack.c.bf16 %v1382_v21, %v1381_v13  ;;  %vm11704_vm12 = vsmask.f32 6400  ;;  %v11715_v21 = vld [vmem:[#allocation19_spill] sm:$0xff] }
 0x175   : > { %vm8339_vm11 = vmand %vm8291_vm1, %vm11699_vm3  ;;  %v4229_v2 = vsel %vm11704_vm12, %v8097_v34, %v8314_v26  ;;  %v8347_v30 = vrot.slane %v1718_v7, 7  ;;  %v1721_v63 = vshll.u32 %v7595_v19, 16  ;;  %vm11705_vm9 = vcmp.ge.f32.partialorder %v7429_v25, 1.0  ;;  %v11714_v7 = vld [vmem:[#allocation8_spill] sm:$0xff] }
 0x176   : > { %v11701_v17 = vsel %vm8339_vm11, 4294967295, %v11700_v17  ;;  %vm8354_vm1 = vmand %vm8309_vm13, %vm11705_vm9  ;;  %vm11708_vm3 = vcmask 1046528   ;;  %5945 = vmatmul.mubr.bf16.gmra.mrb[52].mxu1 %v4229_v2  ;;  %v1231_v34 = vadd.f32 %v8235_v51, %v1230_v23  ;;  %v8364_v57 = vrot.slane %v2169_v58, 7  ;;  %5708 = vst [vmem:[#allocation2 + $0x50] sm:$0xff] %v5643_v32   ;;  %v1233_v58 = vpop.f32.mrb[38].mxu0  ;;  %v11716_v2 = vld [vmem:[#allocation15_spill] sm:$0xff] }
 0x177   : > { %11702 = vst [vmem:[#allocation10_spill] sm:$0xff] %v11701_v17  ;;  %v4749_v38 = vsel %vm11708_vm3, %v4747_v15, %v11231_v55  ;;  %v2172_v16 = vshll.u32 %v2083_v24, 16  ;;  %vm11709_vm13 = vcmp.le.f32.partialorder %v7297_v29, 16.0  ;;  %vm11710_vm9 = vcmp.ge.f32.partialorder %v7297_v29, 1.0  ;;  %5948 = vmatprep.mubr.msk.bf16.mxu1 %vm11588_vm0, %v11587_v47  ;;  %v11725_v55 = vld [vmem:[#allocation9_spill] sm:$0xff] }
 0x178   : > { %vm8372_vm12 = vmand %vm11710_vm9, %vm11709_vm13  ;;  %6033 = vmatmul.mubr.bf16.vlgmr.msra.gmra.mrb[44].mxu0 %v4749_v38  ;;  %v1723_v15 = vor.u32 %v1721_v63, %v8347_v30  ;;  %v2167_v13 = vrot.slane %v11714_v7, 4  ;;  %v1271_v23 = vadd.f32 %v8235_v51, %v11716_v2  ;;  %vm11717_vm3 = vcmp.le.f32.partialorder %v7328_v61, 16.0  ;;  %v5871_v7 = vpop.f32.mrb[39].mxu0 }
 0x179   : > { %vm11718_vm13 = vcmp.ge.f32.partialorder %v7328_v61, 1.0  ;;  %v1342_v32 = vmax.f32 %v1231_v34, 0.0  ;;  %6036 = vmatprep.mubr.msk.bf16.mxu0 %vm11588_vm0, %v11587_v47  ;;  %v2174_v63 = vor.u32 %v2172_v16, %v8364_v57  ;;  %v2176_v38 = vrot.slane %v8364_v57, 4 }
 0x17a   : > { %vm8388_vm9 = vmand %vm11718_vm13, %vm11717_vm3  ;;  %v1234_v42 = vadd.f32 %v8235_v51, %v1233_v58  ;;  %vm11721_vm5 = vcmp.le.f32.partialorder %v7429_v25, 16.0  ;;  %v11722_v61 = vmov 0  ;;  %v1724_v34 = vsel %vm6716_vm6, %v1716_v10, %v1723_v15 }
 0x17b   : > { %vm8402_vm3 = vmand %vm8354_vm1, %vm11721_vm5  ;;  %v1352_v2 = vmax.f32 %v1271_v23, 0.0  ;;  %v5494_v16 = vcombine.low %v8358_v33, %v8366_v49  ;;  %v1274_v57 = vadd.f32 %v8235_v51, %v11725_v55  ;;  %vm11726_vm13 = vcmp.le.f32.partialorder %v7343_v53, 16.0 }
 0x17c   : > { %v11723_v61 = vsel %vm8402_vm3, 4294967295, %v11722_v61  ;;  %vm11727_vm2 = vcmp.ge.f32.partialorder %v7343_v53, 1.0  ;;  %v1383_v10 = vsel %vm8320_vm8, %v1342_v32, 0.0  ;;  %v2084_v59 = vsel %vm6736_vm7, %v7595_v19, %v1724_v34  ;;  %v11733_v32 = vld [vmem:[#allocation12_spill] sm:$0xff] }
 0x17d   : > { %11724 = vst [vmem:[#allocation44_spill] sm:$0xff] %v11723_v61  ;;  %vm8416_vm14 = vmand %vm11727_vm2, %vm11726_vm13  ;;  %v2175_v55 = vsel %vm6716_vm6, %v2167_v13, %v2174_v63  ;;  %v1343_v15 = vmax.f32 %v1234_v42, 0.0  ;;  %vm11730_vm1 = vcmp.ge.f32.partialorder %v7438_v14, 1.0  ;;  %v2178_v58 = vshrl.u32 %v2084_v59, 16  ;;  %v11739_v63 = vld [vmem:[#allocation14_spill] sm:$0xff] }
 0x17e   : > { %vm8432_vm2 = vmand %vm8372_vm12, %vm11730_vm1  ;;  %v2181_v23 = vshll.u32 %v2084_v59, 16  ;;  %vm11734_vm13 = vnez %v11733_v32  ;;  %v1393_v34 = vsel %vm8402_vm3, %v1352_v2, 0.0  ;;  %vm11735_vm5 = vcmp.ge.f32.partialorder %v7442_v5, 1.0  ;;  %v11758_v13 = vld [vmem:[#allocation18_spill] sm:$0xff] }
 0x17f   : > { %v2547_v7 = vsel %vm11734_vm13, %v7633_v40, %v2175_v55  ;;  %vm8445_vm8 = vmand %vm8388_vm9, %vm11735_vm5  ;;  %vm11740_vm10 = vnez %v11739_v63  ;;  %v1384_v40 = vsel %vm8339_vm11, %v1343_v15, 0.0  ;;  %v4231_v2 = vshrl.u32 %v5494_v16, 16 }
 0x180   : > { %v2597_v42 = vsel %vm11740_vm10, %v7722_v11, %v2547_v7  ;;  %v4234_v59 = vshll.u32 %v5494_v16, 16  ;;  %vm11741_vm3 = vcmp.le.f32.partialorder %v7357_v48, 16.0  ;;  %vm11742_vm9 = vcmp.ge.f32.partialorder %v7357_v48, 1.0  ;;  %v1238_v16 = vpop.f32.mrb[40].mxu0 }
 0x181   : > { %vm8460_vm5 = vmand %vm11742_vm9, %vm11741_vm3  ;;  %v8464_v55 = vrot.slane %v2178_v58, 7  ;;  %v2680_v24 = vshrl.u32 %v2597_v42, 16  ;;  %v2683_v61 = vshll.u32 %v2597_v42, 16  ;;  %v5648_v62 = vpack.c.bf16 %v1384_v40, %v1383_v10  ;;  %v11753_v10 = vld [vmem:[#allocation11_spill] sm:$0xff]  ;;  %v5874_v53 = vpop.f32.mrb[41].mxu0  ;;  %v11754_v42 = vld [vmem:[#allocation45_spill] sm:$0xff] }
 0x182   : > { %vm11745_vm12 = vcmp.le.f32.partialorder %v7438_v14, 16.0  ;;  %v11746_v15 = vmov 0  ;;  %v4233_v7 = vrot.slane %v4231_v2, 1  ;;  %v4236_v48 = vrot.slane %v4234_v59, 2  ;;  %v1241_v59 = vpop.f32.mrb[42].mxu0 }
 0x183   : > { %vm8470_vm1 = vmand %vm8432_vm2, %vm11745_vm12  ;;  %v1353_v45 = vmax.f32 %v1274_v57, 0.0  ;;  %vm11749_vm3 = vcmp.le.f32.partialorder %v7442_v5, 16.0  ;;  %v11750_v58 = vmov 0  ;;  %v1279_v14 = vadd.f32 %v8235_v51, %v11753_v10  ;;  %5709 = vst [vmem:[#allocation2 + $0x58] sm:$0xff] %v5648_v62  }
 0x184   : > { %v11747_v15 = vsel %vm8470_vm1, 4294967295, %v11746_v15  ;;  %vm8478_vm9 = vmand %vm8445_vm8, %vm11749_vm3  ;;  %v2183_v40 = vor.u32 %v2181_v23, %v8464_v55  ;;  %v2682_v17 = vrot.slane %v2680_v24, 7  ;;  %v1239_v57 = vadd.f32 %v8235_v51, %v1238_v16  ;;  %v5875_v23 = vpop.f32.mrb[43].mxu0 }
 0x185   : > { %11748 = vst [vmem:[#allocation43_spill] sm:$0xff] %v11747_v15  ;;  %v11751_v58 = vsel %vm8478_vm9, 4294967295, %v11750_v58  ;;  %vm11755_vm12 = vcmp.ge.f32.partialorder %v11703_v41, 1.0  ;;  %v1282_v2 = vadd.f32 %v8235_v51, %v11758_v13  ;;  %v3132_v10 = vrot.slane %v8018_v46, 4 }
 0x186   : > { %11752 = vst [vmem:[#allocation8_spill] sm:$0xff] %v11751_v58  ;;  %vm8491_vm8 = vmand %vm8460_vm5, %vm11755_vm12  ;;  %v8498_v53 = vor.u32 %v4236_v48, %v4233_v7  ;;  %v1394_v62 = vsel %vm8470_vm1, %v1353_v45, 0.0  ;;  %v1354_v24 = vmax.f32 %v1279_v14, 0.0  ;;  %v2184_v29 = vsel %vm6716_vm6, %v2176_v38, %v2183_v40 }
 0x187   : > { %v2685_v16 = vor.u32 %v2683_v61, %v2682_v17  ;;  %v5673_v8 = vpack.c.bf16 %v1394_v62, %v1393_v34  ;;  %vm11759_vm5 = vcmp.ge.f32.partialorder %v11713_v1, 1.0  ;;  %v2548_v45 = vsel %vm11734_vm13, %v7595_v19, %v2184_v29 }
 0x188   : > { %vm8509_vm3 = vmand %vm8416_vm14, %vm11759_vm5  ;;  %vm11762_vm2 = vsmask.f32 6400  ;;  %v1395_v61 = vsel %vm8478_vm9, %v1354_v24, 0.0  ;;  %v1344_v34 = vmax.f32 %v1239_v57, 0.0  ;;  %vm11763_vm1 = vcmp.le.f32.partialorder %v11703_v41, 16.0  ;;  %v11768_v57 = vld [vmem:[#allocation22_spill] sm:$0xff] }
 0x189   : > { %v4238_v38 = vsel %vm11762_vm2, %v8314_v26, %v8498_v53  ;;  %vm8526_vm14 = vmand %vm8491_vm8, %vm11763_vm1  ;;  %v11764_v25 = vmov 0  ;;  %v2598_v19 = vsel %vm11740_vm10, %v7724_v20, %v2548_v45  ;;  %v11767_v7 = vrot.slane %v11715_v21, 4  ;;  %5714 = vst [vmem:[#allocation2 + $0x80] sm:$0xff] %v5673_v8  }
 0x18a   : > { %v11765_v25 = vsel %vm8526_vm14, 4294967295, %v11764_v25  ;;  %5949 = vmatmul.mubr.bf16.gmra.mrb[56].mxu1 %v4238_v38  ;;  %v1355_v48 = vmax.f32 %v1282_v2, 0.0  ;;  %v1727_v41 = vshrl.u32 %v7722_v11, 16  ;;  %v2687_v14 = vrot.slane %v2682_v17, 4 }
 0x18b   : > { %11766 = vst [vmem:[#allocation19_spill] sm:$0xff] %v11765_v25  ;;  %v2686_v26 = vsel %vm6716_vm6, %v11767_v7, %v2685_v16  ;;  %v2689_v40 = vshrl.u32 %v2598_v19, 16  ;;  %vm11769_vm1 = vnez %v11768_v57  ;;  %vm11770_vm2 = vcmp.le.f32.partialorder %v11713_v1, 16.0  ;;  %5952 = vmatprep.mubr.msk.bf16.mxu1 %vm11588_vm0, %v11587_v47  ;;  %v8566_v16 = vld [vmem:[#allocation2 + $0x48] sm:$0xf] }
 0x18c   : > { %v3056_v5 = vsel %vm11769_vm1, %v7722_v11, %v2686_v26  ;;  %vm8545_vm8 = vmand %vm8509_vm3, %vm11770_vm2  ;;  %v11771_v21 = vmov 0  ;;  %v1725_v13 = vrot.slane %v8347_v30, 4  ;;  %v2692_v8 = vshll.u32 %v2598_v19, 16  ;;  %v1632_v19 = vld [vmem:[#allocation2 + $0x4c] sm:$0xf] }
 0x18d   : > { %v11772_v21 = vsel %vm8545_vm8, 4294967295, %v11771_v21  ;;  %v3134_v17 = vshrl.u32 %v3056_v5, 16  ;;  %v1396_v2 = vsel %vm8526_vm14, %v1355_v48, 0.0  ;;  %v1729_v62 = vrot.slane %v1727_v41, 7 }
 0x18e   : > { %11773 = vst [vmem:[#allocation15_spill] sm:$0xff] %v11772_v21  ;;  %v8554_v24 = vrot.slane %v2689_v40, 7  ;;  %v5678_v1 = vpack.c.bf16 %v1396_v2, %v1395_v61  ;;  %v1730_v23 = vshll.u32 %v7722_v11, 16  ;;  %v1736_v29 = vshrl.u32 %v7724_v20, 16 }
 0x18f   : > { %vm11774_vm5 = vcmp.le.f32.partialorder %v11738_v44, 16.0  ;;  %vm11775_vm3 = vcmp.ge.f32.partialorder %v11738_v44, 1.0  ;;  %v3136_v46 = vrot.slane %v3134_v17, 7  ;;  %v3137_v45 = vshll.u32 %v3056_v5, 16 }
 0x190   : > { %vm8562_vm2 = vmand %vm11775_vm3, %vm11774_vm5  ;;  %v1385_v38 = vsel %vm8545_vm8, %v1344_v34, 0.0  ;;  %v1734_v61 = vrot.slane %v1729_v62, 4  ;;  %v2694_v7 = vor.u32 %v2692_v8, %v8554_v24  ;;  %5715 = vst [vmem:[#allocation2 + $0x88] sm:$0xff] %v5678_v1   ;;  %v1732_v26 = vor.u32 %v1730_v23, %v1729_v62  ;;  %v11781_v1 = vld [vmem:[#allocation41_spill] sm:$0xff] }
 0x191   : > { %v8571_v48 = vrot.slane %v1736_v29, 7  ;;  %v1739_v44 = vshll.u32 %v7724_v20, 16  ;;  %v3139_v41 = vor.u32 %v3137_v45, %v3136_v46  ;;  %v2185_v40 = vrot.slane %v8464_v55, 4 }
 0x192   : > { %vm11778_vm5 = vcmp.ge.f32.partialorder %v11754_v42, 1.0  ;;  %v1242_v5 = vadd.f32 %v8235_v51, %v1241_v59  ;;  %v2695_v8 = vsel %vm6716_vm6, %v2687_v14, %v2694_v7  ;;  %v1733_v17 = vsel %vm6716_vm6, %v1725_v13, %v1732_v26  ;;  %v11787_v26 = vld [vmem:[#allocation20_spill] sm:$0xff] }
 0x193   : > { %vm8580_vm3 = vmand %vm8562_vm2, %vm11778_vm5  ;;  %v1741_v55 = vor.u32 %v1739_v44, %v8571_v48  ;;  %v5495_v62 = vcombine.low %v8566_v16, %v1632_v19  ;;  %v3057_v23 = vsel %vm11769_vm1, %v7724_v20, %v2695_v8  ;;  %v3140_v59 = vsel %vm6716_vm6, %v3132_v10, %v3139_v41 }
 0x194   : > { %v2085_v14 = vsel %vm6736_vm7, %v7722_v11, %v1733_v17  ;;  %v1345_v13 = vmax.f32 %v1242_v5, 0.0  ;;  %v3141_v29 = vrot.slane %v3136_v46, 4  ;;  %v3143_v30 = vshrl.u32 %v3057_v23, 16 }
 0x195   : > { %vm11782_vm2 = vnez %v11590_v35  ;;  %v1742_v19 = vsel %vm6716_vm6, %v1734_v61, %v1741_v55  ;;  %vm11783_vm5 = vcmp.le.f32.partialorder %v11754_v42, 16.0  ;;  %v11784_v10 = vmov 0 }
 0x196   : > { %v3510_v45 = vsel %vm11782_vm2, %v7722_v11, %v3140_v59  ;;  %vm8610_vm12 = vmand %vm8580_vm3, %vm11783_vm5  ;;  %v3146_v7 = vshll.u32 %v3057_v23, 16  ;;  %vm11788_vm14 = vnez %v11608_v43  ;;  %v2086_v44 = vsel %vm6736_vm7, %v7724_v20, %v1742_v19 }
 0x197   : > { %v11785_v10 = vsel %vm8610_vm12, 4294967295, %v11784_v10  ;;  %v3558_v46 = vsel %vm11788_vm14, %v11787_v26, %v3510_v45  ;;  %v2187_v41 = vshrl.u32 %v2085_v14, 16  ;;  %v8620_v5 = vrot.slane %v3143_v30, 7 }
 0x198   : > { %11786 = vst [vmem:[#allocation9_spill] sm:$0xff] %v11785_v10  ;;  %v3636_v61 = vshrl.u32 %v3558_v46, 16  ;;  %v2190_v42 = vshll.u32 %v2085_v14, 16  ;;  %v2196_v8 = vshrl.u32 %v2086_v44, 16  ;;  %v3639_v34 = vshll.u32 %v3558_v46, 16 }
 0x199   : > { %v2189_v17 = vrot.slane %v2187_v41, 7  ;;  %v1386_v55 = vsel %vm8610_vm12, %v1345_v13, 0.0  ;;  %v4240_v23 = vshrl.u32 %v5495_v62, 16  ;;  %v3148_v59 = vor.u32 %v3146_v7, %v8620_v5 }
 0x19a   : > { %v3638_v2 = vrot.slane %v3636_v61, 7  ;;  %v8625_v45 = vrot.slane %v2196_v8, 7  ;;  %v2199_v28 = vshll.u32 %v2086_v44, 16  ;;  %v5653_v58 = vpack.c.bf16 %v1386_v55, %v1385_v38  ;;  %v11789_v61 = vld [vmem:[#allocation47_spill] sm:$0xff] }
 0x19b   : > { %v2192_v25 = vor.u32 %v2190_v42, %v2189_v17  ;;  %v2194_v19 = vrot.slane %v2189_v17, 4  ;;  %v3149_v14 = vsel %vm6716_vm6, %v3141_v29, %v3148_v59  ;;  %v3150_v13 = vrot.slane %v8620_v5, 4 }
 0x19c   : > { %v3641_v30 = vor.u32 %v3639_v34, %v3638_v2  ;;  %v2201_v46 = vor.u32 %v2199_v28, %v8625_v45  ;;  %v3511_v7 = vsel %vm11782_vm2, %v7724_v20, %v3149_v14  ;;  %5710 = vst [vmem:[#allocation2 + $0x60] sm:$0xff] %v5653_v58   ;;  %v4242_v41 = vrot.slane %v4240_v23, 1 }
 0x19d   : > { %v2193_v44 = vsel %vm6716_vm6, %v2185_v40, %v2192_v25  ;;  %v4243_v38 = vshll.u32 %v5495_v62, 16  ;;  %v3559_v42 = vsel %vm11788_vm14, %v11789_v61, %v3511_v7  ;;  %v3643_v29 = vrot.slane %v3638_v2, 4  ;;  %v11793_v62 = vld [vmem:[#allocation49_spill] sm:$0xff] }
 0x19e   : > { %v2202_v28 = vsel %vm6716_vm6, %v2194_v19, %v2201_v46  ;;  %v2549_v8 = vsel %vm11734_vm13, %v7722_v11, %v2193_v44  ;;  %v11790_v34 = vrot.slane %v8203_v36, 4  ;;  %v3645_v58 = vshrl.u32 %v3559_v42, 16  ;;  %v11797_v46 = vld [vmem:[#allocation46_spill] sm:$0xff] }
 0x19f   : > { %v2550_v40 = vsel %vm11734_vm13, %v7724_v20, %v2202_v28  ;;  %vm11791_vm5 = vcmp.le.f32.partialorder %v11781_v1, 16.0  ;;  %vm11792_vm3 = vcmp.ge.f32.partialorder %v11781_v1, 1.0  ;;  %v2599_v11 = vsel %vm11740_vm10, %v11787_v26, %v2549_v8 }
 0x1a0   : > { %v3642_v25 = vsel %vm6716_vm6, %v11790_v34, %v3641_v30  ;;  %vm706_vm9 = vmand %vm11792_vm3, %vm11791_vm5  ;;  %v2600_v36 = vsel %vm11740_vm10, %v11789_v61, %v2550_v40  ;;  %v4245_v2 = vrot.slane %v4243_v38, 2  ;;  %v1287_v17 = vadd.f32 %v8235_v51, %v11793_v62  ;;  %v11799_v34 = vld [vmem:[#allocation36_spill] sm:$0xff] }
 0x1a1   : > { %v8665_v20 = vrot.slane %v3645_v58, 7  ;;  %v3648_v55 = vshll.u32 %v3559_v42, 16  ;;  %v2698_v23 = vshrl.u32 %v2599_v11, 16  ;;  %v2707_v1 = vshrl.u32 %v2600_v36, 16 }
 0x1a2   : > { %v4012_v59 = vsel %vm8092_vm15, %v11787_v26, %v3642_v25  ;;  %v2701_v19 = vshll.u32 %v2599_v11, 16  ;;  %v8670_v14 = vor.u32 %v4245_v2, %v4242_v41  ;;  %vm11794_vm3 = vcmp.ge.f32.partialorder %v8300_v9, 1.0 }
 0x1a3   : > { %vm8674_vm5 = vmand %vm706_vm9, %vm11794_vm3  ;;  %v543_v7 = vmul.f32 18.0, %v11797_v46  ;;  %v3650_v44 = vor.u32 %v3648_v55, %v8665_v20  ;;  %v2700_v38 = vrot.slane %v2698_v23, 7  ;;  %v8680_v42 = vrot.slane %v2707_v1, 7  ;;  %v11807_v1 = vld [vmem:[#allocation51_spill] sm:$0xff] }
 0x1a4   : > { %v2710_v28 = vshll.u32 %v2600_v36, 16  ;;  %vm11798_vm12 = vsmask.f32 6400  ;;  %v1356_v41 = vmax.f32 %v1287_v17, 0.0  ;;  %v11800_v25 = vcvt.s32.f32 %v11799_v34 }
 0x1a5   : > { %v4247_v8 = vsel %vm11798_vm12, %v8498_v53, %v8670_v14  ;;  %v3651_v40 = vsel %vm6716_vm6, %v3643_v29, %v3650_v44  ;;  %v2703_v11 = vor.u32 %v2701_v19, %v2700_v38  ;;  %v2705_v2 = vrot.slane %v2700_v38, 4  ;;  %v8705_v29 = vpop.f32.mrb[32].mxu1 }
 0x1a6   : > { %v584_v58 = vsub.f32 %v11800_v25, %v543_v7  ;;  %v2712_v62 = vor.u32 %v2710_v28, %v8680_v42  ;;  %5953 = vmatmul.mubr.bf16.gmra.mrb[60].mxu1 %v4247_v8  ;;  %vm11801_vm3 = vcmp.le.f32.partialorder %v8300_v9, 16.0  ;;  %v11802_v53 = vmov 0  ;;  %v5910_v30 = vpop.f32.mrb[33].mxu1 }
 0x1a7   : > { %vm8695_vm8 = vmand %vm8674_vm5, %vm11801_vm3  ;;  %v4013_v36 = vsel %vm8092_vm15, %v11789_v61, %v3651_v40  ;;  %vm666_vm12 = vcmp.le.f32.partialorder %v11797_v46, 16.0  ;;  %5956 = vmatprep.mubr.msk.bf16.mxu1 %vm11588_vm0, %v11587_v47  ;;  %v11805_v17 = vrot.slane %v8554_v24, 4  ;;  %vm11806_vm5 = vcmp.ge.f32.partialorder %v11797_v46, 1.0  ;;  %v8728_v46 = vpop.f32.mrb[34].mxu1 }
 0x1a8   : > { %v11803_v53 = vsel %vm8695_vm8, 4294967295, %v11802_v53  ;;  %vm748_vm9 = vcmp.ge.f32.partialorder %v584_v58, 1.0  ;;  %v8707_v9 = vcombine.low %v4012_v59, %v4013_v36  ;;  %v2713_v23 = vsel %vm6716_vm6, %v2705_v2, %v2712_v62  ;;  %vm707_vm3 = vmand %vm11806_vm5, %vm666_vm12 }
 0x1a9   : > { %11804 = vst [vmem:[#allocation12_spill] sm:$0xff] %v11803_v53  ;;  %v2704_v55 = vsel %vm6716_vm6, %v11805_v17, %v2703_v11  ;;  %v1290_v19 = vadd.f32 %v8235_v51, %v11807_v1  ;;  %v3059_v24 = vsel %vm11769_vm1, %v11789_v61, %v2713_v23  ;;  %v1397_v7 = vsel %vm8695_vm8, %v1356_v41, 0.0  ;;  %vm789_vm11 = vmand %vm707_vm3, %vm748_vm9  ;;  %v5911_v23 = vpop.f32.mrb[35].mxu1 }
 0x1aa   : > { %v3058_v59 = vsel %vm11769_vm1, %v11787_v26, %v2704_v55  ;;  %v1745_v44 = vshrl.u32 %v11787_v26, 16  ;;  %v11250_v38 = vrot.slane %v8707_v9, 1  ;;  %v3161_v34 = vshrl.u32 %v3059_v24, 16 }
 0x1ab   : > { %v3152_v28 = vshrl.u32 %v3058_v59, 16  ;;  %v3155_v8 = vshll.u32 %v3058_v59, 16  ;;  %vm11808_vm12 = vcmp.le.f32.partialorder %v584_v58, 16.0  ;;  %v11809_v25 = vmov 0 }
 0x1ac   : > { %vm8732_vm5 = vmand %vm789_vm11, %vm11808_vm12  ;;  %v3164_v40 = vshll.u32 %v3059_v24, 16  ;;  %v1357_v11 = vmax.f32 %v1290_v19, 0.0  ;;  %v1747_v2 = vrot.slane %v1745_v44, 7  ;;  %v1748_v41 = vshll.u32 %v11787_v26, 16 }
 0x1ad   : > { %v11810_v25 = vsel %vm8732_vm5, 4294967295, %v11809_v25  ;;  %v11812_v62 = vrot.slane %v8303_v22, 1  ;;  %vm11813_vm9 = vcmask 1046528   ;;  %v3154_v17 = vrot.slane %v3152_v28, 7 }
 0x1ae   : > { %11811 = vst [vmem:[#allocation38_spill] sm:$0xff] %v11810_v25  ;;  %v8742_v55 = vrot.slane %v3161_v34, 7  ;;  %v1754_v58 = vshrl.u32 %v11789_v61, 16  ;;  %v3652_v1 = vrot.slane %v8665_v20, 4  ;;  %v1398_v19 = vsel %vm8732_vm5, %v1357_v11, 0.0  ;;  %vm11817_vm3 = vmmov %vm11813_vm9 }
 0x1af   : > { %v4751_v36 = vsel %vm11813_vm9, %v11812_v62, %v11250_v38  ;;  %v1743_v30 = vrot.slane %v8571_v48, 4  ;;  %v1750_v59 = vor.u32 %v1748_v41, %v1747_v2  ;;  %v3157_v22 = vor.u32 %v3155_v8, %v3154_v17  ;;  %v8752_v34 = vld [vmem:[#allocation2 + $0x50] sm:$0xf]  ;;  %v8759_v48 = vld [vmem:[#allocation2 + $0x54] sm:$0xf] }
 0x1b0   : > { %6037 = vmatmul.mubr.bf16.gmra.mrb[48].mxu0 %v4751_v36  ;;  %v3159_v24 = vrot.slane %v3154_v17, 4  ;;  %v3166_v44 = vor.u32 %v3164_v40, %v8742_v55  ;;  %v5683_v28 = vpack.c.bf16 %v1398_v19, %v1397_v7  ;;  %v1752_v20 = vrot.slane %v1747_v2, 4 }
 0x1b1   : > { %6040 = vmatprep.mubr.msk.bf16.mxu0 %vm11588_vm0, %v11587_v47  ;;  %v1751_v62 = vsel %vm6716_vm6, %v1743_v30, %v1750_v59  ;;  %v8756_v36 = vrot.slane %v1754_v58, 7  ;;  %v1757_v11 = vshll.u32 %v11789_v61, 16  ;;  %v3158_v8 = vsel %vm6716_vm6, %v3150_v13, %v3157_v22 }
 0x1b2   : > { %v3167_v7 = vsel %vm6716_vm6, %v3159_v24, %v3166_v44  ;;  %5716 = vst [vmem:[#allocation2 + $0x90] sm:$0xff] %v5683_v28   ;;  %v2087_v40 = vsel %vm6736_vm7, %v11787_v26, %v1751_v62  ;;  %v2203_v2 = vrot.slane %v8625_v45, 4  ;;  %v3512_v41 = vsel %vm11782_vm2, %v11787_v26, %v3158_v8  ;;  %v6270_v8 = vld [vmem:[#allocation2 + $0x2c] sm:$0xf] }
 0x1b3   : > { %v3513_v5 = vsel %vm11782_vm2, %v11789_v61, %v3167_v7  ;;  %v1759_v13 = vor.u32 %v1757_v11, %v8756_v36  ;;  %v2205_v17 = vshrl.u32 %v2087_v40, 16  ;;  %v3560_v58 = vsel %vm11788_vm14, %v7996_v12, %v3512_v41 }
 0x1b4   : > { %v3561_v23 = vsel %vm11788_vm14, %v7998_v50, %v3513_v5  ;;  %v2208_v45 = vshll.u32 %v2087_v40, 16  ;;  %v5496_v19 = vcombine.low %v8752_v34, %v8759_v48  ;;  %v3654_v26 = vshrl.u32 %v3560_v58, 16  ;;  %v11814_v40 = vld [vmem:[#allocation6_spill] sm:$0xff] }
 0x1b5   : > { %v3657_v30 = vshll.u32 %v3560_v58, 16  ;;  %v3663_v59 = vshrl.u32 %v3561_v23, 16  ;;  %v3666_v22 = vshll.u32 %v3561_v23, 16  ;;  %v1760_v61 = vsel %vm6716_vm6, %v1752_v20, %v1759_v13 }
 0x1b6   : > { %v2207_v24 = vrot.slane %v2205_v17, 7  ;;  %v4249_v44 = vshrl.u32 %v5496_v19, 16  ;;  %v4252_v28 = vshll.u32 %v5496_v19, 16  ;;  %v3656_v62 = vrot.slane %v3654_v26, 7 }
 0x1b7   : > { %v8788_v11 = vrot.slane %v3663_v59, 7  ;;  %v2088_v7 = vsel %vm6736_vm7, %v6270_v8, %v1760_v61  ;;  %v8793_v41 = vadd.s32 272, %v11814_v40  ;;  %v2714_v23 = vrot.slane %v8680_v42, 4 }
 0x1b8   : > { %v2210_v5 = vor.u32 %v2208_v45, %v2207_v24  ;;  %v2212_v58 = vrot.slane %v2207_v24, 4  ;;  %v2214_v38 = vshrl.u32 %v2088_v7, 16  ;;  %v3659_v25 = vor.u32 %v3657_v30, %v3656_v62  ;;  %v6271_v24 = vld [vmem:[#allocation2 + $0x28] sm:$0xf] }
 0x1b9   : > { %v3661_v20 = vrot.slane %v3656_v62, 4  ;;  %v3668_v13 = vor.u32 %v3666_v22, %v8788_v11  ;;  %v2217_v17 = vshll.u32 %v2088_v7, 16  ;;  %v4251_v59 = vrot.slane %v4249_v44, 1 }
 0x1ba   : > { %v2211_v19 = vsel %vm6716_vm6, %v2203_v2, %v2210_v5  ;;  %v8799_v26 = vrot.slane %v2214_v38, 7  ;;  %v4254_v61 = vrot.slane %v4252_v28, 2  ;;  %v3660_v53 = vsel %vm6716_vm6, %v3652_v1, %v3659_v25 }
 0x1bb   : > { %v3669_v45 = vsel %vm6716_vm6, %v3661_v20, %v3668_v13  ;;  %v2551_v42 = vsel %vm11734_vm13, %v6271_v24, %v2211_v19  ;;  %v380_v30 = vcvt.s32.f32 %v8793_v41  ;;  %v4014_v2 = vsel %vm8092_vm15, %v7996_v12, %v3660_v53 }
 0x1bc   : > { %v4015_v38 = vsel %vm8092_vm15, %v7998_v50, %v3669_v45  ;;  %v2219_v22 = vor.u32 %v2217_v17, %v8799_v26  ;;  %v2601_v25 = vsel %vm11740_vm10, %v7996_v12, %v2551_v42  ;;  %v3168_v28 = vrot.slane %v8742_v55, 4 }
 0x1bd   : > { %v8818_v1 = vcombine.low %v4014_v2, %v4015_v38  ;;  %v2716_v44 = vshrl.u32 %v2601_v25, 16  ;;  %v8821_v62 = vor.u32 %v4254_v61, %v4251_v59  ;;  %v2719_v7 = vshll.u32 %v2601_v25, 16 }
 0x1be   : > { %v2220_v53 = vsel %vm6716_vm6, %v2212_v58, %v2219_v22  ;;  %v421_v41 = vadd.f32 0.5, %v380_v30  ;;  %v8826_v5 = vadd.s32 280, %v11814_v40  ;;  %vm11815_vm11 = vsmask.f32 6400 }
 0x1bf   : > { %v4752_v20 = vrot.slane %v8818_v1, 1  ;;  %v2552_v13 = vsel %vm11734_vm13, %v6270_v8, %v2220_v53  ;;  %v2718_v17 = vrot.slane %v2716_v44, 7  ;;  %v4256_v19 = vsel %vm11815_vm11, %v8670_v14, %v8821_v62 }
 0x1c0   : > { %v2602_v59 = vsel %vm11740_vm10, %v7998_v50, %v2552_v13  ;;  %v3670_v58 = vrot.slane %v8788_v11, 4  ;;  %5957 = vmatmul.mubr.bf16.gmra.mrb[64].mxu1 %v4256_v19  ;;  %v462_v61 = vmul.f32 0.055555556, %v421_v41  ;;  %v381_v45 = vcvt.s32.f32 %v8826_v5  ;;  %v8953_v11 = vld [vmem:[#allocation2 + $0x38] sm:$0xf] }
 0x1c1   : > { %v11816_v24 = vrot.slane %v8707_v9, 1  ;;  %v2721_v42 = vor.u32 %v2719_v7, %v2718_v17  ;;  %v2725_v2 = vshrl.u32 %v2602_v59, 16  ;;  %v8846_v14 = vadd.f32 %v8235_v51, %v8021_v3  ;;  %5960 = vmatprep.mubr.msk.bf16.mxu1 %vm11588_vm0, %v11587_v47 }
 0x1c2   : > { %v2723_v50 = vrot.slane %v2718_v17, 4  ;;  %v2728_v38 = vshll.u32 %v2602_v59, 16  ;;  %v503_v22 = vfloor.f32 %v462_v61  ;;  %v422_v25 = vadd.f32 0.5, %v381_v45 }
 0x1c3   : > { %v4753_v8 = vsel %vm11817_vm3, %v11816_v24, %v4752_v20  ;;  %v2722_v9 = vsel %vm6716_vm6, %v2714_v23, %v2721_v42  ;;  %v8854_v44 = vrot.slane %v2725_v2, 7  ;;  %v8858_v3 = vadd.f32 %v8235_v51, %v8050_v18  ;;  %v8870_v24 = vld [vmem:[#allocation2 + $0x30] sm:$0xf] }
 0x1c4   : > { %6041 = vmatmul.mubr.bf16.gmra.mrb[52].mxu0 %v4753_v8  ;;  %v1763_v53 = vshrl.u32 %v7996_v12, 16  ;;  %v3060_v7 = vsel %vm11769_vm1, %v7996_v12, %v2722_v9  ;;  %v544_v41 = vmul.f32 18.0, %v503_v22  ;;  %vm626_vm12 = vcmp.ge.f32.partialorder %v503_v22, 1.0 }
 0x1c5   : > { %6044 = vmatprep.mubr.msk.bf16.mxu0 %vm11588_vm0, %v11587_v47  ;;  %vm667_vm9 = vcmp.le.f32.partialorder %v503_v22, 16.0  ;;  %v2730_v5 = vor.u32 %v2728_v38, %v8854_v44  ;;  %v3170_v13 = vshrl.u32 %v3060_v7, 16  ;;  %v463_v17 = vmul.f32 0.055555556, %v422_v25  ;;  %v8875_v38 = vld [vmem:[#allocation2 + $0x34] sm:$0xf] }
 0x1c6   : > { %v1761_v23 = vrot.slane %v8756_v36, 4  ;;  %v3173_v19 = vshll.u32 %v3060_v7, 16  ;;  %v585_v59 = vsub.f32 %v380_v30, %v544_v41  ;;  %vm8866_vm11 = vmand %vm626_vm12, %vm667_vm9  ;;  %v1765_v61 = vrot.slane %v1763_v53, 7  ;;  %v8885_v7 = vpop.f32.mrb[36].mxu1 }
 0x1c7   : > { %v1766_v12 = vshll.u32 %v8870_v24, 16  ;;  %v2731_v8 = vsel %vm6716_vm6, %v2723_v50, %v2730_v5  ;;  %v3172_v42 = vrot.slane %v3170_v13, 7  ;;  %v504_v2 = vfloor.f32 %v463_v17  ;;  %v5914_v13 = vpop.f32.mrb[37].mxu1 }
 0x1c8   : > { %v1772_v36 = vshrl.u32 %v8875_v38, 16  ;;  %v3061_v30 = vsel %vm11769_vm1, %v8875_v38, %v2731_v8  ;;  %vm749_vm3 = vcmp.ge.f32.partialorder %v585_v59, 1.0  ;;  %vm831_vm12 = vcmp.le.f32.partialorder %v585_v59, 16.0 }
 0x1c9   : > { %v1768_v22 = vor.u32 %v1766_v12, %v1765_v61  ;;  %v3175_v25 = vor.u32 %v3173_v19, %v3172_v42  ;;  %v3179_v9 = vshrl.u32 %v3061_v30, 16  ;;  %vm790_vm9 = vmand %vm8866_vm11, %vm749_vm3  ;;  %v1358_v50 = vmax.f32 %v8846_v14, 0.0  ;;  %v1321_v12 = vpop.f32.mrb[38].mxu1 }
 0x1ca   : > { %v1359_v53 = vmax.f32 %v8858_v3, 0.0  ;;  %v545_v41 = vmul.f32 18.0, %v504_v2  ;;  %vm627_vm5 = vcmp.ge.f32.partialorder %v504_v2, 1.0  ;;  %vm668_vm8 = vcmp.le.f32.partialorder %v504_v2, 16.0  ;;  %vm8896_vm11 = vmand %vm790_vm9, %vm831_vm12 }
 0x1cb   : > { %v1769_v5 = vsel %vm6716_vm6, %v1761_v23, %v1768_v22  ;;  %v3176_v17 = vsel %vm6716_vm6, %v3168_v28, %v3175_v25  ;;  %v3177_v19 = vrot.slane %v3172_v42, 4  ;;  %v8893_v18 = vrot.slane %v3179_v9, 7  ;;  %vm709_vm3 = vmand %vm627_vm5, %vm668_vm8  ;;  %v5915_v28 = vpop.f32.mrb[39].mxu1 }
 0x1cc   : > { %v3182_v14 = vshll.u32 %v3061_v30, 16  ;;  %v11820_v3 = vmov 0  ;;  %v3514_v23 = vsel %vm11782_vm2, %v8870_v24, %v3176_v17  ;;  %v586_v8 = vsub.f32 %v381_v45, %v545_v41 }
 0x1cd   : > { %v11821_v3 = vsel %vm8896_vm11, 4294967295, %v11820_v3  ;;  %v1770_v55 = vrot.slane %v1765_v61, 4  ;;  %v8903_v2 = vrot.slane %v1772_v36, 7  ;;  %v3562_v59 = vsel %vm11788_vm14, %v8143_v27, %v3514_v23  ;;  %v8933_v23 = vld [vmem:[#allocation2 + $0x58] sm:$0xf] }
 0x1ce   : > { %11822 = vst [vmem:[#allocation14_spill] sm:$0xff] %v11821_v3  ;;  %v3184_v42 = vor.u32 %v3182_v14, %v8893_v18  ;;  %v1775_v30 = vshll.u32 %v8875_v38, 16  ;;  %v2089_v22 = vsel %vm6736_vm7, %v8870_v24, %v1769_v5  ;;  %v3672_v25 = vshrl.u32 %v3562_v59, 16 }
 0x1cf   : > { %v1399_v45 = vsel %vm8896_vm11, %v1358_v50, 0.0  ;;  %vm750_vm8 = vcmp.ge.f32.partialorder %v586_v8, 1.0  ;;  %vm832_vm5 = vcmp.le.f32.partialorder %v586_v8, 16.0  ;;  %v2221_v27 = vrot.slane %v8799_v26, 4 }
 0x1d0   : > { %v3185_v61 = vsel %vm6716_vm6, %v3177_v19, %v3184_v42  ;;  %vm791_vm12 = vmand %vm709_vm3, %vm750_vm8  ;;  %v1777_v36 = vor.u32 %v1775_v30, %v8903_v2  ;;  %v2223_v9 = vshrl.u32 %v2089_v22, 16  ;;  %v3674_v5 = vrot.slane %v3672_v25, 7  ;;  %v8936_v30 = vld [vmem:[#allocation2 + $0x5c] sm:$0xf] }
 0x1d1   : > { %v3515_v41 = vsel %vm11782_vm2, %v8875_v38, %v3185_v61  ;;  %v3675_v13 = vshll.u32 %v3562_v59, 16  ;;  %vm8922_vm9 = vmand %vm791_vm12, %vm832_vm5  ;;  %v11823_v17 = vmov 0  ;;  %v2226_v50 = vshll.u32 %v2089_v22, 16 }
 0x1d2   : > { %v11824_v17 = vsel %vm8922_vm9, 4294967295, %v11823_v17  ;;  %v3563_v19 = vsel %vm11788_vm14, %v8173_v4, %v3515_v41  ;;  %v1400_v14 = vsel %vm8922_vm9, %v1359_v53, 0.0  ;;  %v1778_v26 = vsel %vm6716_vm6, %v1770_v55, %v1777_v36 }
 0x1d3   : > { %11825 = vst [vmem:[#allocation11_spill] sm:$0xff] %v11824_v17  ;;  %v2225_v12 = vrot.slane %v2223_v9, 7  ;;  %v3677_v8 = vor.u32 %v3675_v13, %v3674_v5  ;;  %v3679_v28 = vrot.slane %v3674_v5, 4  ;;  %v3681_v42 = vshrl.u32 %v3563_v19, 16 }
 0x1d4   : > { %v2732_v59 = vrot.slane %v8854_v44, 4  ;;  %v3684_v22 = vshll.u32 %v3563_v19, 16  ;;  %v5688_v25 = vpack.c.bf16 %v1400_v14, %v1399_v45  ;;  %v2090_v4 = vsel %vm6736_vm7, %v8875_v38, %v1778_v26 }
 0x1d5   : > { %v2228_v53 = vor.u32 %v2226_v50, %v2225_v12  ;;  %v3678_v55 = vsel %vm6716_vm6, %v3670_v58, %v3677_v8  ;;  %v8945_v61 = vrot.slane %v3681_v42, 7  ;;  %v2230_v36 = vrot.slane %v2225_v12, 4 }
 0x1d6   : > { %v2232_v9 = vshrl.u32 %v2090_v4, 16  ;;  %5717 = vst [vmem:[#allocation2 + $0x98] sm:$0xff] %v5688_v25   ;;  %v2235_v41 = vshll.u32 %v2090_v4, 16  ;;  %v5497_v45 = vcombine.low %v8933_v23, %v8936_v30  ;;  %v341_v5 = vadd.s32 288, %v11814_v40  ;;  %v8970_v4 = vld [vmem:[#allocation2 + $0x3c] sm:$0xf] }
 0x1d7   : > { %v2229_v44 = vsel %vm6716_vm6, %v2221_v27, %v2228_v53  ;;  %v3686_v13 = vor.u32 %v3684_v22, %v8945_v61  ;;  %v4016_v58 = vsel %vm8092_vm15, %v8953_v11, %v3678_v55  ;;  %v342_v25 = vadd.s32 296, %v11814_v40 }
 0x1d8   : > { %v8958_v50 = vrot.slane %v2232_v9, 7  ;;  %v2553_v27 = vsel %vm11734_vm13, %v8870_v24, %v2229_v44  ;;  %v4258_v14 = vshrl.u32 %v5497_v45, 16  ;;  %v4261_v26 = vshll.u32 %v5497_v45, 16 }
 0x1d9   : > { %v2603_v19 = vsel %vm11740_vm10, %v8953_v11, %v2553_v27  ;;  %v382_v12 = vcvt.s32.f32 %v341_v5  ;;  %v3687_v8 = vsel %vm6716_vm6, %v3679_v28, %v3686_v13  ;;  %vm11826_vm3 = vsmask.f32 6400 }
 0x1da   : > { %v2237_v42 = vor.u32 %v2235_v41, %v8958_v50  ;;  %v2734_v22 = vshrl.u32 %v2603_v19, 16  ;;  %v4017_v24 = vsel %vm8092_vm15, %v8970_v4, %v3687_v8  ;;  %v4260_v53 = vrot.slane %v4258_v14, 1 }
 0x1db   : > { %v4263_v55 = vrot.slane %v4261_v26, 2  ;;  %v423_v9 = vadd.f32 0.5, %v382_v12  ;;  %v8975_v44 = vcombine.low %v4016_v58, %v4017_v24  ;;  %v2737_v5 = vshll.u32 %v2603_v19, 16 }
 0x1dc   : > { %v2238_v45 = vsel %vm6716_vm6, %v2230_v36, %v2237_v42  ;;  %v2736_v28 = vrot.slane %v2734_v22, 7  ;;  %v1303_v36 = vadd.f32 %v8235_v51, %v8255_v37  ;;  %vm11827_vm8 = vcmask 1046528  }
 0x1dd   : > { %v2554_v41 = vsel %vm11734_vm13, %v8875_v38, %v2238_v45  ;;  %v8982_v13 = vor.u32 %v4263_v55, %v4260_v53  ;;  %v464_v27 = vmul.f32 0.055555556, %v423_v9  ;;  %v4754_v14 = vrot.slane %v8975_v44, 1 }
 0x1de   : > { %v2604_v58 = vsel %vm11740_vm10, %v8970_v4, %v2554_v41  ;;  %v2739_v26 = vor.u32 %v2737_v5, %v2736_v28  ;;  %v2741_v19 = vrot.slane %v2736_v28, 4  ;;  %v383_v55 = vcvt.s32.f32 %v342_v25  ;;  %v9014_v28 = vld [vmem:[%s11099_s2] ss:$0 sm:$0xff] }
 0x1df   : > { %v2743_v8 = vshrl.u32 %v2604_v58, 16  ;;  %v4265_v38 = vsel %vm11826_vm3, %v8821_v62, %v8982_v13  ;;  %v505_v42 = vfloor.f32 %v464_v27  ;;  %v4755_v22 = vsel %vm11827_vm8, %v4752_v20, %v4754_v14 }
 0x1e0   : > { %v2740_v24 = vsel %vm6716_vm6, %v2732_v59, %v2739_v26  ;;  %v2746_v53 = vshll.u32 %v2604_v58, 16  ;;  %5961 = vmatmul.mubr.bf16.gmra.mrb[68].mxu1 %v4265_v38  ;;  %6045 = vmatmul.mubr.bf16.gmra.mrb[56].mxu0 %v4755_v22  ;;  %v1360_v20 = vmax.f32 %v1303_v36, 0.0  ;;  %v424_v59 = vadd.f32 0.5, %v383_v55 }
 0x1e1   : > { %v9001_v51 = vrot.slane %v2743_v8, 7  ;;  %v3062_v37 = vsel %vm11769_vm1, %v8953_v11, %v2740_v24  ;;  %v546_v62 = vmul.f32 18.0, %v505_v42  ;;  %vm628_vm5 = vcmp.ge.f32.partialorder %v505_v42, 1.0  ;;  %5964 = vmatprep.mubr.msk.bf16.mxu1 %vm11588_vm0, %v11587_v47  ;;  %6048 = vmatprep.mubr.msk.bf16.mxu0 %vm11588_vm0, %v11587_v47 }
 0x1e2   : > { %v3188_v1 = vshrl.u32 %v3062_v37, 16  ;;  %vm669_vm12 = vcmp.le.f32.partialorder %v505_v42, 16.0  ;;  %v3191_v9 = vshll.u32 %v3062_v37, 16  ;;  %v1306_v5 = vadd.f32 %v9014_v28, %v8282_v60 }
 0x1e3   : > { %v2748_v25 = vor.u32 %v2746_v53, %v9001_v51  ;;  %v587_v45 = vsub.f32 %v382_v12, %v546_v62  ;;  %vm710_vm3 = vmand %vm628_vm5, %vm669_vm12  ;;  %v465_v27 = vmul.f32 0.055555556, %v424_v59  ;;  %v1779_v58 = vrot.slane %v8903_v2, 4 }
 0x1e4   : > { %v3190_v41 = vrot.slane %v3188_v1, 7  ;;  %v1781_v26 = vshrl.u32 %v8953_v11, 16  ;;  %v1784_v12 = vshll.u32 %v8953_v11, 16  ;;  %v1361_v42 = vmax.f32 %v1306_v5, 0.0 }
 0x1e5   : > { %v2749_v36 = vsel %vm6716_vm6, %v2741_v19, %v2748_v25  ;;  %vm751_vm8 = vcmp.ge.f32.partialorder %v587_v45, 1.0  ;;  %vm833_vm9 = vcmp.le.f32.partialorder %v587_v45, 16.0  ;;  %v506_v60 = vfloor.f32 %v465_v27 }
 0x1e6   : > { %v3063_v8 = vsel %vm11769_vm1, %v8970_v4, %v2749_v36  ;;  %v3193_v38 = vor.u32 %v3191_v9, %v3190_v41  ;;  %vm792_vm5 = vmand %vm710_vm3, %vm751_vm8  ;;  %v3195_v22 = vrot.slane %v3190_v41, 4  ;;  %v11828_v2 = vmov 0 }
 0x1e7   : > { %v3197_v24 = vshrl.u32 %v3063_v8, 16  ;;  %vm9026_vm12 = vmand %vm792_vm5, %vm833_vm9  ;;  %v1783_v53 = vrot.slane %v1781_v26, 7  ;;  %v1790_v19 = vshrl.u32 %v8970_v4, 16  ;;  %v11831_v37 = vrot.slane %v8893_v18, 4 }
 0x1e8   : > { %v11829_v2 = vsel %vm9026_vm12, 4294967295, %v11828_v2  ;;  %v3200_v1 = vshll.u32 %v3063_v8, 16  ;;  %v547_v59 = vmul.f32 18.0, %v506_v60  ;;  %vm629_vm11 = vcmp.ge.f32.partialorder %v506_v60, 1.0 }
 0x1e9   : > { %11830 = vst [vmem:[#allocation45_spill] sm:$0xff] %v11829_v2  ;;  %v3194_v62 = vsel %vm6716_vm6, %v11831_v37, %v3193_v38  ;;  %v9035_v25 = vrot.slane %v3197_v24, 7  ;;  %vm670_vm9 = vcmp.le.f32.partialorder %v506_v60, 16.0  ;;  %v1786_v45 = vor.u32 %v1784_v12, %v1783_v53 }
 0x1ea   : > { %v3516_v9 = vsel %vm11782_vm2, %v8953_v11, %v3194_v62  ;;  %v1401_v18 = vsel %vm9026_vm12, %v1360_v20, 0.0  ;;  %v588_v41 = vsub.f32 %v383_v55, %v547_v59  ;;  %vm711_vm3 = vmand %vm629_vm11, %vm670_vm9  ;;  %v9045_v27 = vrot.slane %v1790_v19, 7 }
 0x1eb   : > { %v3564_v5 = vsel %vm11788_vm14, %v8358_v33, %v3516_v9  ;;  %v3202_v26 = vor.u32 %v3200_v1, %v9035_v25  ;;  %v1787_v8 = vsel %vm6716_vm6, %v1779_v58, %v1786_v45  ;;  %v1788_v38 = vrot.slane %v1783_v53, 4 }
 0x1ec   : > { %v3690_v36 = vshrl.u32 %v3564_v5, 16  ;;  %vm752_vm8 = vcmp.ge.f32.partialorder %v588_v41, 1.0  ;;  %vm834_vm5 = vcmp.le.f32.partialorder %v588_v41, 16.0  ;;  %v1793_v12 = vshll.u32 %v8970_v4, 16 }
 0x1ed   : > { %v2091_v33 = vsel %vm6736_vm7, %v8953_v11, %v1787_v8  ;;  %v3203_v55 = vsel %vm6716_vm6, %v3195_v22, %v3202_v26  ;;  %v3693_v60 = vshll.u32 %v3564_v5, 16  ;;  %vm793_vm11 = vmand %vm711_vm3, %vm752_vm8  ;;  %v3688_v53 = vrot.slane %v8945_v61, 4  ;;  %v9074_v26 = vld [vmem:[#allocation2 + $0x60] sm:$0xf] }
 0x1ee   : > { %v3692_v20 = vrot.slane %v3690_v36, 7  ;;  %v2241_v24 = vshrl.u32 %v2091_v33, 16  ;;  %v3517_v58 = vsel %vm11782_vm2, %v8970_v4, %v3203_v55  ;;  %vm9060_vm9 = vmand %vm793_vm11, %vm834_vm5  ;;  %v11832_v19 = vmov 0  ;;  %v9076_v36 = vld [vmem:[#allocation2 + $0x64] sm:$0xf] }
 0x1ef   : > { %v11833_v19 = vsel %vm9060_vm9, 4294967295, %v11832_v19  ;;  %v1795_v37 = vor.u32 %v1793_v12, %v9045_v27  ;;  %v2239_v62 = vrot.slane %v8958_v50, 4  ;;  %v3565_v22 = vsel %vm11788_vm14, %v8366_v49, %v3517_v58  ;;  %v9086_v55 = vld [vmem:[#allocation2 + $0x40] sm:$0xf] }
 0x1f0   : > { %11834 = vst [vmem:[#allocation18_spill] sm:$0xff] %v11833_v19  ;;  %v3695_v1 = vor.u32 %v3693_v60, %v3692_v20  ;;  %v1402_v59 = vsel %vm9060_vm9, %v1361_v42, 0.0  ;;  %v2244_v9 = vshll.u32 %v2091_v33, 16  ;;  %v3699_v45 = vshrl.u32 %v3565_v22, 16 }
 0x1f1   : > { %v5693_v5 = vpack.c.bf16 %v1402_v59, %v1401_v18  ;;  %v1796_v61 = vsel %vm6716_vm6, %v1788_v38, %v1795_v37  ;;  %v2750_v41 = vrot.slane %v9001_v51, 4  ;;  %v3697_v49 = vrot.slane %v3692_v20, 4 }
 0x1f2   : > { %v3696_v50 = vsel %vm6716_vm6, %v3688_v53, %v3695_v1  ;;  %v2092_v42 = vsel %vm6736_vm7, %v8970_v4, %v1796_v61  ;;  %v2243_v8 = vrot.slane %v2241_v24, 7  ;;  %v9083_v12 = vrot.slane %v3699_v45, 7 }
 0x1f3   : > { %v3702_v18 = vshll.u32 %v3565_v22, 16  ;;  %5718 = vst [vmem:[#allocation2 + $0xa0] sm:$0xff] %v5693_v5   ;;  %v2250_v38 = vshrl.u32 %v2092_v42, 16  ;;  %v4018_v60 = vsel %vm8092_vm15, %v9086_v55, %v3696_v50  ;;  %v2253_v20 = vshll.u32 %v2092_v42, 16 }
 0x1f4   : > { %v2246_v58 = vor.u32 %v2244_v9, %v2243_v8  ;;  %v5498_v53 = vcombine.low %v9074_v26, %v9076_v36  ;;  %v2248_v37 = vrot.slane %v2243_v8, 4  ;;  %v1799_v22 = vshrl.u32 %v9086_v55, 16 }
 0x1f5   : > { %v3704_v24 = vor.u32 %v3702_v18, %v9083_v12  ;;  %v9094_v1 = vrot.slane %v2250_v38, 7  ;;  %v1802_v61 = vshll.u32 %v9086_v55, 16  ;;  %v9106_v18 = vld [vmem:[#allocation2 + $0x44] sm:$0xf]  ;;  %vm11835_vm3 = vsmask.f32 6400 }
 0x1f6   : > { %v2247_v59 = vsel %vm6716_vm6, %v2239_v62, %v2246_v58  ;;  %v4267_v45 = vshrl.u32 %v5498_v53, 16  ;;  %v4270_v5 = vshll.u32 %v5498_v53, 16  ;;  %v1801_v8 = vrot.slane %v1799_v22, 7 }
 0x1f7   : > { %v3705_v9 = vsel %vm6716_vm6, %v3697_v49, %v3704_v24  ;;  %v2255_v50 = vor.u32 %v2253_v20, %v9094_v1  ;;  %v2555_v42 = vsel %vm11734_vm13, %v8953_v11, %v2247_v59  ;;  %v1797_v11 = vrot.slane %v9045_v27, 4 }
 0x1f8   : > { %v4019_v62 = vsel %vm8092_vm15, %v9106_v18, %v3705_v9  ;;  %v2605_v38 = vsel %vm11740_vm10, %v9086_v55, %v2555_v42  ;;  %v4269_v58 = vrot.slane %v4267_v45, 1  ;;  %v4272_v53 = vrot.slane %v4270_v5, 2 }
 0x1f9   : > { %v9114_v49 = vcombine.low %v4018_v60, %v4019_v62  ;;  %v2256_v20 = vsel %vm6716_vm6, %v2248_v37, %v2255_v50  ;;  %v2752_v24 = vshrl.u32 %v2605_v38, 16  ;;  %v2755_v59 = vshll.u32 %v2605_v38, 16 }
 0x1fa   : > { %v2556_v22 = vsel %vm11734_vm13, %v8970_v4, %v2256_v20  ;;  %v9122_v9 = vor.u32 %v4272_v53, %v4269_v58  ;;  %v1804_v33 = vor.u32 %v1802_v61, %v1801_v8  ;;  %v1808_v37 = vshrl.u32 %v9106_v18, 16 }
 0x1fb   : > { %v11257_v42 = vrot.slane %v9114_v49, 1  ;;  %v2606_v60 = vsel %vm11740_vm10, %v9106_v18, %v2556_v22  ;;  %v2754_v45 = vrot.slane %v2752_v24, 7  ;;  %v1806_v50 = vrot.slane %v1801_v8, 4 }
 0x1fc   : > { %v2761_v5 = vshrl.u32 %v2606_v60, 16  ;;  %v4274_v27 = vsel %vm11835_vm3, %v8982_v13, %v9122_v9  ;;  %v1805_v4 = vsel %vm6716_vm6, %v1797_v11, %v1804_v33  ;;  %vm11836_vm8 = vcmask 1046528  }
 0x1fd   : > { %v4757_v61 = vsel %vm11836_vm8, %v4754_v14, %v11257_v42  ;;  %v2757_v62 = vor.u32 %v2755_v59, %v2754_v45  ;;  %v2764_v38 = vshll.u32 %v2606_v60, 16  ;;  %5965 = vmatmul.mubr.bf16.gmra.mrb[72].mxu1 %v4274_v27  ;;  %v9139_v58 = vrot.slane %v1808_v37, 7 }
 0x1fe   : > { %6049 = vmatmul.mubr.bf16.gmra.mrb[60].mxu0 %v4757_v61  ;;  %v2759_v53 = vrot.slane %v2754_v45, 4  ;;  %v9141_v20 = vrot.slane %v2761_v5, 7  ;;  %v1811_v13 = vshll.u32 %v9106_v18, 16  ;;  %v2093_v33 = vsel %vm6736_vm7, %v9086_v55, %v1805_v4  ;;  %5968 = vmatprep.mubr.msk.bf16.mxu1 %vm11588_vm0, %v11587_v47  ;;  %v9164_v45 = vld [vmem:[#allocation2 + $0x68] sm:$0xf] }
 0x1ff   : > { %6052 = vmatprep.mubr.msk.bf16.mxu0 %vm11588_vm0, %v11587_v47  ;;  %v2758_v44 = vsel %vm6716_vm6, %v2750_v41, %v2757_v62  ;;  %v2257_v14 = vrot.slane %v9094_v1, 4  ;;  %v2259_v8 = vshrl.u32 %v2093_v33, 16  ;;  %v9157_v24 = vadd.s32 304, %v11814_v40  ;;  %v9167_v5 = vld [vmem:[#allocation2 + $0x6c] sm:$0xf] }
 0x200   : > { %v2766_v11 = vor.u32 %v2764_v38, %v9141_v20  ;;  %v3064_v22 = vsel %vm11769_vm1, %v9086_v55, %v2758_v44  ;;  %v1813_v59 = vor.u32 %v1811_v13, %v9139_v58  ;;  %v2262_v60 = vshll.u32 %v2093_v33, 16 }
 0x201   : > { %v3206_v51 = vshrl.u32 %v3064_v22, 16  ;;  %v3209_v37 = vshll.u32 %v3064_v22, 16  ;;  %v2261_v41 = vrot.slane %v2259_v8, 7  ;;  %v9175_v61 = vadd.f32 %v9014_v28, %v8705_v29 }
 0x202   : > { %v2767_v27 = vsel %vm6716_vm6, %v2759_v53, %v2766_v11  ;;  %v1814_v4 = vsel %vm6716_vm6, %v1806_v50, %v1813_v59  ;;  %v9179_v62 = vcombine.low %v9164_v45, %v9167_v5 }
 0x203   : > { %v3065_v38 = vsel %vm11769_vm1, %v9106_v18, %v2767_v27  ;;  %v3208_v13 = vrot.slane %v3206_v51, 7  ;;  %v2094_v53 = vsel %vm6736_vm7, %v9106_v18, %v1814_v4  ;;  %v2264_v33 = vor.u32 %v2262_v60, %v2261_v41 }
 0x204   : > { %v3215_v44 = vshrl.u32 %v3065_v38, 16  ;;  %v3218_v50 = vshll.u32 %v3065_v38, 16  ;;  %v2266_v8 = vrot.slane %v2261_v41, 4  ;;  %v2268_v11 = vshrl.u32 %v2094_v53, 16 }
 0x205   : > { %v3211_v29 = vor.u32 %v3209_v37, %v3208_v13  ;;  %v3213_v22 = vrot.slane %v3208_v13, 4  ;;  %v2265_v59 = vsel %vm6716_vm6, %v2257_v14, %v2264_v33  ;;  %v2271_v42 = vshll.u32 %v2094_v53, 16 }
 0x206   : > { %v9189_v1 = vrot.slane %v3215_v44, 7  ;;  %v9191_v19 = vrot.slane %v2268_v11, 7  ;;  %v2557_v51 = vsel %vm11734_vm13, %v9086_v55, %v2265_v59  ;;  %v11837_v60 = vcvt.s32.f32 %v9157_v24  ;;  %v9212_v44 = vld [vmem:[#allocation2 + $0x48] sm:$0xf] }
 0x207   : > { %v11838_v41 = vrot.slane %v9035_v25, 4  ;;  %v3706_v4 = vrot.slane %v9083_v12, 4  ;;  %v2607_v14 = vsel %vm11740_vm10, %v8566_v16, %v2557_v51  ;;  %v2768_v38 = vrot.slane %v9141_v20, 4 }
 0x208   : > { %v425_v27 = vadd.f32 0.5, %v11837_v60  ;;  %v3220_v13 = vor.u32 %v3218_v50, %v9189_v1  ;;  %v2273_v33 = vor.u32 %v2271_v42, %v9191_v19  ;;  %v2770_v25 = vshrl.u32 %v2607_v14, 16 }
 0x209   : > { %v3212_v37 = vsel %vm6716_vm6, %v11838_v41, %v3211_v29  ;;  %v4276_v20 = vshrl.u32 %v9179_v62, 16  ;;  %v2773_v42 = vshll.u32 %v2607_v14, 16  ;;  %v9229_v41 = vld [vmem:[#allocation2 + $0x4c] sm:$0xf] }
 0x20a   : > { %v3518_v53 = vsel %vm11782_vm2, %v9086_v55, %v3212_v37  ;;  %v466_v11 = vmul.f32 0.055555556, %v425_v27  ;;  %v3221_v50 = vsel %vm6716_vm6, %v3213_v22, %v3220_v13  ;;  %v2274_v55 = vsel %vm6716_vm6, %v2266_v8, %v2273_v33 }
 0x20b   : > { %v3566_v12 = vsel %vm11788_vm14, %v9212_v44, %v3518_v53  ;;  %v3519_v59 = vsel %vm11782_vm2, %v9106_v18, %v3221_v50  ;;  %v2558_v51 = vsel %vm11734_vm13, %v9106_v18, %v2274_v55  ;;  %v2772_v60 = vrot.slane %v2770_v25, 7 }
 0x20c   : > { %v3708_v29 = vshrl.u32 %v3566_v12, 16  ;;  %v507_v27 = vfloor.f32 %v466_v11  ;;  %v3567_v22 = vsel %vm11788_vm14, %v9229_v41, %v3519_v59  ;;  %v3711_v13 = vshll.u32 %v3566_v12, 16 }
 0x20d   : > { %v2608_v8 = vsel %vm11740_vm10, %v9229_v41, %v2558_v51  ;;  %v3717_v14 = vshrl.u32 %v3567_v22, 16  ;;  %v3720_v53 = vshll.u32 %v3567_v22, 16  ;;  %v2775_v33 = vor.u32 %v2773_v42, %v2772_v60 }
 0x20e   : > { %v3710_v37 = vrot.slane %v3708_v29, 7  ;;  %v2777_v50 = vrot.slane %v2772_v60, 4  ;;  %v2779_v25 = vshrl.u32 %v2608_v8, 16  ;;  %v2782_v11 = vshll.u32 %v2608_v8, 16 }
 0x20f   : > { %v9237_v55 = vrot.slane %v3717_v14, 7  ;;  %v2776_v2 = vsel %vm6716_vm6, %v2768_v38, %v2775_v33  ;;  %v548_v59 = vmul.f32 18.0, %v507_v27  ;;  %vm630_vm5 = vcmp.ge.f32.partialorder %v507_v27, 1.0 }
 0x210   : > { %v3713_v16 = vor.u32 %v3711_v13, %v3710_v37  ;;  %v3715_v18 = vrot.slane %v3710_v37, 4  ;;  %v9243_v29 = vrot.slane %v2779_v25, 7  ;;  %v3066_v42 = vsel %vm11769_vm1, %v9212_v44, %v2776_v2 }
 0x211   : > { %vm671_vm11 = vcmp.le.f32.partialorder %v507_v27, 16.0  ;;  %v3722_v51 = vor.u32 %v3720_v53, %v9237_v55  ;;  %v3222_v60 = vrot.slane %v9189_v1, 4  ;;  %v3224_v22 = vshrl.u32 %v3066_v42, 16 }
 0x212   : > { %v3714_v12 = vsel %vm6716_vm6, %v3706_v4, %v3713_v16  ;;  %v4278_v37 = vrot.slane %v4276_v20, 1  ;;  %v2784_v13 = vor.u32 %v2782_v11, %v9243_v29  ;;  %v11839_v4 = vcvt.s32.f32 %v9157_v24  ;;  %vm712_vm3 = vmand %vm630_vm5, %vm671_vm11 }
 0x213   : > { %v4020_v38 = vsel %vm8092_vm15, %v9212_v44, %v3714_v12  ;;  %v4279_v8 = vshll.u32 %v9179_v62, 16  ;;  %v3723_v2 = vsel %vm6716_vm6, %v3715_v18, %v3722_v51  ;;  %v3226_v27 = vrot.slane %v3224_v22, 7 }
 0x214   : > { %v589_v16 = vsub.f32 %v11839_v4, %v548_v59  ;;  %v3227_v14 = vshll.u32 %v3066_v42, 16  ;;  %v344_v1 = vadd.s32 312, %v11814_v40  ;;  %v4021_v20 = vsel %vm8092_vm15, %v9229_v41, %v3723_v2 }
 0x215   : > { %v2785_v53 = vsel %vm6716_vm6, %v2777_v50, %v2784_v13  ;;  %v9265_v24 = vcombine.low %v4020_v38, %v4021_v20  ;;  %v3724_v18 = vrot.slane %v9237_v55, 4  ;;  %v11840_v11 = vmov 0 }
 0x216   : > { %vm753_vm8 = vcmp.ge.f32.partialorder %v589_v16, 1.0  ;;  %vm835_vm9 = vcmp.le.f32.partialorder %v589_v16, 16.0  ;;  %v3067_v62 = vsel %vm11769_vm1, %v9229_v41, %v2785_v53  ;;  %v3229_v33 = vor.u32 %v3227_v14, %v3226_v27 }
 0x217   : > { %vm794_vm5 = vmand %vm712_vm3, %vm753_vm8  ;;  %v3233_v25 = vshrl.u32 %v3067_v62, 16  ;;  %v4281_v59 = vrot.slane %v4279_v8, 2  ;;  %v385_v12 = vcvt.s32.f32 %v344_v1  ;;  %v9277_v50 = vadd.f32 %v9014_v28, %v8728_v46 }
 0x218   : > { %vm9271_vm11 = vmand %vm794_vm5, %vm835_vm9  ;;  %v4758_v42 = vrot.slane %v9265_v24, 1  ;;  %v3230_v51 = vsel %vm6716_vm6, %v3222_v60, %v3229_v33  ;;  %v3231_v22 = vrot.slane %v3226_v27, 4  ;;  %v3236_v38 = vshll.u32 %v3067_v62, 16  ;;  %v9401_v24 = vld [vmem:[#allocation2 + $0x54] sm:$0xf] }
 0x219   : > { %v11841_v11 = vsel %vm9271_vm11, 4294967295, %v11840_v11  ;;  %v9282_v55 = vrot.slane %v3233_v25, 7  ;;  %v3520_v13 = vsel %vm11782_vm2, %v9212_v44, %v3230_v51  ;;  %v9287_v4 = vor.u32 %v4281_v59, %v4278_v37 }
 0x21a   : > { %11842 = vst [vmem:[#allocation22_spill] sm:$0xff] %v11841_v11  ;;  %v426_v16 = vadd.f32 0.5, %v385_v12  ;;  %v11843_v46 = vrot.slane %v9114_v49, 1  ;;  %vm11844_vm9 = vcmask 1046528   ;;  %v3568_v60 = vsel %vm11788_vm14, %v8752_v34, %v3520_v13 }
 0x21b   : > { %v11845_v2 = vmax.f32 %v9175_v61, 0.0  ;;  %v1817_v37 = vshrl.u32 %v9212_v44, 16  ;;  %v3238_v14 = vor.u32 %v3236_v38, %v9282_v55  ;;  %v3726_v1 = vshrl.u32 %v3568_v60, 16 }
 0x21c   : > { %v4759_v8 = vsel %vm11844_vm9, %v11843_v46, %v4758_v42  ;;  %vm11846_vm3 = vsmask.f32 6400  ;;  %v1363_v20 = vmax.f32 %v9277_v50, 0.0  ;;  %v467_v61 = vmul.f32 0.055555556, %v426_v16 }
 0x21d   : > { %v9301_v27 = vsel %vm9271_vm11, %v11845_v2, 0.0  ;;  %6053 = vmatmul.mubr.bf16.gmra.mrb[64].mxu0 %v4759_v8  ;;  %v4283_v49 = vsel %vm11846_vm3, %v9122_v9, %v9287_v4  ;;  %v1819_v53 = vrot.slane %v1817_v37, 7  ;;  %v1820_v62 = vshll.u32 %v9212_v44, 16 }
 0x21e   : > { %6056 = vmatprep.mubr.msk.bf16.mxu0 %vm11588_vm0, %v11587_v47  ;;  %5969 = vmatmul.mubr.bf16.gmra.mrb[76].mxu1 %v4283_v49  ;;  %v1826_v33 = vshrl.u32 %v9229_v41, 16  ;;  %v3239_v25 = vsel %vm6716_vm6, %v3231_v22, %v3238_v14  ;;  %v3728_v59 = vrot.slane %v3726_v1, 7  ;;  %v3729_v51 = vshll.u32 %v3568_v60, 16 }
 0x21f   : > { %v1815_v38 = vrot.slane %v9139_v58, 4  ;;  %5972 = vmatprep.mubr.msk.bf16.mxu1 %vm11588_vm0, %v11587_v47  ;;  %v3521_v9 = vsel %vm11782_vm2, %v9229_v41, %v3239_v25  ;;  %v508_v50 = vfloor.f32 %v467_v61  ;;  %v1822_v13 = vor.u32 %v1820_v62, %v1819_v53 }
 0x220   : > { %v1829_v16 = vshll.u32 %v9229_v41, 16  ;;  %v3569_v46 = vsel %vm11788_vm14, %v8759_v48, %v3521_v9  ;;  %v3731_v22 = vor.u32 %v3729_v51, %v3728_v59  ;;  %v1824_v8 = vrot.slane %v1819_v53, 4  ;;  %v9347_v9 = vld [vmem:[#allocation2 + $0x70] sm:$0xf] }
 0x221   : > { %v9325_v60 = vrot.slane %v1826_v33, 7  ;;  %v3733_v58 = vrot.slane %v3728_v59, 4  ;;  %v3735_v2 = vshrl.u32 %v3569_v46, 16  ;;  %v549_v37 = vmul.f32 18.0, %v508_v50 }
 0x222   : > { %vm631_vm8 = vcmp.ge.f32.partialorder %v508_v50, 1.0  ;;  %v3732_v14 = vsel %vm6716_vm6, %v3724_v18, %v3731_v22  ;;  %vm672_vm5 = vcmp.le.f32.partialorder %v508_v50, 16.0  ;;  %v1823_v1 = vsel %vm6716_vm6, %v1815_v38, %v1822_v13 }
 0x223   : > { %v1831_v49 = vor.u32 %v1829_v16, %v9325_v60  ;;  %v9332_v61 = vrot.slane %v3735_v2, 7  ;;  %v3738_v62 = vshll.u32 %v3569_v46, 16  ;;  %v590_v25 = vsub.f32 %v385_v12, %v549_v37  ;;  %vm713_vm9 = vmand %vm631_vm8, %vm672_vm5  ;;  %v9350_v46 = vld [vmem:[#allocation2 + $0x74] sm:$0xf] }
 0x224   : > { %v2095_v53 = vsel %vm6736_vm7, %v9212_v44, %v1823_v1  ;;  %v4022_v33 = vsel %vm8092_vm15, %v8752_v34, %v3732_v14  ;;  %v2275_v59 = vrot.slane %v9191_v19, 4  ;;  %v2786_v16 = vrot.slane %v9243_v29, 4 }
 0x225   : > { %v1832_v18 = vsel %vm6716_vm6, %v1824_v8, %v1831_v49  ;;  %v2277_v51 = vshrl.u32 %v2095_v53, 16  ;;  %v3740_v38 = vor.u32 %v3738_v62, %v9332_v61  ;;  %vm754_vm3 = vcmp.ge.f32.partialorder %v590_v25, 1.0 }
 0x226   : > { %vm836_vm11 = vcmp.le.f32.partialorder %v590_v25, 16.0  ;;  %v2096_v12 = vsel %vm6736_vm7, %v9229_v41, %v1832_v18  ;;  %vm795_vm8 = vmand %vm713_vm9, %vm754_vm3  ;;  %v2280_v13 = vshll.u32 %v2095_v53, 16  ;;  %v11847_v22 = vmov 0 }
 0x227   : > { %v2279_v50 = vrot.slane %v2277_v51, 7  ;;  %v2286_v34 = vshrl.u32 %v2096_v12, 16  ;;  %v3741_v19 = vsel %vm6716_vm6, %v3733_v58, %v3740_v38  ;;  %vm9354_vm5 = vmand %vm795_vm8, %vm836_vm11  ;;  %v2289_v8 = vshll.u32 %v2096_v12, 16  ;;  %v9379_v12 = vld [vmem:[#allocation2 + $0x50] sm:$0xf] }
 0x228   : > { %v11848_v22 = vsel %vm9354_vm5, 4294967295, %v11847_v22  ;;  %v5500_v2 = vcombine.low %v9347_v9, %v9350_v46  ;;  %v345_v37 = vadd.s32 320, %v11814_v40  ;;  %v4023_v14 = vsel %vm8092_vm15, %v8759_v48, %v3741_v19 }
 0x229   : > { %11849 = vst [vmem:[#allocation41_spill] sm:$0xff] %v11848_v22  ;;  %v1404_v29 = vsel %vm9354_vm5, %v1363_v20, 0.0  ;;  %v2282_v1 = vor.u32 %v2280_v13, %v2279_v50  ;;  %v2284_v49 = vrot.slane %v2279_v50, 4  ;;  %v9366_v58 = vcombine.low %v4022_v33, %v4023_v14 }
 0x22a   : > { %v5698_v62 = vpack.c.bf16 %v1404_v29, %v9301_v27  ;;  %v9369_v25 = vrot.slane %v2286_v34, 7  ;;  %v4285_v53 = vshrl.u32 %v5500_v2, 16  ;;  %v3240_v40 = vrot.slane %v9282_v55, 4  ;;  %v9462_v55 = vld [vmem:[#allocation2 + $0x7c] sm:$0xf] }
 0x22b   : > { %v2283_v18 = vsel %vm6716_vm6, %v2275_v59, %v2282_v1  ;;  %v4288_v51 = vshll.u32 %v5500_v2, 16  ;;  %v386_v38 = vcvt.s32.f32 %v345_v37  ;;  %v4760_v48 = vrot.slane %v9366_v58, 1  ;;  %v9558_v58 = vld [vmem:[#allocation2 + $0x84] sm:$0xf] }
 0x22c   : > { %5719 = vst [vmem:[#allocation2 + $0xa8] sm:$0xff] %v5698_v62   ;;  %v2291_v20 = vor.u32 %v2289_v8, %v9369_v25  ;;  %v2559_v33 = vsel %vm11734_vm13, %v9212_v44, %v2283_v18  ;;  %v4287_v27 = vrot.slane %v4285_v53, 1  ;;  %v3742_v50 = vrot.slane %v9332_v61, 4 }
 0x22d   : > { %v2609_v59 = vsel %vm11740_vm10, %v9379_v12, %v2559_v33  ;;  %v4290_v13 = vrot.slane %v4288_v51, 2  ;;  %v427_v34 = vadd.f32 0.5, %v386_v38  ;;  %vm11850_vm11 = vcmask 1046528  }
 0x22e   : > { %v4761_v19 = vsel %vm11850_vm11, %v4758_v42, %v4760_v48  ;;  %v2292_v44 = vsel %vm6716_vm6, %v2284_v49, %v2291_v20  ;;  %v2788_v8 = vshrl.u32 %v2609_v59, 16  ;;  %v1319_v2 = vadd.f32 %v9014_v28, %v8885_v7 }
 0x22f   : > { %6057 = vmatmul.mubr.bf16.gmra.mrb[68].mxu0 %v4761_v19  ;;  %v2560_v37 = vsel %vm11734_vm13, %v9229_v41, %v2292_v44  ;;  %v2791_v14 = vshll.u32 %v2609_v59, 16  ;;  %v9397_v29 = vor.u32 %v4290_v13, %v4287_v27  ;;  %v468_v1 = vmul.f32 0.055555556, %v427_v34 }
 0x230   : > { %6060 = vmatprep.mubr.msk.bf16.mxu0 %vm11588_vm0, %v11587_v47  ;;  %v2610_v42 = vsel %vm11740_vm10, %v9401_v24, %v2560_v37  ;;  %v2790_v49 = vrot.slane %v2788_v8, 7  ;;  %v1835_v7 = vshrl.u32 %v9379_v12, 16  ;;  %v1838_v28 = vshll.u32 %v9379_v12, 16 }
 0x231   : > { %v2797_v62 = vshrl.u32 %v2610_v42, 16  ;;  %v2800_v41 = vshll.u32 %v2610_v42, 16  ;;  %vm11851_vm9 = vsmask.f32 6400  ;;  %v509_v18 = vfloor.f32 %v468_v1 }
 0x232   : > { %v4292_v53 = vsel %vm11851_vm9, %v9287_v4, %v9397_v29  ;;  %v2793_v51 = vor.u32 %v2791_v14, %v2790_v49  ;;  %v2795_v20 = vrot.slane %v2790_v49, 4  ;;  %v1837_v33 = vrot.slane %v1835_v7, 7 }
 0x233   : > { %5973 = vmatmul.mubr.bf16.gmra.mrb[80].mxu1 %v4292_v53  ;;  %v1844_v27 = vshrl.u32 %v9401_v24, 16  ;;  %v9412_v59 = vrot.slane %v2797_v62, 7  ;;  %v550_v13 = vmul.f32 18.0, %v509_v18  ;;  %vm632_vm3 = vcmp.ge.f32.partialorder %v509_v18, 1.0 }
 0x234   : > { %vm673_vm8 = vcmp.le.f32.partialorder %v509_v18, 16.0  ;;  %5976 = vmatprep.mubr.msk.bf16.mxu1 %vm11588_vm0, %v11587_v47  ;;  %v2794_v34 = vsel %vm6716_vm6, %v2786_v16, %v2793_v51  ;;  %v1364_v19 = vmax.f32 %v1319_v2, 0.0  ;;  %v1833_v4 = vrot.slane %v9325_v60, 4 }
 0x235   : > { %v1840_v44 = vor.u32 %v1838_v28, %v1837_v33  ;;  %v2802_v8 = vor.u32 %v2800_v41, %v9412_v59  ;;  %v3068_v37 = vsel %vm11769_vm1, %v9379_v12, %v2794_v34  ;;  %v591_v14 = vsub.f32 %v386_v38, %v550_v13  ;;  %vm714_vm11 = vmand %vm632_vm3, %vm673_vm8 }
 0x236   : > { %v9423_v1 = vrot.slane %v1844_v27, 7  ;;  %v3242_v42 = vshrl.u32 %v3068_v37, 16  ;;  %v1842_v7 = vrot.slane %v1837_v33, 4  ;;  %v1847_v16 = vshll.u32 %v9401_v24, 16 }
 0x237   : > { %v1841_v49 = vsel %vm6716_vm6, %v1833_v4, %v1840_v44  ;;  %v2803_v60 = vsel %vm6716_vm6, %v2795_v20, %v2802_v8  ;;  %vm755_vm9 = vcmp.ge.f32.partialorder %v591_v14, 1.0  ;;  %vm837_vm5 = vcmp.le.f32.partialorder %v591_v14, 16.0 }
 0x238   : > { %v2097_v2 = vsel %vm6736_vm7, %v9379_v12, %v1841_v49  ;;  %v3069_v38 = vsel %vm11769_vm1, %v9401_v24, %v2803_v60  ;;  %v3244_v28 = vrot.slane %v3242_v42, 7  ;;  %v3245_v62 = vshll.u32 %v3068_v37, 16  ;;  %vm796_vm3 = vmand %vm714_vm11, %vm755_vm9 }
 0x239   : > { %v1849_v41 = vor.u32 %v1847_v16, %v9423_v1  ;;  %v3251_v53 = vshrl.u32 %v3069_v38, 16  ;;  %v3254_v18 = vshll.u32 %v3069_v38, 16  ;;  %vm9437_vm8 = vmand %vm796_vm3, %vm837_vm5  ;;  %v11852_v51 = vmov 0 }
 0x23a   : > { %v11853_v51 = vsel %vm9437_vm8, 4294967295, %v11852_v51  ;;  %v2295_v20 = vshrl.u32 %v2097_v2, 16  ;;  %v2298_v33 = vshll.u32 %v2097_v2, 16  ;;  %v3247_v27 = vor.u32 %v3245_v62, %v3244_v28 }
 0x23b   : > { %11854 = vst [vmem:[#allocation20_spill] sm:$0xff] %v11853_v51  ;;  %v3249_v13 = vrot.slane %v3244_v28, 4  ;;  %v1405_v34 = vsel %vm9437_vm8, %v1364_v19, 0.0  ;;  %v1850_v4 = vsel %vm6716_vm6, %v1842_v7, %v1849_v41  ;;  %v9445_v44 = vrot.slane %v3251_v53, 7  ;;  %v9460_v28 = vld [vmem:[#allocation2 + $0x78] sm:$0xf] }
 0x23c   : > { %v5599_v8 = vpack.c.bf16 %v1405_v34, %v1405_v34  ;;  %v2098_v37 = vsel %vm6736_vm7, %v9401_v24, %v1850_v4  ;;  %v2297_v14 = vrot.slane %v2295_v20, 7  ;;  %v3248_v42 = vsel %vm6716_vm6, %v3240_v40, %v3247_v27 }
 0x23d   : > { %v2293_v49 = vrot.slane %v9369_v25, 4  ;;  %v2304_v16 = vshrl.u32 %v2098_v37, 16  ;;  %v2307_v19 = vshll.u32 %v2098_v37, 16  ;;  %v3256_v60 = vor.u32 %v3254_v18, %v9445_v44 }
 0x23e   : > { %v3522_v7 = vsel %vm11782_vm2, %v9379_v12, %v3248_v42  ;;  %1611 = vst [vmem:[#allocation2 + $0xb0] sm:$0x3] %v5599_v8  ;;  %v2300_v2 = vor.u32 %v2298_v33, %v2297_v14  ;;  %v2804_v38 = vrot.slane %v9412_v59, 4  ;;  %v2302_v40 = vrot.slane %v2297_v14, 4 }
 0x23f   : > { %v3570_v25 = vsel %vm11788_vm14, %v8933_v23, %v3522_v7  ;;  %v9467_v62 = vrot.slane %v2304_v16, 7  ;;  %v5501_v41 = vcombine.low %v9460_v28, %v9462_v55  ;;  %v3257_v53 = vsel %vm6716_vm6, %v3249_v13, %v3256_v60 }
 0x240   : > { %v3744_v18 = vshrl.u32 %v3570_v25, 16  ;;  %v3747_v20 = vshll.u32 %v3570_v25, 16  ;;  %v2301_v59 = vsel %vm6716_vm6, %v2293_v49, %v2300_v2  ;;  %v3523_v33 = vsel %vm11782_vm2, %v9401_v24, %v3257_v53 }
 0x241   : > { %v2309_v27 = vor.u32 %v2307_v19, %v9467_v62  ;;  %v2561_v34 = vsel %vm11734_vm13, %v9379_v12, %v2301_v59  ;;  %v4294_v4 = vshrl.u32 %v5501_v41, 16  ;;  %v3571_v13 = vsel %vm11788_vm14, %v8936_v30, %v3523_v33 }
 0x242   : > { %v3746_v8 = vrot.slane %v3744_v18, 7  ;;  %v2611_v37 = vsel %vm11740_vm10, %v8933_v23, %v2561_v34  ;;  %v4297_v14 = vshll.u32 %v5501_v41, 16  ;;  %v3753_v42 = vshrl.u32 %v3571_v13, 16 }
 0x243   : > { %v3756_v49 = vshll.u32 %v3571_v13, 16  ;;  %v2310_v16 = vsel %vm6716_vm6, %v2302_v40, %v2309_v27  ;;  %v2806_v19 = vshrl.u32 %v2611_v37, 16  ;;  %v2809_v2 = vshll.u32 %v2611_v37, 16 }
 0x244   : > { %v3749_v60 = vor.u32 %v3747_v20, %v3746_v8  ;;  %v3751_v7 = vrot.slane %v3746_v8, 4  ;;  %v2562_v12 = vsel %vm11734_vm13, %v9401_v24, %v2310_v16  ;;  %v9493_v25 = vrot.slane %v3753_v42, 7 }
 0x245   : > { %v2612_v53 = vsel %vm11740_vm10, %v8936_v30, %v2562_v12  ;;  %v2808_v41 = vrot.slane %v2806_v19, 7  ;;  %v4296_v18 = vrot.slane %v4294_v4, 1  ;;  %v3258_v59 = vrot.slane %v9445_v44, 4 }
 0x246   : > { %v3750_v40 = vsel %vm6716_vm6, %v3742_v50, %v3749_v60  ;;  %v2815_v20 = vshrl.u32 %v2612_v53, 16  ;;  %v4299_v33 = vrot.slane %v4297_v14, 2  ;;  %v3758_v24 = vor.u32 %v3756_v49, %v9493_v25 }
 0x247   : > { %v4024_v27 = vsel %vm8092_vm15, %v8933_v23, %v3750_v40  ;;  %v2811_v34 = vor.u32 %v2809_v2, %v2808_v41  ;;  %v2818_v13 = vshll.u32 %v2612_v53, 16  ;;  %v2813_v8 = vrot.slane %v2808_v41, 4 }
 0x248   : > { %v9507_v37 = vrot.slane %v2815_v20, 7  ;;  %v3760_v61 = vrot.slane %v9493_v25, 4  ;;  %v9510_v4 = vor.u32 %v4299_v33, %v4296_v18  ;;  %v3759_v50 = vsel %vm6716_vm6, %v3751_v7, %v3758_v24 }
 0x249   : > { %v2812_v44 = vsel %vm6716_vm6, %v2804_v38, %v2811_v34  ;;  %v1851_v14 = vrot.slane %v9423_v1, 4  ;;  %v1853_v42 = vshrl.u32 %v8933_v23, 16  ;;  %v4025_v49 = vsel %vm8092_vm15, %v8936_v30, %v3759_v50 }
 0x24a   : > { %v2820_v16 = vor.u32 %v2818_v13, %v9507_v37  ;;  %v3070_v19 = vsel %vm11769_vm1, %v8933_v23, %v2812_v44  ;;  %vm11855_vm5 = vsmask.f32 6400  ;;  %v9528_v7 = vcombine.low %v4024_v27, %v4025_v49 }
 0x24b   : > { %v4301_v60 = vsel %vm11855_vm5, %v9397_v29, %v9510_v4  ;;  %v3260_v38 = vshrl.u32 %v3070_v19, 16  ;;  %v1855_v1 = vrot.slane %v1853_v42, 7  ;;  %v1856_v12 = vshll.u32 %v8933_v23, 16  ;;  %vm11857_vm9 = vmmov %vm11855_vm5 }
 0x24c   : > { %5977 = vmatmul.mubr.bf16.gmra.mrb[84].mxu1 %v4301_v60  ;;  %v2821_v2 = vsel %vm6716_vm6, %v2813_v8, %v2820_v16  ;;  %v3263_v53 = vshll.u32 %v3070_v19, 16  ;;  %v1862_v41 = vshrl.u32 %v8936_v30, 16  ;;  %v1865_v18 = vshll.u32 %v8936_v30, 16  ;;  %v6283_v16 = vld [vmem:[#allocation2 + $0x58] sm:$0xf] }
 0x24d   : > { %5980 = vmatprep.mubr.msk.bf16.mxu1 %vm11588_vm0, %v11587_v47  ;;  %v11263_v29 = vrot.slane %v9528_v7, 1  ;;  %v3071_v40 = vsel %vm11769_vm1, %v8936_v30, %v2821_v2  ;;  %v3262_v20 = vrot.slane %v3260_v38, 7  ;;  %v1858_v33 = vor.u32 %v1856_v12, %v1855_v1  ;;  %v9556_v19 = vld [vmem:[#allocation2 + $0x80] sm:$0xf] }
 0x24e   : > { %v3269_v23 = vshrl.u32 %v3071_v40, 16  ;;  %v1860_v24 = vrot.slane %v1855_v1, 4  ;;  %v9541_v27 = vrot.slane %v1862_v41, 7  ;;  %v2311_v34 = vrot.slane %v9467_v62, 4 }
 0x24f   : > { %vm11856_vm11 = vcmask 1046528   ;;  %v3265_v8 = vor.u32 %v3263_v53, %v3262_v20  ;;  %v3272_v50 = vshll.u32 %v3071_v40, 16  ;;  %v1859_v44 = vsel %vm6716_vm6, %v1851_v14, %v1858_v33 }
 0x250   : > { %v4763_v13 = vsel %vm11856_vm11, %v4760_v48, %v11263_v29  ;;  %v3267_v30 = vrot.slane %v3262_v20, 4  ;;  %v9551_v42 = vrot.slane %v3269_v23, 7  ;;  %v1867_v49 = vor.u32 %v1865_v18, %v9541_v27  ;;  %vm11859_vm3 = vmmov %vm11856_vm11 }
 0x251   : > { %6061 = vmatmul.mubr.bf16.gmra.mrb[72].mxu0 %v4763_v13  ;;  %v2099_v62 = vsel %vm6736_vm7, %v6283_v16, %v1859_v44  ;;  %v3266_v48 = vsel %vm6716_vm6, %v3258_v59, %v3265_v8  ;;  %v2822_v60 = vrot.slane %v9507_v37, 4  ;;  %v5502_v38 = vcombine.low %v9556_v19, %v9558_v58  ;;  %v6284_v59 = vld [vmem:[#allocation2 + $0x5c] sm:$0xf]  ;;  %vm11861_vm11 = vmmov %vm11859_vm3 }
 0x252   : > { %6064 = vmatprep.mubr.msk.bf16.mxu0 %vm11588_vm0, %v11587_v47  ;;  %v2313_v14 = vshrl.u32 %v2099_v62, 16  ;;  %v3274_v1 = vor.u32 %v3272_v50, %v9551_v42  ;;  %v3524_v12 = vsel %vm11782_vm2, %v6283_v16, %v3266_v48  ;;  %v1868_v2 = vsel %vm6716_vm6, %v1860_v24, %v1867_v49 }
 0x253   : > { %v2316_v53 = vshll.u32 %v2099_v62, 16  ;;  %v3572_v41 = vsel %vm11788_vm14, %v9074_v26, %v3524_v12  ;;  %v2100_v37 = vsel %vm6736_vm7, %v6284_v59, %v1868_v2  ;;  %v4303_v40 = vshrl.u32 %v5502_v38, 16 }
 0x254   : > { %v2315_v18 = vrot.slane %v2313_v14, 7  ;;  %v3275_v20 = vsel %vm6716_vm6, %v3267_v30, %v3274_v1  ;;  %v3762_v33 = vshrl.u32 %v3572_v41, 16  ;;  %v2322_v23 = vshrl.u32 %v2100_v37, 16 }
 0x255   : > { %v3525_v24 = vsel %vm11782_vm2, %v6284_v59, %v3275_v20  ;;  %v3765_v8 = vshll.u32 %v3572_v41, 16  ;;  %v2325_v14 = vshll.u32 %v2100_v37, 16  ;;  %v4305_v1 = vrot.slane %v4303_v40, 1 }
 0x256   : > { %v2318_v50 = vor.u32 %v2316_v53, %v2315_v18  ;;  %v2320_v44 = vrot.slane %v2315_v18, 4  ;;  %v3573_v49 = vsel %vm11788_vm14, %v9076_v36, %v3525_v24  ;;  %v3764_v62 = vrot.slane %v3762_v33, 7 }
 0x257   : > { %v9585_v48 = vrot.slane %v2322_v23, 7  ;;  %v3771_v12 = vshrl.u32 %v3573_v49, 16  ;;  %v4306_v2 = vshll.u32 %v5502_v38, 16  ;;  %v3774_v29 = vshll.u32 %v3573_v49, 16 }
 0x258   : > { %v2319_v30 = vsel %vm6716_vm6, %v2311_v34, %v2318_v50  ;;  %v3767_v13 = vor.u32 %v3765_v8, %v3764_v62  ;;  %v3769_v18 = vrot.slane %v3764_v62, 4  ;;  %v1869_v23 = vrot.slane %v9541_v27, 4 }
 0x259   : > { %v2327_v41 = vor.u32 %v2325_v14, %v9585_v48  ;;  %v2563_v53 = vsel %vm11734_vm13, %v6283_v16, %v2319_v30  ;;  %v9592_v20 = vrot.slane %v3771_v12, 7  ;;  %v4308_v33 = vrot.slane %v4306_v2, 2 }
 0x25a   : > { %v2613_v37 = vsel %vm11740_vm10, %v9074_v26, %v2563_v53  ;;  %v3768_v34 = vsel %vm6716_vm6, %v3760_v61, %v3767_v13  ;;  %v1874_v62 = vshll.u32 %v9074_v26, 16  ;;  %v1880_v53 = vshrl.u32 %v9076_v36, 16 }
 0x25b   : > { %v2328_v38 = vsel %vm6716_vm6, %v2320_v44, %v2327_v41  ;;  %v2824_v40 = vshrl.u32 %v2613_v37, 16  ;;  %v3776_v16 = vor.u32 %v3774_v29, %v9592_v20  ;;  %v4026_v24 = vsel %vm8092_vm15, %v9074_v26, %v3768_v34 }
 0x25c   : > { %v2564_v8 = vsel %vm11734_vm13, %v6284_v59, %v2328_v38  ;;  %v2827_v50 = vshll.u32 %v2613_v37, 16  ;;  %v9613_v13 = vor.u32 %v4308_v33, %v4305_v1  ;;  %v1871_v44 = vshrl.u32 %v9074_v26, 16 }
 0x25d   : > { %v2614_v25 = vsel %vm11740_vm10, %v9076_v36, %v2564_v8  ;;  %v2826_v61 = vrot.slane %v2824_v40, 7  ;;  %v3777_v29 = vsel %vm6716_vm6, %v3769_v18, %v3776_v16  ;;  %v3778_v37 = vrot.slane %v9592_v20, 4 }
 0x25e   : > { %v2833_v27 = vshrl.u32 %v2614_v25, 16  ;;  %v2836_v49 = vshll.u32 %v2614_v25, 16  ;;  %v4027_v59 = vsel %vm8092_vm15, %v9076_v36, %v3777_v29  ;;  %v4310_v30 = vsel %vm11857_vm9, %v9510_v4, %v9613_v13  ;;  %vm11862_vm9 = vmmov %vm11855_vm5 }
 0x25f   : > { %v2829_v14 = vor.u32 %v2827_v50, %v2826_v61  ;;  %v2831_v12 = vrot.slane %v2826_v61, 4  ;;  %v9625_v1 = vcombine.low %v4026_v24, %v4027_v59  ;;  %5981 = vmatmul.mubr.bf16.gmra.mrb[88].mxu1 %v4310_v30  ;;  %v1873_v41 = vrot.slane %v1871_v44, 7  ;;  %v9642_v24 = vld [vmem:[#allocation2 + $0x88] sm:$0xf] }
 0x260   : > { %v9627_v2 = vrot.slane %v2833_v27, 7  ;;  %v1883_v33 = vshll.u32 %v9076_v36, 16  ;;  %v2329_v34 = vrot.slane %v9585_v48, 4  ;;  %5984 = vmatprep.mubr.msk.bf16.mxu1 %vm11588_vm0, %v11587_v47  ;;  %v9646_v25 = vrot.slane %v1880_v53, 7 }
 0x261   : > { %v2830_v18 = vsel %vm6716_vm6, %v2822_v60, %v2829_v14  ;;  %v4764_v4 = vrot.slane %v9625_v1, 1  ;;  %v1876_v16 = vor.u32 %v1874_v62, %v1873_v41  ;;  %v9644_v60 = vld [vmem:[#allocation2 + $0x8c] sm:$0xf]  ;;  %v1878_v50 = vrot.slane %v1873_v41, 4 }
 0x262   : > { %v2838_v38 = vor.u32 %v2836_v49, %v9627_v2  ;;  %v3072_v40 = vsel %vm11769_vm1, %v9074_v26, %v2830_v18  ;;  %v5503_v48 = vcombine.low %v9642_v24, %v9644_v60  ;;  %v11858_v61 = vrot.slane %v9528_v7, 1 }
 0x263   : > { %v3278_v8 = vshrl.u32 %v3072_v40, 16  ;;  %v3281_v27 = vshll.u32 %v3072_v40, 16  ;;  %v1877_v49 = vsel %vm6716_vm6, %v1869_v23, %v1876_v16  ;;  %v1885_v14 = vor.u32 %v1883_v33, %v9646_v25 }
 0x264   : > { %v4765_v44 = vsel %vm11859_vm3, %v11858_v61, %v4764_v4  ;;  %v2839_v29 = vsel %vm6716_vm6, %v2831_v12, %v2838_v38  ;;  %v2101_v7 = vsel %vm6736_vm7, %v9074_v26, %v1877_v49  ;;  %v4312_v40 = vshrl.u32 %v5503_v48, 16 }
 0x265   : > { %6065 = vmatmul.mubr.bf16.gmra.mrb[76].mxu0 %v4765_v44  ;;  %v3073_v62 = vsel %vm11769_vm1, %v9076_v36, %v2839_v29  ;;  %v3280_v59 = vrot.slane %v3278_v8, 7  ;;  %v2331_v41 = vshrl.u32 %v2101_v7, 16  ;;  %v2334_v53 = vshll.u32 %v2101_v7, 16 }
 0x266   : > { %6068 = vmatprep.mubr.msk.bf16.mxu0 %vm11588_vm0, %v11587_v47  ;;  %v3287_v12 = vshrl.u32 %v3073_v62, 16  ;;  %v3290_v30 = vshll.u32 %v3073_v62, 16  ;;  %v1886_v38 = vsel %vm6716_vm6, %v1878_v50, %v1885_v14  ;;  %v4315_v61 = vshll.u32 %v5503_v48, 16 }
 0x267   : > { %v3283_v23 = vor.u32 %v3281_v27, %v3280_v59  ;;  %v3285_v18 = vrot.slane %v3280_v59, 4  ;;  %v2102_v33 = vsel %vm6736_vm7, %v9076_v36, %v1886_v38  ;;  %v2333_v8 = vrot.slane %v2331_v41, 7 }
 0x268   : > { %v9670_v16 = vrot.slane %v3287_v12, 7  ;;  %v11860_v44 = vrot.slane %v9551_v42, 4  ;;  %v2340_v49 = vshrl.u32 %v2102_v33, 16  ;;  %v2840_v27 = vrot.slane %v9627_v2, 4 }
 0x269   : > { %v4314_v62 = vrot.slane %v4312_v40, 1  ;;  %v2336_v14 = vor.u32 %v2334_v53, %v2333_v8  ;;  %v2343_v7 = vshll.u32 %v2102_v33, 16  ;;  %v2338_v42 = vrot.slane %v2333_v8, 4  ;;  %v6286_v40 = vld [vmem:[#allocation2 + $0x60] sm:$0xf] }
 0x26a   : > { %v3284_v29 = vsel %vm6716_vm6, %v11860_v44, %v3283_v23  ;;  %v3292_v50 = vor.u32 %v3290_v30, %v9670_v16  ;;  %v9687_v48 = vrot.slane %v2340_v49, 7  ;;  %v4317_v12 = vrot.slane %v4315_v61, 2 }
 0x26b   : > { %v3526_v59 = vsel %vm11782_vm2, %v9074_v26, %v3284_v29  ;;  %v2337_v30 = vsel %vm6716_vm6, %v2329_v34, %v2336_v14  ;;  %v3294_v23 = vrot.slane %v9670_v16, 4  ;;  %v6285_v26 = vld [vmem:[#allocation2 + $0x64] sm:$0xf] }
 0x26c   : > { %v3574_v36 = vsel %vm11788_vm14, %v9164_v45, %v3526_v59  ;;  %v3293_v2 = vsel %vm6716_vm6, %v3285_v18, %v3292_v50  ;;  %v2345_v38 = vor.u32 %v2343_v7, %v9687_v48  ;;  %v2565_v33 = vsel %vm11734_vm13, %v6286_v40, %v2337_v30 }
 0x26d   : > { %v3780_v41 = vshrl.u32 %v3574_v36, 16  ;;  %v3527_v53 = vsel %vm11782_vm2, %v6285_v26, %v3293_v2  ;;  %v9699_v8 = vor.u32 %v4317_v12, %v4314_v62  ;;  %v3783_v34 = vshll.u32 %v3574_v36, 16 }
 0x26e   : > { %v3575_v18 = vsel %vm11788_vm14, %v9167_v5, %v3527_v53  ;;  %v2615_v44 = vsel %vm11740_vm10, %v9164_v45, %v2565_v33  ;;  %v2346_v50 = vsel %vm6716_vm6, %v2338_v42, %v2345_v38  ;;  %v1889_v38 = vshrl.u32 %v9164_v45, 16 }
 0x26f   : > { %v3782_v61 = vrot.slane %v3780_v41, 7  ;;  %v3789_v29 = vshrl.u32 %v3575_v18, 16  ;;  %v3792_v49 = vshll.u32 %v3575_v18, 16  ;;  %v2842_v59 = vshrl.u32 %v2615_v44, 16 }
 0x270   : > { %v2566_v62 = vsel %vm11734_vm13, %v6285_v26, %v2346_v50  ;;  %v2845_v12 = vshll.u32 %v2615_v44, 16  ;;  %v4319_v30 = vsel %vm11855_vm5, %v9613_v13, %v9699_v8  ;;  %v1887_v26 = vrot.slane %v9646_v25, 4 }
 0x271   : > { %v3785_v14 = vor.u32 %v3783_v34, %v3782_v61  ;;  %v3787_v7 = vrot.slane %v3782_v61, 4  ;;  %v9711_v2 = vrot.slane %v3789_v29, 7  ;;  %v2616_v36 = vsel %vm11740_vm10, %v9167_v5, %v2566_v62  ;;  %5985 = vmatmul.mubr.bf16.gmra.mrb[92].mxu1 %v4319_v30 }
 0x272   : > { %v2844_v41 = vrot.slane %v2842_v59, 7  ;;  %v2851_v53 = vshrl.u32 %v2616_v36, 16  ;;  %v2854_v61 = vshll.u32 %v2616_v36, 16  ;;  %5988 = vmatprep.mubr.msk.bf16.mxu1 %vm11588_vm0, %v11587_v47  ;;  %v1892_v34 = vshll.u32 %v9164_v45, 16 }
 0x273   : > { %v3786_v42 = vsel %vm6716_vm6, %v3778_v37, %v3785_v14  ;;  %v3794_v40 = vor.u32 %v3792_v49, %v9711_v2  ;;  %v1891_v37 = vrot.slane %v1889_v38, 7  ;;  %v1898_v29 = vshrl.u32 %v9167_v5, 16 }
 0x274   : > { %v4028_v33 = vsel %vm8092_vm15, %v9164_v45, %v3786_v42  ;;  %v2847_v18 = vor.u32 %v2845_v12, %v2844_v41  ;;  %v2849_v20 = vrot.slane %v2844_v41, 4  ;;  %v9731_v13 = vrot.slane %v2851_v53, 7 }
 0x275   : > { %v3795_v25 = vsel %vm6716_vm6, %v3787_v7, %v3794_v40  ;;  %v1901_v49 = vshll.u32 %v9167_v5, 16  ;;  %v1894_v62 = vor.u32 %v1892_v34, %v1891_v37  ;;  %v1896_v42 = vrot.slane %v1891_v37, 4 }
 0x276   : > { %v2848_v44 = vsel %vm6716_vm6, %v2840_v27, %v2847_v18  ;;  %v4029_v50 = vsel %vm8092_vm15, %v9167_v5, %v3795_v25  ;;  %v2856_v59 = vor.u32 %v2854_v61, %v9731_v13  ;;  %v3796_v27 = vrot.slane %v9711_v2, 4 }
 0x277   : > { %v3074_v14 = vsel %vm11769_vm1, %v9164_v45, %v2848_v44  ;;  %v9747_v12 = vcombine.low %v4028_v33, %v4029_v50  ;;  %v1895_v30 = vsel %vm6716_vm6, %v1887_v26, %v1894_v62  ;;  %v9754_v53 = vrot.slane %v1898_v29, 7  ;;  %v9770_v29 = vld [vmem:[#allocation2 + $0x90] sm:$0xf] }
 0x278   : > { %v3296_v7 = vshrl.u32 %v3074_v14, 16  ;;  %v3299_v36 = vshll.u32 %v3074_v14, 16  ;;  %v2857_v41 = vsel %vm6716_vm6, %v2849_v20, %v2856_v59  ;;  %v2103_v18 = vsel %vm6736_vm7, %v9164_v45, %v1895_v30  ;;  %v9776_v59 = vld [vmem:[#allocation2 + $0x94] sm:$0xf] }
 0x279   : > { %v4766_v38 = vrot.slane %v9747_v12, 1  ;;  %v3075_v40 = vsel %vm11769_vm1, %v9167_v5, %v2857_v41  ;;  %v1903_v20 = vor.u32 %v1901_v49, %v9754_v53  ;;  %v2347_v34 = vrot.slane %v9687_v48, 4  ;;  %v6288_v41 = vld [vmem:[#allocation2 + $0x68] sm:$0xf] }
 0x27a   : > { %v3298_v33 = vrot.slane %v3296_v7, 7  ;;  %v3305_v61 = vshrl.u32 %v3075_v40, 16  ;;  %v2349_v26 = vshrl.u32 %v2103_v18, 16  ;;  %v3308_v5 = vshll.u32 %v3075_v40, 16 }
 0x27b   : > { %v4767_v37 = vsel %vm11861_vm11, %v4764_v4, %v4766_v38  ;;  %v1904_v45 = vsel %vm6716_vm6, %v1896_v42, %v1903_v20  ;;  %v2352_v48 = vshll.u32 %v2103_v18, 16  ;;  %v6287_v4 = vld [vmem:[#allocation2 + $0x6c] sm:$0xf]  ;;  %v2858_v62 = vrot.slane %v9731_v13, 4  ;;  %vm11864_vm11 = vmmov %vm11859_vm3 }
 0x27c   : > { %v3301_v25 = vor.u32 %v3299_v36, %v3298_v33  ;;  %v3303_v44 = vrot.slane %v3298_v33, 4  ;;  %6069 = vmatmul.mubr.bf16.gmra.mrb[80].mxu0 %v4767_v37  ;;  %v9772_v50 = vrot.slane %v3305_v61, 7  ;;  %v2351_v49 = vrot.slane %v2349_v26, 7 }
 0x27d   : > { %6072 = vmatprep.mubr.msk.bf16.mxu0 %vm11588_vm0, %v11587_v47  ;;  %v2104_v14 = vsel %vm6736_vm7, %v6287_v4, %v1904_v45  ;;  %v5504_v7 = vcombine.low %v9770_v29, %v9776_v59  ;;  %v1905_v16 = vrot.slane %v9754_v53, 4 }
 0x27e   : > { %v3302_v1 = vsel %vm6716_vm6, %v3294_v23, %v3301_v25  ;;  %v3310_v36 = vor.u32 %v3308_v5, %v9772_v50  ;;  %v2354_v42 = vor.u32 %v2352_v48, %v2351_v49  ;;  %v2356_v40 = vrot.slane %v2351_v49, 4 }
 0x27f   : > { %v3528_v30 = vsel %vm11782_vm2, %v6288_v41, %v3302_v1  ;;  %v2358_v33 = vshrl.u32 %v2104_v14, 16  ;;  %v2361_v18 = vshll.u32 %v2104_v14, 16  ;;  %v4321_v45 = vshrl.u32 %v5504_v7, 16 }
 0x280   : > { %v3576_v23 = vsel %vm11788_vm14, %v9347_v9, %v3528_v30  ;;  %v3311_v13 = vsel %vm6716_vm6, %v3303_v44, %v3310_v36  ;;  %v2355_v26 = vsel %vm6716_vm6, %v2347_v34, %v2354_v42  ;;  %v4324_v1 = vshll.u32 %v5504_v7, 16 }
 0x281   : > { %v3798_v61 = vshrl.u32 %v3576_v23, 16  ;;  %v3801_v20 = vshll.u32 %v3576_v23, 16  ;;  %v3529_v37 = vsel %vm11782_vm2, %v6287_v4, %v3311_v13  ;;  %v9802_v25 = vrot.slane %v2358_v33, 7 }
 0x282   : > { %v2567_v5 = vsel %vm11734_vm13, %v6288_v41, %v2355_v26  ;;  %v3577_v49 = vsel %vm11788_vm14, %v9350_v46, %v3529_v37  ;;  %v4323_v41 = vrot.slane %v4321_v45, 1  ;;  %v4326_v37 = vrot.slane %v4324_v1, 2 }
 0x283   : > { %v3800_v48 = vrot.slane %v3798_v61, 7  ;;  %v2617_v44 = vsel %vm11740_vm10, %v9347_v9, %v2567_v5  ;;  %v3807_v34 = vshrl.u32 %v3577_v49, 16  ;;  %v3810_v14 = vshll.u32 %v3577_v49, 16 }
 0x284   : > { %v2363_v36 = vor.u32 %v2361_v18, %v9802_v25  ;;  %v2860_v30 = vshrl.u32 %v2617_v44, 16  ;;  %v2863_v33 = vshll.u32 %v2617_v44, 16  ;;  %v1907_v5 = vshrl.u32 %v9347_v9, 16 }
 0x285   : > { %v3803_v42 = vor.u32 %v3801_v20, %v3800_v48  ;;  %v3805_v23 = vrot.slane %v3800_v48, 4  ;;  %v9813_v13 = vrot.slane %v3807_v34, 7  ;;  %v3312_v20 = vrot.slane %v9772_v50, 4 }
 0x286   : > { %v2364_v26 = vsel %vm6716_vm6, %v2356_v40, %v2363_v36  ;;  %v2862_v61 = vrot.slane %v2860_v30, 7  ;;  %v1910_v48 = vshll.u32 %v9347_v9, 16  ;;  %v9837_v34 = vor.u32 %v4326_v37, %v4323_v41 }
 0x287   : > { %v3804_v7 = vsel %vm6716_vm6, %v3796_v27, %v3803_v42  ;;  %v2568_v18 = vsel %vm11734_vm13, %v6287_v4, %v2364_v26  ;;  %v3812_v45 = vor.u32 %v3810_v14, %v9813_v13  ;;  %v1909_v14 = vrot.slane %v1907_v5, 7  ;;  %v9857_v5 = vld [vmem:[#allocation2 + $0x98] sm:$0xf] }
 0x288   : > { %v2618_v40 = vsel %vm11740_vm10, %v9350_v46, %v2568_v18  ;;  %v2865_v49 = vor.u32 %v2863_v33, %v2862_v61  ;;  %v4030_v2 = vsel %vm8092_vm15, %v9347_v9, %v3804_v7  ;;  %v2867_v27 = vrot.slane %v2862_v61, 4 }
 0x289   : > { %v2869_v44 = vshrl.u32 %v2618_v40, 16  ;;  %v2872_v4 = vshll.u32 %v2618_v40, 16  ;;  %v3813_v50 = vsel %vm6716_vm6, %v3805_v23, %v3812_v45  ;;  %v1916_v33 = vshrl.u32 %v9350_v46, 16 }
 0x28a   : > { %v2866_v1 = vsel %vm6716_vm6, %v2858_v62, %v2865_v49  ;;  %v4031_v36 = vsel %vm8092_vm15, %v9350_v46, %v3813_v50  ;;  %v3814_v62 = vrot.slane %v9813_v13, 4  ;;  %v4328_v41 = vsel %vm11862_vm9, %v9699_v8, %v9837_v34  ;;  %vm11865_vm9 = vmmov %vm11855_vm5 }
 0x28b   : > { %v9842_v30 = vrot.slane %v2869_v44, 7  ;;  %v3076_v42 = vsel %vm11769_vm1, %v9347_v9, %v2866_v1  ;;  %v9848_v26 = vcombine.low %v4030_v2, %v4031_v36  ;;  %5989 = vmatmul.mubr.bf16.gmra.mrb[96].mxu1 %v4328_v41  ;;  %v1912_v7 = vor.u32 %v1910_v48, %v1909_v14  ;;  %v9863_v44 = vld [vmem:[#allocation2 + $0x9c] sm:$0xf] }
 0x28c   : > { %v3314_v23 = vshrl.u32 %v3076_v42, 16  ;;  %v3317_v37 = vshll.u32 %v3076_v42, 16  ;;  %v9855_v18 = vrot.slane %v1916_v33, 7  ;;  %v1914_v49 = vrot.slane %v1909_v14, 4  ;;  %5992 = vmatprep.mubr.msk.bf16.mxu1 %vm11588_vm0, %v11587_v47 }
 0x28d   : > { %v2874_v61 = vor.u32 %v2872_v4, %v9842_v30  ;;  %v11264_v45 = vrot.slane %v9848_v26, 1  ;;  %v1919_v2 = vshll.u32 %v9350_v46, 16  ;;  %v1913_v48 = vsel %vm6716_vm6, %v1905_v16, %v1912_v7 }
 0x28e   : > { %v3316_v40 = vrot.slane %v3314_v23, 7  ;;  %v2365_v4 = vrot.slane %v9802_v25, 4  ;;  %v5505_v50 = vcombine.low %v9857_v5, %v9863_v44  ;;  %v2105_v42 = vsel %vm6736_vm7, %v9347_v9, %v1913_v48 }
 0x28f   : > { %v2875_v8 = vsel %vm6716_vm6, %v2867_v27, %v2874_v61  ;;  %v4769_v1 = vsel %vm11859_vm3, %v4766_v38, %v11264_v45  ;;  %v1921_v25 = vor.u32 %v1919_v2, %v9855_v18  ;;  %v2367_v38 = vshrl.u32 %v2105_v42, 16 }
 0x290   : > { %v3077_v27 = vsel %vm11769_vm1, %v9350_v46, %v2875_v8  ;;  %v3319_v14 = vor.u32 %v3317_v37, %v3316_v40  ;;  %v3321_v53 = vrot.slane %v3316_v40, 4  ;;  %6073 = vmatmul.mubr.bf16.gmra.mrb[84].mxu0 %v4769_v1  ;;  %v2370_v33 = vshll.u32 %v2105_v42, 16 }
 0x291   : > { %v3323_v36 = vshrl.u32 %v3077_v27, 16  ;;  %v3326_v16 = vshll.u32 %v3077_v27, 16  ;;  %6076 = vmatprep.mubr.msk.bf16.mxu0 %vm11588_vm0, %v11587_v47  ;;  %v4330_v23 = vshrl.u32 %v5505_v50, 16  ;;  %v1922_v37 = vsel %vm6716_vm6, %v1914_v49, %v1921_v25 }
 0x292   : > { %v3320_v12 = vsel %vm6716_vm6, %v3312_v20, %v3319_v14  ;;  %v4333_v7 = vshll.u32 %v5505_v50, 16  ;;  %v2106_v20 = vsel %vm6736_vm7, %v9350_v46, %v1922_v37  ;;  %v2369_v2 = vrot.slane %v2367_v38, 7 }
 0x293   : > { %v9890_v41 = vrot.slane %v3323_v36, 7  ;;  %v3530_v61 = vsel %vm11782_vm2, %v9347_v9, %v3320_v12  ;;  %v2876_v8 = vrot.slane %v9842_v30, 4  ;;  %v2376_v27 = vshrl.u32 %v2106_v20, 16 }
 0x294   : > { %v3578_v40 = vsel %vm11788_vm14, %v9460_v28, %v3530_v61  ;;  %v4332_v14 = vrot.slane %v4330_v23, 1  ;;  %v2372_v42 = vor.u32 %v2370_v33, %v2369_v2  ;;  %v2374_v49 = vrot.slane %v2369_v2, 4 }
 0x295   : > { %v3328_v48 = vor.u32 %v3326_v16, %v9890_v41  ;;  %v3816_v1 = vshrl.u32 %v3578_v40, 16  ;;  %v3819_v36 = vshll.u32 %v3578_v40, 16  ;;  %v2379_v50 = vshll.u32 %v2106_v20, 16 }
 0x296   : > { %v9907_v61 = vrot.slane %v2376_v27, 7  ;;  %v4335_v45 = vrot.slane %v4333_v7, 2  ;;  %v2373_v16 = vsel %vm6716_vm6, %v2365_v4, %v2372_v42  ;;  %v3330_v38 = vrot.slane %v9890_v41, 4 }
 0x297   : > { %v3329_v25 = vsel %vm6716_vm6, %v3321_v53, %v3328_v48  ;;  %v3818_v12 = vrot.slane %v3816_v1, 7  ;;  %v1925_v33 = vshrl.u32 %v9460_v28, 16  ;;  %v1923_v7 = vrot.slane %v9855_v18, 4 }
 0x298   : > { %v3531_v30 = vsel %vm11782_vm2, %v9350_v46, %v3329_v25  ;;  %v2381_v37 = vor.u32 %v2379_v50, %v9907_v61  ;;  %v2569_v2 = vsel %vm11734_vm13, %v9347_v9, %v2373_v16  ;;  %v9924_v4 = vor.u32 %v4335_v45, %v4332_v14 }
 0x299   : > { %v3579_v23 = vsel %vm11788_vm14, %v9462_v55, %v3531_v30  ;;  %v3821_v53 = vor.u32 %v3819_v36, %v3818_v12  ;;  %v3823_v40 = vrot.slane %v3818_v12, 4  ;;  %v2619_v27 = vsel %vm11740_vm10, %v9460_v28, %v2569_v2 }
 0x29a   : > { %v3825_v20 = vshrl.u32 %v3579_v23, 16  ;;  %v3828_v48 = vshll.u32 %v3579_v23, 16  ;;  %v2382_v1 = vsel %vm6716_vm6, %v2374_v49, %v2381_v37  ;;  %v1927_v36 = vrot.slane %v1925_v33, 7 }
 0x29b   : > { %v3822_v18 = vsel %vm6716_vm6, %v3814_v62, %v3821_v53  ;;  %v2570_v9 = vsel %vm11734_vm13, %v9350_v46, %v2382_v1  ;;  %v2878_v45 = vshrl.u32 %v2619_v27, 16  ;;  %v2881_v49 = vshll.u32 %v2619_v27, 16 }
 0x29c   : > { %v9935_v42 = vrot.slane %v3825_v20, 7  ;;  %v2620_v14 = vsel %vm11740_vm10, %v9462_v55, %v2570_v9  ;;  %v4337_v50 = vsel %vm11855_vm5, %v9837_v34, %v9924_v4  ;;  %v1928_v13 = vshll.u32 %v9460_v28, 16  ;;  %vm11866_vm5 = vmmov %vm11859_vm3 }
 0x29d   : > { %v2880_v25 = vrot.slane %v2878_v45, 7  ;;  %v2887_v12 = vshrl.u32 %v2620_v14, 16  ;;  %v2890_v30 = vshll.u32 %v2620_v14, 16  ;;  %5993 = vmatmul.mubr.bf16.gmra.mrb[100].mxu1 %v4337_v50  ;;  %v4032_v46 = vsel %vm8092_vm15, %v9460_v28, %v3822_v18 }
 0x29e   : > { %v3830_v62 = vor.u32 %v3828_v48, %v9935_v42  ;;  %v1930_v16 = vor.u32 %v1928_v13, %v1927_v36  ;;  %v1932_v33 = vrot.slane %v1927_v36, 4  ;;  %v1934_v23 = vshrl.u32 %v9462_v55, 16  ;;  %5996 = vmatprep.mubr.msk.bf16.mxu1 %vm11588_vm0, %v11587_v47 }
 0x29f   : > { %v2883_v53 = vor.u32 %v2881_v49, %v2880_v25  ;;  %v2885_v37 = vrot.slane %v2880_v25, 4  ;;  %v9956_v20 = vrot.slane %v2887_v12, 7  ;;  %v1937_v27 = vshll.u32 %v9462_v55, 16 }
 0x2a0   : > { %v3831_v34 = vsel %vm6716_vm6, %v3823_v40, %v3830_v62  ;;  %v1931_v48 = vsel %vm6716_vm6, %v1923_v7, %v1930_v16  ;;  %v9963_v1 = vrot.slane %v1934_v23, 7  ;;  %v2383_v14 = vrot.slane %v9907_v61, 4 }
 0x2a1   : > { %v4033_v2 = vsel %vm8092_vm15, %v9462_v55, %v3831_v34  ;;  %v2884_v40 = vsel %vm6716_vm6, %v2876_v8, %v2883_v53  ;;  %v2892_v18 = vor.u32 %v2890_v30, %v9956_v20  ;;  %v2107_v9 = vsel %vm6736_vm7, %v9460_v28, %v1931_v48 }
 0x2a2   : > { %v9966_v36 = vcombine.low %v4032_v46, %v4033_v2  ;;  %v3078_v45 = vsel %vm11769_vm1, %v9460_v28, %v2884_v40  ;;  %v1939_v7 = vor.u32 %v1937_v27, %v9963_v1  ;;  %v2385_v49 = vshrl.u32 %v2107_v9, 16  ;;  %v9996_v27 = vld [vmem:[#allocation2 + $0xa0] sm:$0xf] }
 0x2a3   : > { %v2893_v8 = vsel %vm6716_vm6, %v2885_v37, %v2892_v18  ;;  %v3332_v13 = vshrl.u32 %v3078_v45, 16  ;;  %v3335_v62 = vshll.u32 %v3078_v45, 16  ;;  %v2388_v46 = vshll.u32 %v2107_v9, 16  ;;  %v10002_v45 = vld [vmem:[#allocation2 + $0xa4] sm:$0xf] }
 0x2a4   : > { %v4770_v50 = vrot.slane %v9966_v36, 1  ;;  %v3079_v25 = vsel %vm11769_vm1, %v9462_v55, %v2893_v8  ;;  %v1940_v12 = vsel %vm6716_vm6, %v1932_v33, %v1939_v7  ;;  %v2387_v30 = vrot.slane %v2385_v49, 7 }
 0x2a5   : > { %v11863_v61 = vrot.slane %v9848_v26, 1  ;;  %v3334_v23 = vrot.slane %v3332_v13, 7  ;;  %v3341_v34 = vshrl.u32 %v3079_v25, 16  ;;  %v3344_v53 = vshll.u32 %v3079_v25, 16 }
 0x2a6   : > { %v3832_v37 = vrot.slane %v9935_v42, 4  ;;  %v2108_v2 = vsel %vm6736_vm7, %v9462_v55, %v1940_v12  ;;  %v2390_v48 = vor.u32 %v2388_v46, %v2387_v30  ;;  %v2392_v33 = vrot.slane %v2387_v30, 4 }
 0x2a7   : > { %v4771_v16 = vsel %vm11864_vm11, %v11863_v61, %v4770_v50  ;;  %v3337_v26 = vor.u32 %v3335_v62, %v3334_v23  ;;  %v3339_v40 = vrot.slane %v3334_v23, 4  ;;  %v10000_v18 = vrot.slane %v3341_v34, 7  ;;  %vm11884_vm11 = vmmov %vm11865_vm9 }
 0x2a8   : > { %6077 = vmatmul.mubr.bf16.gmra.mrb[88].mxu0 %v4771_v16  ;;  %v2394_v9 = vshrl.u32 %v2108_v2, 16  ;;  %v2391_v42 = vsel %vm6716_vm6, %v2383_v14, %v2390_v48  ;;  %v2397_v7 = vshll.u32 %v2108_v2, 16  ;;  %v2894_v49 = vrot.slane %v9956_v20, 4 }
 0x2a9   : > { %6080 = vmatprep.mubr.msk.bf16.mxu0 %vm11588_vm0, %v11587_v47  ;;  %v5506_v8 = vcombine.low %v9996_v27, %v10002_v45  ;;  %v3338_v13 = vsel %vm6716_vm6, %v3330_v38, %v3337_v26  ;;  %v3346_v62 = vor.u32 %v3344_v53, %v10000_v18  ;;  %v2571_v12 = vsel %vm11734_vm13, %v9460_v28, %v2391_v42 }
 0x2aa   : > { %v10014_v25 = vrot.slane %v2394_v9, 7  ;;  %v3532_v20 = vsel %vm11782_vm2, %v9460_v28, %v3338_v13  ;;  %v2621_v14 = vsel %vm11740_vm10, %v9556_v19, %v2571_v12  ;;  %v1941_v30 = vrot.slane %v9963_v1, 4 }
 0x2ab   : > { %v4339_v41 = vshrl.u32 %v5506_v8, 16  ;;  %v3347_v38 = vsel %vm6716_vm6, %v3339_v40, %v3346_v62  ;;  %v3580_v46 = vsel %vm11788_vm14, %v9556_v19, %v3532_v20  ;;  %v2896_v16 = vshrl.u32 %v2621_v14, 16 }
 0x2ac   : > { %v2399_v61 = vor.u32 %v2397_v7, %v10014_v25  ;;  %v3533_v28 = vsel %vm11782_vm2, %v9462_v55, %v3347_v38  ;;  %v3834_v23 = vshrl.u32 %v3580_v46, 16  ;;  %v3837_v34 = vshll.u32 %v3580_v46, 16 }
 0x2ad   : > { %v2899_v53 = vshll.u32 %v2621_v14, 16  ;;  %v3581_v2 = vsel %vm11788_vm14, %v9558_v58, %v3533_v28  ;;  %v2898_v26 = vrot.slane %v2896_v16, 7  ;;  %v4341_v40 = vrot.slane %v4339_v41, 1 }
 0x2ae   : > { %v2400_v48 = vsel %vm6716_vm6, %v2392_v33, %v2399_v61  ;;  %v3836_v9 = vrot.slane %v3834_v23, 7  ;;  %v3843_v42 = vshrl.u32 %v3581_v2, 16  ;;  %v3846_v7 = vshll.u32 %v3581_v2, 16 }
 0x2af   : > { %v2572_v13 = vsel %vm11734_vm13, %v9462_v55, %v2400_v48  ;;  %v2901_v12 = vor.u32 %v2899_v53, %v2898_v26  ;;  %v2903_v20 = vrot.slane %v2898_v26, 4  ;;  %v4342_v14 = vshll.u32 %v5506_v8, 16 }
 0x2b0   : > { %v2622_v62 = vsel %vm11740_vm10, %v9558_v58, %v2572_v13  ;;  %v3839_v38 = vor.u32 %v3837_v34, %v3836_v9  ;;  %v3841_v46 = vrot.slane %v3836_v9, 4  ;;  %v10046_v28 = vrot.slane %v3843_v42, 7  ;;  %v10059_v34 = vld [vmem:[#allocation2 + $0xa8] sm:$0x1] }
 0x2b1   : > { %v2905_v33 = vshrl.u32 %v2622_v62, 16  ;;  %v2902_v41 = vsel %vm6716_vm6, %v2894_v49, %v2901_v12  ;;  %v2908_v61 = vshll.u32 %v2622_v62, 16  ;;  %v4344_v16 = vrot.slane %v4342_v14, 2 }
 0x2b2   : > { %v1943_v23 = vshrl.u32 %v9556_v19, 16  ;;  %v3840_v55 = vsel %vm6716_vm6, %v3832_v37, %v3839_v38  ;;  %v3848_v2 = vor.u32 %v3846_v7, %v10046_v28  ;;  %v3080_v8 = vsel %vm11769_vm1, %v9556_v19, %v2902_v41 }
 0x2b3   : > { %v10054_v53 = vrot.slane %v2905_v33, 7  ;;  %v4034_v49 = vsel %vm8092_vm15, %v9556_v19, %v3840_v55  ;;  %v3348_v48 = vrot.slane %v10000_v18, 4  ;;  %v3350_v26 = vshrl.u32 %v3080_v8, 16 }
 0x2b4   : > { %v3353_v9 = vshll.u32 %v3080_v8, 16  ;;  %v3849_v37 = vsel %vm6716_vm6, %v3841_v46, %v3848_v2  ;;  %v10068_v7 = vor.u32 %v4344_v16, %v4341_v40  ;;  %v1945_v13 = vrot.slane %v1943_v23, 7 }
 0x2b5   : > { %v2910_v42 = vor.u32 %v2908_v61, %v10054_v53  ;;  %v4035_v62 = vsel %vm8092_vm15, %v9558_v58, %v3849_v37  ;;  %v3352_v12 = vrot.slane %v3350_v26, 7  ;;  %v1946_v14 = vshll.u32 %v9556_v19, 16 }
 0x2b6   : > { %v1952_v38 = vshrl.u32 %v9558_v58, 16  ;;  %v10076_v33 = vcombine.low %v4034_v49, %v4035_v62  ;;  %v4346_v40 = vsel %vm11865_vm9, %v9924_v4, %v10068_v7  ;;  %v1950_v23 = vrot.slane %v1945_v13, 4  ;;  %vm11889_vm9 = vmmov %vm11859_vm3 }
 0x2b7   : > { %v2911_v46 = vsel %vm6716_vm6, %v2903_v20, %v2910_v42  ;;  %v3355_v61 = vor.u32 %v3353_v9, %v3352_v12  ;;  %5997 = vmatmul.mubr.bf16.gmra.mrb[104].mxu1 %v4346_v40  ;;  %v1948_v16 = vor.u32 %v1946_v14, %v1945_v13  ;;  %v3357_v20 = vrot.slane %v3352_v12, 4 }
 0x2b8   : > { %v3081_v41 = vsel %vm11769_vm1, %v9558_v58, %v2911_v46  ;;  %v4772_v55 = vrot.slane %v10076_v33, 1  ;;  %v10087_v49 = vrot.slane %v1952_v38, 7  ;;  %6000 = vmatprep.mubr.msk.bf16.mxu1 %vm11588_vm0, %v11587_v47  ;;  %v1955_v9 = vshll.u32 %v9558_v58, 16  ;;  %v6262_v33 = vld [vmem:[%s11103_s6 + $0x8] sm:$0xff]  }
 0x2b9   : > { %v3359_v2 = vshrl.u32 %v3081_v41, 16  ;;  %v3362_v8 = vshll.u32 %v3081_v41, 16  ;;  %v3356_v4 = vsel %vm6716_vm6, %v3348_v48, %v3355_v61  ;;  %v1949_v26 = vsel %vm6716_vm6, %v1941_v30, %v1948_v16 }
 0x2ba   : > { %v4773_v37 = vsel %vm11859_vm3, %v4770_v50, %v4772_v55  ;;  %v3534_v48 = vsel %vm11782_vm2, %v9556_v19, %v3356_v4  ;;  %v2109_v1 = vsel %vm6736_vm7, %v9556_v19, %v1949_v26  ;;  %v1957_v13 = vor.u32 %v1955_v9, %v10087_v49  ;;  %vm11896_vm3 = vmmov %vm11884_vm11 }
 0x2bb   : > { %v10103_v42 = vrot.slane %v3359_v2, 7  ;;  %6081 = vmatmul.mubr.bf16.gmra.mrb[92].mxu0 %v4773_v37  ;;  %v3582_v30 = vsel %vm11788_vm14, %v9642_v24, %v3534_v48  ;;  %v2403_v36 = vshrl.u32 %v2109_v1, 16  ;;  %v2406_v62 = vshll.u32 %v2109_v1, 16 }
 0x2bc   : > { %6084 = vmatprep.mubr.msk.bf16.mxu0 %vm11588_vm0, %v11587_v47  ;;  %v3850_v12 = vrot.slane %v10046_v28, 4  ;;  %v3852_v14 = vshrl.u32 %v3582_v30, 16  ;;  %v3855_v38 = vshll.u32 %v3582_v30, 16  ;;  %v1958_v46 = vsel %vm6716_vm6, %v1950_v23, %v1957_v13 }
 0x2bd   : > { %v3364_v50 = vor.u32 %v3362_v8, %v10103_v42  ;;  %v2401_v40 = vrot.slane %v10014_v25, 4  ;;  %v2405_v41 = vrot.slane %v2403_v36, 7  ;;  %v2912_v61 = vrot.slane %v10054_v53, 4 }
 0x2be   : > { %v3854_v2 = vrot.slane %v3852_v14, 7  ;;  %v2110_v8 = vsel %vm6736_vm7, %v9558_v58, %v1958_v46  ;;  %v1997_v28 = vshrl.u32 %v9857_v5, 16  ;;  %v2006_v14 = vshrl.u32 %v9863_v44, 16 }
 0x2bf   : > { %v3365_v16 = vsel %vm6716_vm6, %v3357_v20, %v3364_v50  ;;  %v2408_v23 = vor.u32 %v2406_v62, %v2405_v41  ;;  %v2412_v26 = vshrl.u32 %v2110_v8, 16  ;;  %v2410_v9 = vrot.slane %v2405_v41, 4 }
 0x2c0   : > { %v3535_v4 = vsel %vm11782_vm2, %v9558_v58, %v3365_v16  ;;  %v3857_v20 = vor.u32 %v3855_v38, %v3854_v2  ;;  %v2415_v37 = vshll.u32 %v2110_v8, 16  ;;  %v10145_v50 = vrot.slane %v1997_v28, 7 }
 0x2c1   : > { %v3583_v53 = vsel %vm11788_vm14, %v9644_v60, %v3535_v4  ;;  %v2409_v30 = vsel %vm6716_vm6, %v2401_v40, %v2408_v23  ;;  %v10138_v13 = vrot.slane %v2412_v26, 7  ;;  %v3859_v38 = vrot.slane %v3854_v2, 4 }
 0x2c2   : > { %v3861_v48 = vshrl.u32 %v3583_v53, 16  ;;  %v3864_v1 = vshll.u32 %v3583_v53, 16  ;;  %v3858_v36 = vsel %vm6716_vm6, %v3850_v12, %v3857_v20  ;;  %v2573_v62 = vsel %vm11734_vm13, %v9556_v19, %v2409_v30 }
 0x2c3   : > { %v2417_v41 = vor.u32 %v2415_v37, %v10138_v13  ;;  %v2623_v40 = vsel %vm11740_vm10, %v9642_v24, %v2573_v62  ;;  %v4036_v12 = vsel %vm8092_vm15, %v9642_v24, %v3858_v36  ;;  %v2004_v4 = vrot.slane %v10145_v50, 4 }
 0x2c4   : > { %v10148_v46 = vrot.slane %v3861_v48, 7  ;;  %v2914_v16 = vshrl.u32 %v2623_v40, 16  ;;  %v2917_v8 = vshll.u32 %v2623_v40, 16  ;;  %v2008_v23 = vrot.slane %v2006_v14, 7 }
 0x2c5   : > { %v2418_v2 = vsel %vm6716_vm6, %v2410_v9, %v2417_v41  ;;  %v2009_v20 = vshll.u32 %v9863_v44, 16  ;;  %v2015_v37 = vshrl.u32 %v9996_v27, 16  ;;  %v2018_v30 = vshll.u32 %v9996_v27, 16 }
 0x2c6   : > { %v3866_v28 = vor.u32 %v3864_v1, %v10148_v46  ;;  %v2574_v26 = vsel %vm11734_vm13, %v9558_v58, %v2418_v2  ;;  %v2916_v53 = vrot.slane %v2914_v16, 7  ;;  %v2013_v9 = vrot.slane %v2008_v23, 4 }
 0x2c7   : > { %v2624_v1 = vsel %vm11740_vm10, %v9644_v60, %v2574_v26  ;;  %v2011_v16 = vor.u32 %v2009_v20, %v2008_v23  ;;  %v2017_v2 = vrot.slane %v2015_v37, 7  ;;  %v2024_v26 = vshrl.u32 %v10002_v45, 16  ;;  %v10192_v20 = vpop.f32.mrb[44].mxu0 }
 0x2c8   : > { %v3867_v48 = vsel %vm6716_vm6, %v3859_v38, %v3866_v28  ;;  %v2919_v58 = vor.u32 %v2917_v8, %v2916_v53  ;;  %v2921_v62 = vrot.slane %v2916_v53, 4  ;;  %v2923_v14 = vshrl.u32 %v2624_v1, 16  ;;  %v10190_v53 = vpop.f32.mrb[40].mxu1 }
 0x2c9   : > { %v4037_v36 = vsel %vm8092_vm15, %v9644_v60, %v3867_v48  ;;  %v2926_v40 = vshll.u32 %v2624_v1, 16  ;;  %v2027_v18 = vshll.u32 %v10002_v45, 16  ;;  %v2020_v23 = vor.u32 %v2018_v30, %v2017_v2 }
 0x2ca   : > { %v10176_v41 = vcombine.low %v4036_v12, %v4037_v36  ;;  %v2920_v38 = vsel %vm6716_vm6, %v2912_v61, %v2919_v58  ;;  %v10180_v28 = vrot.slane %v2923_v14, 7  ;;  %v2012_v12 = vsel %vm6716_vm6, %v2004_v4, %v2011_v16  ;;  %v6261_v61 = vld [vmem:[%s11103_s6] sm:$0xff]   ;;  %v5934_v58 = vpop.f32.mrb[41].mxu1  ;;  %v6034_v14 = vpop.f32.mrb[45].mxu0 }
 0x2cb   : > { %v3082_v8 = vsel %vm11769_vm1, %v9642_v24, %v2920_v38  ;;  %v2022_v36 = vrot.slane %v2017_v2, 4  ;;  %v2021_v30 = vsel %vm6716_vm6, %v2013_v9, %v2020_v23  ;;  %v10205_v16 = vrot.slane %v2024_v26, 7  ;;  %v10212_v38 = vpop.f32.mrb[42].mxu1  ;;  %v10214_v2 = vpop.f32.mrb[46].mxu0  ;;  %6117 = vmatpush3.bf16.msra.mxu1 %v6261_v61  ;;  %v10233_v58 = vld [vmem:[#allocation2 + $0xa8] sm:$0xf] }
 0x2cc   : > { %v11265_v19 = vrot.slane %v10176_v41, 1  ;;  %v2928_v37 = vor.u32 %v2926_v40, %v10180_v28  ;;  %v3368_v48 = vshrl.u32 %v3082_v8, 16  ;;  %v3371_v1 = vshll.u32 %v3082_v8, 16  ;;  %v6035_v23 = vpop.f32.mrb[47].mxu0  ;;  %6118 = vmatprep.subr.bf16.mxu1 %v11587_v47  ;;  %v10235_v14 = vld [vmem:[#allocation2 + $0xac] sm:$0xf] }
 0x2cd   : > { %v10210_v40 = vsel %vm6736_vm7, %v9863_v44, %v2012_v12  ;;  %v2117_v26 = vsel %vm6736_vm7, %v9996_v27, %v2021_v30  ;;  %v5935_v12 = vpop.f32.mrb[43].mxu1  ;;  %v10239_v30 = vpop.f32.mrb[48].mxu0  ;;  %v4895_v32 = vadd.f32 %v10214_v2, %v10212_v38 }
 0x2ce   : > { %v4775_v4 = vsel %vm11866_vm5, %v4772_v55, %v11265_v19  ;;  %v2929_v55 = vsel %vm6716_vm6, %v2921_v62, %v2928_v37  ;;  %v3370_v9 = vrot.slane %v3368_v48, 7  ;;  %v2466_v8 = vshrl.u32 %v10210_v40, 16  ;;  %v6038_v22 = vpop.f32.mrb[49].mxu0 }
 0x2cf   : > { %6085 = vmatmul.mubr.bf16.gmra.mrb[96].mxu0 %v4775_v4  ;;  %v3083_v61 = vsel %vm11769_vm1, %v9644_v60, %v2929_v55  ;;  %v2029_v37 = vor.u32 %v2027_v18, %v10205_v16  ;;  %v2475_v48 = vshrl.u32 %v2117_v26, 16  ;;  %v10237_v4 = vpop.f32.mrb[44].mxu1  ;;  %v2478_v62 = vshll.u32 %v2117_v26, 16  ;;  %v10245_v17 = vpop.f32.mrb[50].mxu0  ;;  %6119 = vmatpush3.bf16.msra.mxu1 %v6262_v33 }
 0x2d0   : > { %6088 = vmatprep.mubr.msk.bf16.mxu0 %vm11588_vm0, %v11587_v47  ;;  %v3373_v12 = vor.u32 %v3371_v1, %v3370_v9  ;;  %v3375_v23 = vrot.slane %v3370_v9, 4  ;;  %v3377_v19 = vshrl.u32 %v3083_v61, 16  ;;  %v3380_v25 = vshll.u32 %v3083_v61, 16  ;;  %v5938_v51 = vpop.f32.mrb[45].mxu1  ;;  %11868 = vst [vmem:[#allocation49_spill] sm:$0xff] %v10245_v17  ;;  %v6263_v1 = vld [vmem:[%s11103_s6 + $0x10] sm:$0xff]   ;;  %6120 = vmatprep.subr.bf16.mxu1 %v11587_v47 }
 0x2d1   : > { %v2030_v60 = vsel %vm6716_vm6, %v2022_v36, %v2029_v37  ;;  %v2468_v55 = vrot.slane %v2466_v8, 7  ;;  %v2477_v18 = vrot.slane %v2475_v48, 7  ;;  %v10243_v11 = vpop.f32.mrb[46].mxu1  ;;  %v11869_v9 = vrot.slane %v10103_v42, 4  ;;  %v6039_v33 = vpop.f32.mrb[51].mxu0 }
 0x2d2   : > { %11867 = vst [vmem:[#allocation47_spill] sm:$0xff] %v10243_v11  ;;  %v10254_v51 = vrot.slane %v3377_v19, 7  ;;  %v2118_v36 = vsel %vm6736_vm7, %v10002_v45, %v2030_v60  ;;  %v5507_v26 = vcombine.low %v10233_v58, %v10235_v14  ;;  %v5939_v8 = vpop.f32.mrb[47].mxu1  ;;  %v2469_v61 = vshll.u32 %v10210_v40, 16 }
 0x2d3   : > { %v3374_v22 = vsel %vm6716_vm6, %v11869_v9, %v3373_v12  ;;  %v2473_v37 = vrot.slane %v2468_v55, 4  ;;  %v2480_v19 = vor.u32 %v2478_v62, %v2477_v18  ;;  %v10266_v48 = vpop.f32.mrb[48].mxu1  ;;  %v10268_v12 = vpop.f32.mrb[52].mxu0  ;;  %v2482_v8 = vrot.slane %v2477_v18, 4  ;;  %6121 = vmatpush3.bf16.msra.mxu1 %v6263_v1 }
 0x2d4   : > { %v3536_v42 = vsel %vm11782_vm2, %v9642_v24, %v3374_v22  ;;  %11870 = vst [vmem:[#allocation46_spill] sm:$0xff] %v10266_v48  ;;  %11871 = vst [vmem:[#allocation36_spill] sm:$0xff] %v10268_v12  ;;  %v3382_v60 = vor.u32 %v3380_v25, %v10254_v51  ;;  %v2484_v33 = vshrl.u32 %v2118_v36, 16  ;;  %v5942_v3 = vpop.f32.mrb[49].mxu1  ;;  %v6042_v15 = vpop.f32.mrb[53].mxu0  ;;  %v2487_v62 = vshll.u32 %v2118_v36, 16  ;;  %6122 = vmatprep.subr.bf16.mxu1 %v11587_v47 }
 0x2d5   : > { %v3584_v9 = vsel %vm11788_vm14, %v9770_v29, %v3536_v42  ;;  %v2481_v40 = vsel %vm6716_vm6, %v2473_v37, %v2480_v19  ;;  %v10276_v22 = vpop.f32.mrb[50].mxu1  ;;  %v10278_v21 = vpop.f32.mrb[54].mxu0  ;;  %v4348_v3 = vshrl.u32 %v5507_v26, 16  ;;  %v10288_v36 = vld [vmem:[#allocation2 + $0x8c] sm:$0xf]  ;;  %v4351_v19 = vshll.u32 %v5507_v26, 16 }
 0x2d6   : > { %v3870_v10 = vshrl.u32 %v3584_v9, 16  ;;  %v3873_v24 = vshll.u32 %v3584_v9, 16  ;;  %11872 = vst [vmem:[#allocation51_spill] sm:$0xff] %v10276_v22  ;;  %11873 = vst [vmem:[#allocation6_spill] sm:$0xff] %v10278_v21  ;;  %v3383_v25 = vsel %vm6716_vm6, %v3375_v23, %v3382_v60  ;;  %v10282_v6 = vrot.slane %v2484_v33, 7  ;;  %v5943_v18 = vpop.f32.mrb[51].mxu1 }
 0x2d7   : > { %v2581_v15 = vsel %vm11734_vm13, %v9996_v27, %v2481_v40  ;;  %v6043_v42 = vpop.f32.mrb[55].mxu0  ;;  %v3537_v1 = vsel %vm11782_vm2, %v10288_v36, %v3383_v25  ;;  %v10296_v60 = vpop.f32.mrb[52].mxu1  ;;  %v11876_v40 = vshll.u32 %v9857_v5, 16  ;;  %v10309_v0 = vor.u32 %v2469_v61, %v2468_v55 }
 0x2d8   : > { %v3872_v37 = vrot.slane %v3870_v10, 7  ;;  %v2631_v23 = vsel %vm11740_vm10, %v10233_v58, %v2581_v15  ;;  %11874 = vst [vmem:[#allocation53_spill] sm:$0xff] %v10296_v60  ;;  %v10298_v9 = vpop.f32.mrb[56].mxu0  ;;  %v3585_v33 = vsel %vm11788_vm14, %v9776_v59, %v3537_v1  ;;  %v2489_v10 = vor.u32 %v2487_v62, %v10282_v6  ;;  %v5946_v42 = vpop.f32.mrb[53].mxu1 }
 0x2d9   : > { %11875 = vst [vmem:[#allocation54_spill] sm:$0xff] %v10298_v9  ;;  %v10306_v18 = vor.u32 %v11876_v40, %v10145_v50  ;;  %v2986_v25 = vshrl.u32 %v2631_v23, 16  ;;  %v6046_v39 = vpop.f32.mrb[57].mxu0  ;;  %v3879_v26 = vshrl.u32 %v3585_v33, 16  ;;  %v3882_v52 = vshll.u32 %v3585_v33, 16  ;;  %v10311_v9 = vpop.f32.mrb[54].mxu1 }
 0x2da   : > { %v3875_v15 = vor.u32 %v3873_v24, %v3872_v37  ;;  %11877 = vst [vmem:[#allocation55_spill] sm:$0xff] %v10311_v9  ;;  %v10313_v60 = vpop.f32.mrb[58].mxu0  ;;  %v3877_v1 = vrot.slane %v3872_v37, 4  ;;  %v2490_v21 = vsel %vm6716_vm6, %v2482_v8, %v2489_v10  ;;  %v4350_v50 = vrot.slane %v4348_v3, 1  ;;  %v5947_v22 = vpop.f32.mrb[55].mxu1 }
 0x2db   : > { %11878 = vst [vmem:[#allocation56_spill] sm:$0xff] %v10313_v60  ;;  %v4353_v40 = vrot.slane %v4351_v19, 2  ;;  %v6047_v62 = vpop.f32.mrb[59].mxu0  ;;  %v11879_v42 = vrot.slane %v10148_v46, 4  ;;  %v10321_v24 = vrot.slane %v3879_v26, 7  ;;  %v2582_v55 = vsel %vm11734_vm13, %v10002_v45, %v2490_v21  ;;  %v10326_v37 = vpop.f32.mrb[56].mxu1 }
 0x2dc   : > { %v2988_v61 = vrot.slane %v2986_v25, 7  ;;  %11880 = vst [vmem:[#allocation57_spill] sm:$0xff] %v10326_v37  ;;  %v10328_v33 = vpop.f32.mrb[60].mxu0  ;;  %v2632_v46 = vsel %vm11740_vm10, %v10235_v14, %v2582_v55  ;;  %v2989_v22 = vshll.u32 %v2631_v23, 16  ;;  %v1959_v3 = vrot.slane %v10087_v49, 4  ;;  %v5950_v19 = vpop.f32.mrb[57].mxu1 }
 0x2dd   : > { %v3876_v39 = vsel %vm6716_vm6, %v11879_v42, %v3875_v15  ;;  %11881 = vst [vmem:[#allocation58_spill] sm:$0xff] %v10328_v33  ;;  %v6050_v10 = vpop.f32.mrb[61].mxu0  ;;  %v3884_v21 = vor.u32 %v3882_v52, %v10321_v24  ;;  %v2995_v25 = vshrl.u32 %v2632_v46, 16  ;;  %v2998_v15 = vshll.u32 %v2632_v46, 16  ;;  %v10340_v62 = vpop.f32.mrb[58].mxu1 }
 0x2de   : > { %v4038_v8 = vsel %vm8092_vm15, %v9770_v29, %v3876_v39  ;;  %v10338_v26 = vor.u32 %v4353_v40, %v4350_v50  ;;  %11882 = vst [vmem:[#allocation59_spill] sm:$0xff] %v10340_v62  ;;  %v10342_v42 = vpop.f32.mrb[62].mxu0  ;;  %v10344_v39 = vld [vmem:[#allocation2 + $0x88] sm:$0xf]  ;;  %v1970_v49 = vshrl.u32 %v10288_v36, 16  ;;  %v1973_v55 = vshll.u32 %v10288_v36, 16 }
 0x2df   : > { %11883 = vst [vmem:[#allocation60_spill] sm:$0xff] %v10342_v42  ;;  %v1961_v33 = vshrl.u32 %v10344_v39, 16  ;;  %v1964_v23 = vshll.u32 %v10344_v39, 16  ;;  %v5951_v19 = vpop.f32.mrb[59].mxu1  ;;  %v6051_v52 = vpop.f32.mrb[63].mxu0  ;;  %v3885_v50 = vsel %vm6716_vm6, %v3877_v1, %v3884_v21  ;;  %v2993_v40 = vrot.slane %v2988_v61, 4 }
 0x2e0   : > { %v10352_v46 = vrot.slane %v2995_v25, 7  ;;  %v4355_v10 = vsel %vm11884_vm11, %v10068_v7, %v10338_v26  ;;  %v10357_v42 = vpop.f32.mrb[60].mxu1  ;;  %v4039_v62 = vsel %vm8092_vm15, %v9776_v59, %v3885_v50  ;;  %v10362_v37 = vor.u32 %v2989_v22, %v2988_v61  ;;  %v10433_v9 = vld [vmem:[#allocation2 + $0x94] sm:$0xf]  ;;  %vm11904_vm11 = vmmov %vm11896_vm3 }
 0x2e1   : > { %11885 = vst [vmem:[#allocation61_spill] sm:$0xff] %v10357_v42  ;;  %6001 = vmatmul.mubr.bf16.gmra.mrb[108].mxu1 %v4355_v10  ;;  %v1963_v19 = vrot.slane %v1961_v33, 7  ;;  %v10364_v52 = vrot.slane %v1970_v49, 7  ;;  %v5954_v1 = vpop.f32.mrb[61].mxu1  ;;  %v10366_v21 = vcombine.low %v4038_v8, %v4039_v62  ;;  %v2419_v60 = vrot.slane %v10138_v13, 4 }
 0x2e2   : > { %v3000_v25 = vor.u32 %v2998_v15, %v10352_v46  ;;  %6004 = vmatprep.mubr.msk.bf16.mxu1 %vm11588_vm0, %v11587_v47  ;;  %v10373_v42 = vpop.f32.mrb[62].mxu1  ;;  %v1979_v49 = vshrl.u32 %v9770_v29, 16  ;;  %v1988_v15 = vshrl.u32 %v9776_v59, 16  ;;  %v1991_v13 = vshll.u32 %v9776_v59, 16 }
 0x2e3   : > { %11886 = vst [vmem:[#allocation62_spill] sm:$0xff] %v10373_v42  ;;  %v1966_v61 = vor.u32 %v1964_v23, %v1963_v19  ;;  %v1968_v22 = vrot.slane %v1963_v19, 4  ;;  %v1975_v33 = vor.u32 %v1973_v55, %v10364_v52  ;;  %v5955_v50 = vpop.f32.mrb[63].mxu1  ;;  %v11278_v8 = vrot.slane %v10366_v21, 1  ;;  %v11928_v57 = vld [vmem:[#allocation57_spill] sm:$0xff] }
 0x2e4   : > { %v3001_v62 = vsel %vm6716_vm6, %v2993_v40, %v3000_v25  ;;  %v10382_v10 = vpop.f32.mrb[64].mxu1  ;;  %v10388_v19 = vrot.slane %v1979_v49, 7  ;;  %v11888_v59 = vrot.slane %v10176_v41, 1 }
 0x2e5   : > { %11887 = vst [vmem:[#allocation63_spill] sm:$0xff] %v10382_v10  ;;  %v1967_v23 = vsel %vm6716_vm6, %v1959_v3, %v1966_v61  ;;  %v1976_v55 = vsel %vm6716_vm6, %v1968_v22, %v1975_v33  ;;  %v10393_v29 = vsel %vm11769_vm1, %v10235_v14, %v3001_v62  ;;  %v5958_v1 = vpop.f32.mrb[65].mxu1  ;;  %v1990_v61 = vrot.slane %v1988_v15, 7  ;;  %v10406_v22 = vld [vmem:[#allocation2 + $0xb0] sm:$0xf] }
 0x2e6   : > { %v4777_v40 = vsel %vm11889_vm9, %v11888_v59, %v11278_v8  ;;  %v2111_v3 = vsel %vm6736_vm7, %v10344_v39, %v1967_v23  ;;  %v2112_v25 = vsel %vm6736_vm7, %v10288_v36, %v1976_v55  ;;  %v10408_v33 = vpop.f32.mrb[66].mxu1  ;;  %v1986_v23 = vrot.slane %v10388_v19, 4  ;;  %v10414_v15 = vld [vmem:[#allocation2 + $0xb4] sm:$0xf] }
 0x2e7   : > { %11890 = vst [vmem:[#allocation64_spill] sm:$0xff] %v10408_v33  ;;  %6089 = vmatmul.mubr.bf16.gmra.mrb[100].mxu0 %v4777_v40  ;;  %v2421_v49 = vshrl.u32 %v2111_v3, 16  ;;  %v2424_v50 = vshll.u32 %v2111_v3, 16  ;;  %v2430_v62 = vshrl.u32 %v2112_v25, 16  ;;  %v2433_v41 = vshll.u32 %v2112_v25, 16  ;;  %v5959_v1 = vpop.f32.mrb[67].mxu1 }
 0x2e8   : > { %6092 = vmatprep.mubr.msk.bf16.mxu0 %vm11588_vm0, %v11587_v47  ;;  %v1993_v59 = vor.u32 %v1991_v13, %v1990_v61  ;;  %v1995_v8 = vrot.slane %v1990_v61, 4  ;;  %v3449_v55 = vshrl.u32 %v10393_v29, 16  ;;  %v10416_v7 = vpop.f32.mrb[68].mxu1  ;;  %v5508_v25 = vcombine.low %v10406_v22, %v10414_v15 }
 0x2e9   : > { %11891 = vst [vmem:[#allocation65_spill] sm:$0xff] %v10416_v7  ;;  %v2423_v33 = vrot.slane %v2421_v49, 7  ;;  %v10418_v40 = vrot.slane %v2430_v62, 7  ;;  %v5962_v1 = vpop.f32.mrb[69].mxu1  ;;  %v3452_v7 = vshll.u32 %v10393_v29, 16 }
 0x2ea   : > { %v1994_v13 = vsel %vm6716_vm6, %v1986_v23, %v1993_v59  ;;  %v2003_v61 = vsel %vm6716_vm6, %v1995_v8, %v10306_v18  ;;  %v10430_v49 = vpop.f32.mrb[70].mxu1  ;;  %v10444_v29 = vrot.slane %v3449_v55, 7 }
 0x2eb   : > { %11892 = vst [vmem:[#allocation66_spill] sm:$0xff] %v10430_v49  ;;  %v2426_v62 = vor.u32 %v2424_v50, %v2423_v33  ;;  %v2428_v42 = vrot.slane %v2423_v33, 4  ;;  %v2435_v3 = vor.u32 %v2433_v41, %v10418_v40  ;;  %v10438_v1 = vsel %vm6736_vm7, %v10433_v9, %v1994_v13  ;;  %v5963_v23 = vpop.f32.mrb[71].mxu1 }
 0x2ec   : > { %v2115_v18 = vsel %vm6736_vm7, %v9857_v5, %v2003_v61  ;;  %v2448_v8 = vshrl.u32 %v10438_v1, 16  ;;  %v4357_v50 = vshrl.u32 %v5508_v25, 16  ;;  %v10446_v33 = vpop.f32.mrb[72].mxu1 }
 0x2ed   : > { %11893 = vst [vmem:[#allocation67_spill] sm:$0xff] %v10446_v33  ;;  %v2427_v41 = vsel %vm6716_vm6, %v2419_v60, %v2426_v62  ;;  %v2436_v59 = vsel %vm6716_vm6, %v2428_v42, %v2435_v3  ;;  %v2457_v13 = vshrl.u32 %v2115_v18, 16  ;;  %v2460_v10 = vshll.u32 %v2115_v18, 16  ;;  %v5966_v23 = vpop.f32.mrb[73].mxu1  ;;  %v6264_v60 = vld [vmem:[%s11103_s6 + $0x18] sm:$0xff]  }
 0x2ee   : > { %v2575_v61 = vsel %vm11734_vm13, %v10344_v39, %v2427_v41  ;;  %v2576_v55 = vsel %vm11734_vm13, %v10288_v36, %v2436_v59  ;;  %v10458_v49 = vrot.slane %v2448_v8, 7  ;;  %v4359_v33 = vrot.slane %v4357_v50, 1  ;;  %v10460_v12 = vpop.f32.mrb[74].mxu1  ;;  %v10465_v42 = vld [vmem:[#allocation2 + $0x90] sm:$0xf]  ;;  %6123 = vmatpush3.bf16.msra.mxu1 %v6264_v60 }
 0x2ef   : > { %11894 = vst [vmem:[#allocation68_spill] sm:$0xff] %v10460_v12  ;;  %v2625_v3 = vsel %vm11740_vm10, %v10465_v42, %v2575_v61  ;;  %v2626_v39 = vsel %vm11740_vm10, %v10433_v9, %v2576_v55  ;;  %v2459_v36 = vrot.slane %v2457_v13, 7  ;;  %v4360_v62 = vshll.u32 %v5508_v25, 16  ;;  %v5967_v18 = vpop.f32.mrb[75].mxu1  ;;  %6124 = vmatprep.subr.bf16.mxu1 %v11587_v47 }
 0x2f0   : > { %v2932_v8 = vshrl.u32 %v2625_v3, 16  ;;  %v2935_v50 = vshll.u32 %v2625_v3, 16  ;;  %v2941_v41 = vshrl.u32 %v2626_v39, 16  ;;  %v2944_v59 = vshll.u32 %v2626_v39, 16  ;;  %v10489_v39 = vpop.f32.mrb[64].mxu0 }
 0x2f1   : > { %v2455_v23 = vrot.slane %v10458_v49, 4  ;;  %v2462_v12 = vor.u32 %v2460_v10, %v2459_v36  ;;  %v2464_v48 = vrot.slane %v2459_v36, 4  ;;  %v4362_v17 = vrot.slane %v4360_v62, 2 }
 0x2f2   : > { %v2934_v61 = vrot.slane %v2932_v8, 7  ;;  %v10475_v11 = vrot.slane %v2941_v41, 7  ;;  %v1977_v55 = vrot.slane %v10364_v52, 4  ;;  %v1982_v25 = vshll.u32 %v10465_v42, 16  ;;  %v10495_v8 = vpop.f32.mrb[76].mxu1 }
 0x2f3   : > { %v2463_v13 = vsel %vm6716_vm6, %v2455_v23, %v2462_v12  ;;  %v2472_v60 = vsel %vm6716_vm6, %v2464_v48, %v10309_v0  ;;  %v10485_v10 = vor.u32 %v3452_v7, %v10444_v29  ;;  %v10487_v3 = vor.u32 %v4362_v17, %v4359_v33  ;;  %v6054_v12 = vpop.f32.mrb[65].mxu0  ;;  %11895 = vst [vmem:[#allocation69_spill] sm:$0xff] %v10495_v8 }
 0x2f4   : > { %v2937_v36 = vor.u32 %v2935_v50, %v2934_v61  ;;  %v2939_v62 = vrot.slane %v2934_v61, 4  ;;  %v2946_v52 = vor.u32 %v2944_v59, %v10475_v11  ;;  %v2579_v18 = vsel %vm11734_vm13, %v9857_v5, %v2463_v13  ;;  %v10509_v33 = vpop.f32.mrb[66].mxu0  ;;  %v5970_v5 = vpop.f32.mrb[77].mxu1 }
 0x2f5   : > { %v2580_v0 = vsel %vm11734_vm13, %v9863_v44, %v2472_v60  ;;  %v10503_v17 = vsel %vm11740_vm10, %v9996_v27, %v2579_v18  ;;  %v4364_v48 = vsel %vm11896_vm3, %v10338_v26, %v10487_v3  ;;  %v1984_v7 = vor.u32 %v1982_v25, %v10388_v19  ;;  %v6055_v26 = vpop.f32.mrb[67].mxu0  ;;  %v10521_v19 = vpop.f32.mrb[78].mxu1  ;;  %vm11919_vm3 = vmmov %vm11866_vm5 }
 0x2f6   : > { %v11897_v50 = vrot.slane %v10180_v28, 4  ;;  %v2947_v44 = vsel %vm6716_vm6, %v2939_v62, %v2946_v52  ;;  %v2630_v27 = vsel %vm11740_vm10, %v10002_v45, %v2580_v0  ;;  %v2968_v59 = vshrl.u32 %v10503_v17, 16  ;;  %6005 = vmatmul.mubr.bf16.gmra.mrb[112].mxu1 %v4364_v48  ;;  %11898 = vst [vmem:[#allocation70_spill] sm:$0xff] %v10521_v19  ;;  %v5971_v13 = vpop.f32.mrb[79].mxu1 }
 0x2f7   : > { %v3085_v23 = vsel %vm11769_vm1, %v10433_v9, %v2947_v44  ;;  %v2977_v61 = vshrl.u32 %v2630_v27, 16  ;;  %v2980_v25 = vshll.u32 %v2630_v27, 16  ;;  %6008 = vmatprep.mubr.msk.bf16.mxu1 %vm11588_vm0, %v11587_v47  ;;  %v1985_v0 = vsel %vm6716_vm6, %v1977_v55, %v1984_v7 }
 0x2f8   : > { %v2938_v41 = vsel %vm6716_vm6, %v11897_v50, %v2937_v36  ;;  %v3395_v62 = vshrl.u32 %v3085_v23, 16  ;;  %v3398_v52 = vshll.u32 %v3085_v23, 16  ;;  %v10531_v18 = vrot.slane %v2968_v59, 7 }
 0x2f9   : > { %v3084_v28 = vsel %vm11769_vm1, %v10465_v42, %v2938_v41  ;;  %v2979_v12 = vrot.slane %v2977_v61, 7  ;;  %v2451_v48 = vshll.u32 %v10438_v1, 16  ;;  %v2113_v41 = vsel %vm6736_vm7, %v10465_v42, %v1985_v0 }
 0x2fa   : > { %v3386_v60 = vshrl.u32 %v3084_v28, 16  ;;  %v3389_v36 = vshll.u32 %v3084_v28, 16  ;;  %v10536_v50 = vrot.slane %v3395_v62, 7  ;;  %v2437_v44 = vrot.slane %v10418_v40, 4 }
 0x2fb   : > { %v2975_v27 = vrot.slane %v10531_v18, 4  ;;  %v2982_v26 = vor.u32 %v2980_v25, %v2979_v12  ;;  %v2984_v59 = vrot.slane %v2979_v12, 4  ;;  %v2439_v28 = vshrl.u32 %v2113_v41, 16 }
 0x2fc   : > { %v3388_v5 = vrot.slane %v3386_v60, 7  ;;  %v3400_v55 = vor.u32 %v3398_v52, %v10536_v50  ;;  %v2442_v7 = vshll.u32 %v2113_v41, 16  ;;  %v2453_v40 = vor.u32 %v2451_v48, %v10458_v49  ;;  %v10571_v48 = vld [vmem:[#allocation2 + $0xb8] ss:$0 sps:$4 sm:$0xff]   ;;  %v10578_v41 = vld [vmem:[#allocation2 + $0x9c] sm:$0xf] }
 0x2fd   : > { %v2983_v1 = vsel %vm6716_vm6, %v2975_v27, %v2982_v26  ;;  %v2992_v13 = vsel %vm6716_vm6, %v2984_v59, %v10362_v37  ;;  %v2441_v60 = vrot.slane %v2439_v28, 7  ;;  %v11899_v62 = vrot.slane %v10254_v51, 4 }
 0x2fe   : > { %v3391_v23 = vor.u32 %v3389_v36, %v3388_v5  ;;  %v3393_v61 = vrot.slane %v3388_v5, 4  ;;  %v10559_v52 = vsel %vm11769_vm1, %v10002_v45, %v2983_v1  ;;  %v3090_v37 = vsel %vm11769_vm1, %v10233_v58, %v2992_v13  ;;  %v10573_v5 = vld [vmem:[#allocation2 + $0x98] sm:$0xf] }
 0x2ff   : > { %v3431_v12 = vshrl.u32 %v10559_v52, 16  ;;  %v3440_v0 = vshrl.u32 %v3090_v37, 16  ;;  %v3443_v26 = vshll.u32 %v3090_v37, 16  ;;  %v2444_v59 = vor.u32 %v2442_v7, %v2441_v60 }
 0x300   : > { %v3392_v25 = vsel %vm6716_vm6, %v11899_v62, %v3391_v23  ;;  %v3401_v36 = vsel %vm6716_vm6, %v3393_v61, %v3400_v55  ;;  %v4366_v7 = vshrl.u32 %v10571_v48, 16 }
 0x301   : > { %v3538_v49 = vsel %vm11782_vm2, %v10465_v42, %v3392_v25  ;;  %v3539_v51 = vsel %vm11782_vm2, %v10433_v9, %v3401_v36  ;;  %v10583_v1 = vrot.slane %v3431_v12, 7  ;;  %v3442_v13 = vrot.slane %v3440_v0, 7 }
 0x302   : > { %v3586_v45 = vsel %vm11788_vm14, %v10573_v5, %v3538_v49  ;;  %v3587_v27 = vsel %vm11788_vm14, %v10578_v41, %v3539_v51  ;;  %v2445_v62 = vsel %vm6716_vm6, %v2437_v44, %v2444_v59  ;;  %v2446_v25 = vrot.slane %v2441_v60, 4  ;;  %v10600_v59 = vpop.f32.mrb[68].mxu0 }
 0x303   : > { %v3888_v28 = vshrl.u32 %v3586_v45, 16  ;;  %v3891_v23 = vshll.u32 %v3586_v45, 16  ;;  %v3897_v61 = vshrl.u32 %v3587_v27, 16  ;;  %v3900_v55 = vshll.u32 %v3587_v27, 16 }
 0x304   : > { %v2577_v51 = vsel %vm11734_vm13, %v10465_v42, %v2445_v62  ;;  %v3438_v37 = vrot.slane %v10583_v1, 4  ;;  %v3445_v45 = vor.u32 %v3443_v26, %v3442_v13  ;;  %v3447_v27 = vrot.slane %v3442_v13, 4 }
 0x305   : > { %v3890_v36 = vrot.slane %v3888_v28, 7  ;;  %v10587_v49 = vrot.slane %v3897_v61, 7  ;;  %v2454_v12 = vsel %vm6716_vm6, %v2446_v25, %v2453_v40  ;;  %v2627_v40 = vsel %vm11740_vm10, %v10573_v5, %v2577_v51 }
 0x306   : > { %v2578_v60 = vsel %vm11734_vm13, %v10433_v9, %v2454_v12  ;;  %v3446_v42 = vsel %vm6716_vm6, %v3438_v37, %v3445_v45  ;;  %v3455_v26 = vsel %vm6716_vm6, %v3447_v27, %v10485_v10  ;;  %v11900_v9 = vrot.slane %v10321_v24, 4  ;;  %v10639_v37 = vpop.f32.mrb[80].mxu1 }
 0x307   : > { %v3893_v0 = vor.u32 %v3891_v23, %v3890_v36  ;;  %v3895_v19 = vrot.slane %v3890_v36, 4  ;;  %v3902_v44 = vor.u32 %v3900_v55, %v10587_v49  ;;  %v2628_v28 = vsel %vm11740_vm10, %v10578_v41, %v2578_v60  ;;  %v6058_v23 = vpop.f32.mrb[69].mxu0  ;;  %11901 = vst [vmem:[#allocation71_spill] sm:$0xff] %v10639_v37 }
 0x308   : > { %v3544_v10 = vsel %vm11782_vm2, %v10233_v58, %v3446_v42  ;;  %v3545_v13 = vsel %vm11782_vm2, %v10235_v14, %v3455_v26  ;;  %v10625_v62 = vpop.f32.mrb[70].mxu0  ;;  %v2950_v60 = vshrl.u32 %v2627_v40, 16  ;;  %v2953_v42 = vshll.u32 %v2627_v40, 16 }
 0x309   : > { %v3894_v61 = vsel %vm6716_vm6, %v11900_v9, %v3893_v0  ;;  %v3903_v55 = vsel %vm6716_vm6, %v3895_v19, %v3902_v44  ;;  %v3592_v19 = vsel %vm11788_vm14, %v10406_v22, %v3544_v10  ;;  %v3593_v36 = vsel %vm11788_vm14, %v10414_v15, %v3545_v13  ;;  %v6059_v51 = vpop.f32.mrb[71].mxu0  ;;  %v5974_v44 = vpop.f32.mrb[81].mxu1 }
 0x30a   : > { %v4040_v24 = vsel %vm8092_vm15, %v10573_v5, %v3894_v61  ;;  %v4041_v25 = vsel %vm8092_vm15, %v10578_v41, %v3903_v55  ;;  %v3942_v27 = vshrl.u32 %v3592_v19, 16  ;;  %v3951_v12 = vshrl.u32 %v3593_v36, 16  ;;  %v10645_v9 = vpop.f32.mrb[82].mxu1 }
 0x30b   : > { %v10641_v45 = vcombine.low %v4040_v24, %v4041_v25  ;;  %v2948_v0 = vrot.slane %v10475_v11, 4  ;;  %v2959_v26 = vshrl.u32 %v2628_v28, 16  ;;  %v3402_v23 = vrot.slane %v10536_v50, 4  ;;  %11902 = vst [vmem:[#allocation72_spill] sm:$0xff] %v10645_v9  ;;  %v5975_v51 = vpop.f32.mrb[83].mxu1 }
 0x30c   : > { %v3945_v55 = vshll.u32 %v3592_v19, 16  ;;  %v2962_v10 = vshll.u32 %v2628_v28, 16  ;;  %v4368_v13 = vrot.slane %v4366_v7, 1  ;;  %v2952_v24 = vrot.slane %v2950_v60, 7 }
 0x30d   : > { %v4778_v61 = vrot.slane %v10641_v45, 1  ;;  %v2961_v25 = vrot.slane %v2959_v26, 7  ;;  %v4369_v37 = vshll.u32 %v10571_v48, 16  ;;  %v2971_v11 = vshll.u32 %v10503_v17, 16 }
 0x30e   : > { %v11903_v40 = vrot.slane %v10366_v21, 1  ;;  %v3954_v44 = vshll.u32 %v3593_v36, 16  ;;  %v3944_v9 = vrot.slane %v3942_v27, 7  ;;  %v10655_v8 = vrot.slane %v3951_v12, 7 }
 0x30f   : > { %v2955_v28 = vor.u32 %v2953_v42, %v2952_v24  ;;  %v2957_v7 = vrot.slane %v2952_v24, 4  ;;  %v2964_v19 = vor.u32 %v2962_v10, %v2961_v25  ;;  %v4371_v60 = vrot.slane %v4369_v37, 2 }
 0x310   : > { %v4779_v50 = vsel %vm11866_vm5, %v11903_v40, %v4778_v61  ;;  %v3904_v17 = vrot.slane %v10587_v49, 4  ;;  %v2966_v48 = vrot.slane %v2961_v25, 4  ;;  %v2973_v26 = vor.u32 %v2971_v11, %v10531_v18  ;;  %v10677_v11 = vld [vmem:[#allocation2 + $0xa0] sm:$0xf] }
 0x311   : > { %6093 = vmatmul.mubr.bf16.gmra.mrb[104].mxu0 %v4779_v50  ;;  %v3434_v21 = vshll.u32 %v10559_v52, 16  ;;  %v2956_v36 = vsel %vm6716_vm6, %v2948_v0, %v2955_v28  ;;  %v2965_v27 = vsel %vm6716_vm6, %v2957_v7, %v2964_v19  ;;  %v4372_v12 = vor.u32 %v4371_v60, %v4368_v13 }
 0x312   : > { %6096 = vmatprep.mubr.msk.bf16.mxu0 %vm11588_vm0, %v11587_v47  ;;  %v3949_v42 = vrot.slane %v3944_v9, 4  ;;  %v3086_v37 = vsel %vm11769_vm1, %v10573_v5, %v2956_v36  ;;  %v3087_v10 = vsel %vm11769_vm1, %v10578_v41, %v2965_v27  ;;  %v2974_v18 = vsel %vm6716_vm6, %v2966_v48, %v2973_v26 }
 0x313   : > { %v3956_v52 = vor.u32 %v3954_v44, %v10655_v8  ;;  %v3404_v51 = vshrl.u32 %v3086_v37, 16  ;;  %v3407_v0 = vshll.u32 %v3086_v37, 16  ;;  %v3413_v24 = vshrl.u32 %v3087_v10, 16 }
 0x314   : > { %v3416_v25 = vshll.u32 %v3087_v10, 16  ;;  %v4373_v13 = vsel %vm11904_vm11, %v10487_v3, %v4372_v12  ;;  %v3088_v40 = vsel %vm11769_vm1, %v10677_v11, %v2974_v18  ;;  %v2031_v28 = vrot.slane %v10205_v16, 4 }
 0x315   : > { %v10684_v50 = vsel %vm6716_vm6, %v3949_v42, %v3956_v52  ;;  %v3406_v44 = vrot.slane %v3404_v51, 7  ;;  %v3415_v7 = vrot.slane %v3413_v24, 7  ;;  %6009 = vmatmul.mubr.bf16.gmra.mrb[116].mxu1 %v4373_v13  ;;  %v3422_v19 = vshrl.u32 %v3088_v40, 16 }
 0x316   : > { %v3436_v60 = vor.u32 %v3434_v21, %v10583_v1  ;;  %v3425_v48 = vshll.u32 %v3088_v40, 16  ;;  %v10688_v3 = vor.u32 %v3945_v55, %v3944_v9  ;;  %v4047_v26 = vsel %vm8092_vm15, %v10414_v15, %v10684_v50  ;;  %6012 = vmatprep.mubr.msk.bf16.mxu1 %vm11588_vm0, %v11587_v47 }
 0x317   : > { %v11905_v36 = vshll.u32 %v10059_v34, 16  ;;  %v3409_v16 = vor.u32 %v3407_v0, %v3406_v44  ;;  %v3411_v42 = vrot.slane %v3406_v44, 4  ;;  %v3418_v37 = vor.u32 %v3416_v25, %v3415_v7  ;;  %v10718_v25 = vld [vmem:[%s11102_s5] ss:$0 sm:$0xff] }
 0x318   : > { %v2491_v1 = vrot.slane %v10282_v6, 4  ;;  %v3420_v9 = vrot.slane %v3415_v7, 4  ;;  %v3424_v55 = vrot.slane %v3422_v19, 7  ;;  %v3002_v10 = vrot.slane %v10352_v46, 4 }
 0x319   : > { %v2035_v27 = vsel %vm6716_vm6, %v2031_v28, %v11905_v36  ;;  %v3410_v18 = vsel %vm6716_vm6, %v3402_v23, %v3409_v16  ;;  %v3419_v52 = vsel %vm6716_vm6, %v3411_v42, %v3418_v37  ;;  %v6265_v23 = vld [vmem:[%s11103_s6 + $0x20] sm:$0xff]   ;;  %v4892_v28 = vadd.f32 %v10192_v20, %v10190_v53 }
 0x31a   : > { %v2119_v21 = vsel %vm6736_vm7, %v10059_v34, %v2035_v27  ;;  %v3540_v6 = vsel %vm11782_vm2, %v10573_v5, %v3410_v18  ;;  %v3541_v24 = vsel %vm11782_vm2, %v10578_v41, %v3419_v52  ;;  %v3427_v31 = vor.u32 %v3425_v48, %v3424_v55  ;;  %v6296_v5 = vld [vmem:[#allocation2 + $0xa4] sm:$0xf]  ;;  %6125 = vmatpush3.bf16.msra.mxu1 %v6265_v23  ;;  %vm11906_vm7 = vmmov %vm11866_vm5 }
 0x31b   : > { %v2493_v51 = vshrl.u32 %v2119_v21, 16  ;;  %v2496_v0 = vshll.u32 %v2119_v21, 16  ;;  %v3429_v34 = vrot.slane %v3424_v55, 4  ;;  %v3588_v13 = vsel %vm11788_vm14, %v10677_v11, %v3540_v6  ;;  %6126 = vmatprep.subr.bf16.mxu1 %v11587_v47  ;;  %v10754_v6 = vld [vmem:[#allocation2 + $0xb0] sm:$0x3] }
 0x31c   : > { %v3589_v40 = vsel %vm11788_vm14, %v6296_v5, %v3541_v24  ;;  %v3906_v44 = vshrl.u32 %v3588_v13, 16  ;;  %v3909_v7 = vshll.u32 %v3588_v13, 16  ;;  %v3428_v36 = vsel %vm6716_vm6, %v3420_v9, %v3427_v31  ;;  %v2123_v9 = vld [vmem:[#allocation2 + $0xa8] sm:$0x3] }
 0x31d   : > { %v2495_v41 = vrot.slane %v2493_v51, 7  ;;  %v3915_v19 = vshrl.u32 %v3589_v40, 16  ;;  %v3918_v48 = vshll.u32 %v3589_v40, 16  ;;  %v3437_v27 = vsel %vm6716_vm6, %v3429_v34, %v3436_v60  ;;  %6013 = vmatmul.mubr.bf16.gmra.mrb[120].mxu1 %v4372_v12 }
 0x31e   : > { %v10735_v42 = vadd.f32 %v10718_v25, %v4892_v28  ;;  %v3908_v37 = vrot.slane %v3906_v44, 7  ;;  %v3542_v53 = vsel %vm11782_vm2, %v10677_v11, %v3428_v36  ;;  %v3543_v20 = vsel %vm11782_vm2, %v6296_v5, %v3437_v27  ;;  %6132 = vmatprep.mubr.msk.bf16.mxu1 %vm11588_vm0, %v11587_v47 }
 0x31f   : > { %v2498_v16 = vor.u32 %v2496_v0, %v2495_v41  ;;  %v3917_v55 = vrot.slane %v3915_v19, 7  ;;  %v3590_v12 = vsel %vm11788_vm14, %v10233_v58, %v3542_v53  ;;  %v3591_v60 = vsel %vm11788_vm14, %v10235_v14, %v3543_v20  ;;  %v10757_v40 = vpop.f32.mrb[84].mxu1 }
 0x320   : > { %v3456_v18 = vrot.slane %v10444_v29, 4  ;;  %v3911_v52 = vor.u32 %v3909_v7, %v3908_v37  ;;  %v3913_v51 = vrot.slane %v3908_v37, 4  ;;  %v5105_v24 = vmax.f32 %v10735_v42, 0.0  ;;  %v5978_v7 = vpop.f32.mrb[85].mxu1 }
 0x321   : > { %v2499_v21 = vsel %vm6716_vm6, %v2491_v1, %v2498_v16  ;;  %v3920_v0 = vor.u32 %v3918_v48, %v3917_v55  ;;  %v3924_v31 = vshrl.u32 %v3590_v12, 16  ;;  %v3927_v34 = vshll.u32 %v3590_v12, 16  ;;  %v10772_v27 = vpop.f32.mrb[86].mxu1  ;;  %v11911_v7 = vld [vmem:[#allocation51_spill] sm:$0xff] }
 0x322   : > { %v3933_v23 = vshrl.u32 %v3591_v60, 16  ;;  %v3936_v13 = vshll.u32 %v3591_v60, 16  ;;  %v3912_v1 = vsel %vm6716_vm6, %v3904_v17, %v3911_v52  ;;  %v3922_v28 = vrot.slane %v3917_v55, 4  ;;  %v5979_v37 = vpop.f32.mrb[87].mxu1 }
 0x323   : > { %v3921_v41 = vsel %vm6716_vm6, %v3913_v51, %v3920_v0  ;;  %v2583_v44 = vsel %vm11734_vm13, %v2123_v9, %v2499_v21  ;;  %v4042_v19 = vsel %vm8092_vm15, %v10677_v11, %v3912_v1  ;;  %v3926_v36 = vrot.slane %v3924_v31, 7 }
 0x324   : > { %v4043_v48 = vsel %vm8092_vm15, %v6296_v5, %v3921_v41  ;;  %v3935_v49 = vrot.slane %v3933_v23, 7  ;;  %v2633_v16 = vsel %vm11740_vm10, %v10754_v6, %v2583_v44  ;;  %v4900_v42 = vadd.f32 %v10239_v30, %v10237_v4  ;;  %v10782_v21 = vpop.f32.mrb[72].mxu0  ;;  %v11909_v41 = vld [vmem:[#allocation46_spill] sm:$0xff] }
 0x325   : > { %v5535_v17 = vcombine.low %v4042_v19, %v4043_v48  ;;  %v3929_v11 = vor.u32 %v3927_v34, %v3926_v36  ;;  %v3931_v55 = vrot.slane %v3926_v36, 4  ;;  %v3004_v12 = vshrl.u32 %v2633_v16, 16  ;;  %v6062_v30 = vpop.f32.mrb[73].mxu0  ;;  %v11912_v19 = vld [vmem:[#allocation6_spill] sm:$0xff] }
 0x326   : > { %v3938_v53 = vor.u32 %v3936_v13, %v3935_v49  ;;  %v3940_v5 = vrot.slane %v3935_v49, 4  ;;  %v3007_v60 = vshll.u32 %v2633_v16, 16  ;;  %v5065_v9 = vadd.f32 %v10718_v25, %v4895_v32  ;;  %v11908_v13 = vld [vmem:[#allocation49_spill] sm:$0xff]  ;;  %v11915_v49 = vld [vmem:[#allocation30_spill] sm:$0xff] }
 0x327   : > { %v4780_v20 = vrot.slane %v5535_v17, 1  ;;  %v3930_v63 = vsel %vm6716_vm6, %v3922_v28, %v3929_v11  ;;  %v5066_v4 = vadd.f32 %v10718_v25, %v4900_v42  ;;  %v11910_v28 = vld [vmem:[#allocation36_spill] sm:$0xff]  ;;  %v4911_v48 = vadd.f32 %v11912_v19, %v11911_v7  ;;  %v11917_v32 = vld [vmem:[#allocation34_spill] sm:$0xff] }
 0x328   : > { %v3939_v38 = vsel %vm6716_vm6, %v3931_v55, %v3938_v53  ;;  %v3948_v2 = vsel %vm6716_vm6, %v3940_v5, %v10688_v3  ;;  %v4044_v51 = vsel %vm8092_vm15, %v10233_v58, %v3930_v63  ;;  %v10804_v3 = vpop.f32.mrb[74].mxu0  ;;  %v3006_v58 = vrot.slane %v3004_v12, 7  ;;  %v11921_v30 = vld [vmem:[#allocation54_spill] sm:$0xff]  ;;  %v11933_v7 = vld [vmem:[#allocation60_spill] sm:$0xff] }
 0x329   : > { %v4781_v52 = vsel %vm11906_vm7, %v4778_v61, %v4780_v20  ;;  %v4045_v0 = vsel %vm8092_vm15, %v10235_v14, %v3939_v38  ;;  %v4046_v31 = vsel %vm8092_vm15, %v10406_v22, %v3948_v2  ;;  %v5106_v61 = vmax.f32 %v5065_v9, 0.0  ;;  %v6063_v23 = vpop.f32.mrb[75].mxu0  ;;  %v11907_v22 = vld [vmem:[#allocation47_spill] sm:$0xff] }
 0x32a   : > { %6097 = vmatmul.mubr.bf16.gmra.mrb[108].mxu0 %v4781_v52  ;;  %v10806_v34 = vcombine.low %v4044_v51, %v4045_v0  ;;  %v10813_v45 = vcombine.low %v4046_v31, %v4047_v26  ;;  %v5107_v14 = vmax.f32 %v5066_v4, 0.0  ;;  %v4903_v1 = vadd.f32 %v11908_v13, %v11907_v22  ;;  %v11913_v26 = vld [vmem:[#allocation29_spill] sm:$0xff]  ;;  %v11924_v0 = vld [vmem:[#allocation42_spill] sm:$0xff]  ;;  %v11926_v31 = vld [vmem:[#allocation55_spill] sm:$0xff] }
 0x32b   : > { %6100 = vmatprep.mubr.msk.bf16.mxu0 %vm11588_vm0, %v11587_v47  ;;  %v4908_v44 = vadd.f32 %v11910_v28, %v11909_v41  ;;  %v3009_v50 = vor.u32 %v3007_v60, %v3006_v58  ;;  %vm11914_vm10 = vnez %v11913_v26  ;;  %vm11916_vm13 = vnez %v11915_v49  ;;  %v11922_v51 = vld [vmem:[#allocation37_spill] sm:$0xff]  ;;  %v3096_v26 = vld [vmem:[#allocation2 + $0xb0] sm:$0x7] }
 0x32c   : > { %v4782_v15 = vrot.slane %v10806_v34, 1  ;;  %v5146_v36 = vsel %vm11914_vm10, %v5105_v24, 0.0  ;;  %v5147_v17 = vsel %vm11916_vm13, %v5106_v61, 0.0  ;;  %vm11918_vm9 = vnez %v11917_v32  ;;  %v11927_v34 = vld [vmem:[#allocation56_spill] sm:$0xff]  ;;  %v11930_v22 = vld [vmem:[#allocation13_spill] sm:$0xff]  ;;  %vm11940_vm13 = vmmov %vm11919_vm3 }
 0x32d   : > { %v5187_v16 = vadd.f32 %v5147_v17, %v5146_v36  ;;  %v5148_v42 = vsel %vm11918_vm9, %v5107_v14, 0.0  ;;  %v5067_v37 = vadd.f32 %v10718_v25, %v4903_v1  ;;  %v5068_v11 = vadd.f32 %v10718_v25, %v4908_v44  ;;  %v11932_v44 = vld [vmem:[#allocation59_spill] sm:$0xff] }
 0x32e   : > { %v4783_v55 = vsel %vm11919_vm3, %v4780_v20, %v4782_v15  ;;  %v4784_v53 = vrot.slane %v10813_v45, 1  ;;  %v3010_v24 = vsel %vm6716_vm6, %v3002_v10, %v3009_v50  ;;  %v5069_v5 = vadd.f32 %v10718_v25, %v4911_v48  ;;  %v11920_v20 = vld [vmem:[#allocation53_spill] sm:$0xff] }
 0x32f   : > { %v3092_v12 = vsel %vm11769_vm1, %v10754_v6, %v3010_v24  ;;  %v5188_v60 = vadd.f32 %v5187_v16, %v5148_v42  ;;  %v5108_v9 = vmax.f32 %v5067_v37, 0.0  ;;  %v5109_v63 = vmax.f32 %v5068_v11, 0.0  ;;  %v11929_v6 = vld [vmem:[#allocation58_spill] sm:$0xff]  ;;  %v11934_v48 = vld [vmem:[#allocation61_spill] sm:$0xff]  ;;  %v3552_v42 = vld [vmem:[#allocation2 + $0xb8] sm:$0x7] }
 0x330   : > { %v3458_v38 = vshrl.u32 %v3092_v12, 16  ;;  %v3461_v2 = vshll.u32 %v3092_v12, 16  ;;  %v5110_v4 = vmax.f32 %v5069_v5, 0.0  ;;  %v4916_v52 = vadd.f32 %v11921_v30, %v11920_v20  ;;  %v11935_v16 = vld [vmem:[#allocation62_spill] sm:$0xff]  ;;  %v11936_v12 = vld [vmem:[#allocation21_spill] sm:$0xff] }
 0x331   : > { %vm11923_vm5 = vnez %v11922_v51  ;;  %vm11925_vm11 = vnez %v11924_v0  ;;  %v4919_v58 = vadd.f32 %v11927_v34, %v11926_v31  ;;  %v4924_v61 = vadd.f32 %v11929_v6, %v11928_v57  ;;  %v11941_v51 = vld [vmem:[#allocation16_spill] sm:$0xff]  ;;  %v11943_v31 = vld [vmem:[#allocation63_spill] sm:$0xff]  ;;  %v11944_v6 = vld [vmem:[#allocation17_spill] sm:$0xff] }
 0x332   : > { %v5149_v46 = vsel %vm11923_vm5, %v5108_v9, 0.0  ;;  %v5150_v10 = vsel %vm11925_vm11, %v5109_v63, 0.0  ;;  %6101 = vmatmul.mubr.bf16.gmra.mrb[112].mxu0 %v4783_v55  ;;  %v3460_v23 = vrot.slane %v3458_v38, 7  ;;  %vm11931_vm1 = vnez %v11930_v22  ;;  %v10874_v63 = vpop.f32.mrb[88].mxu1 }
 0x333   : > { %v5189_v14 = vadd.f32 %v5188_v60, %v5149_v46  ;;  %v5151_v13 = vsel %vm11931_vm1, %v5110_v4, 0.0  ;;  %v5070_v1 = vadd.f32 %v10718_v25, %v4916_v52  ;;  %6104 = vmatprep.mubr.msk.bf16.mxu0 %vm11588_vm0, %v11587_v47  ;;  %v5071_v41 = vadd.f32 %v10718_v25, %v4919_v58  ;;  %v5982_v20 = vpop.f32.mrb[89].mxu1 }
 0x334   : > { %v5072_v28 = vadd.f32 %v10718_v25, %v4924_v61  ;;  %v4927_v19 = vadd.f32 %v11933_v7, %v11932_v44  ;;  %v4932_v50 = vadd.f32 %v10489_v39, %v11934_v48  ;;  %v3463_v36 = vor.u32 %v3461_v2, %v3460_v23  ;;  %v11938_v2 = vld [vmem:[#allocation7_spill] sm:$0xff]  ;;  %v10888_v35 = vpop.f32.mrb[90].mxu1  ;;  %v11946_v61 = vld [vmem:[#allocation64_spill] sm:$0xff] }
 0x335   : > { %v5190_v49 = vadd.f32 %v5189_v14, %v5150_v10  ;;  %v5111_v17 = vmax.f32 %v5070_v1, 0.0  ;;  %v4935_v32 = vadd.f32 %v10509_v33, %v11935_v16  ;;  %v5112_v37 = vmax.f32 %v5071_v41, 0.0  ;;  %v5983_v58 = vpop.f32.mrb[91].mxu1 }
 0x336   : > { %v5113_v11 = vmax.f32 %v5072_v28, 0.0  ;;  %v5073_v55 = vadd.f32 %v10718_v25, %v4927_v19  ;;  %v5074_v24 = vadd.f32 %v10718_v25, %v4932_v50  ;;  %v3464_v5 = vsel %vm6716_vm6, %v3456_v18, %v3463_v36  ;;  %v11949_v19 = vld [vmem:[#allocation67_spill] sm:$0xff] }
 0x337   : > { %v5191_v39 = vadd.f32 %v5190_v49, %v5151_v13  ;;  %vm11937_vm7 = vnez %v11936_v12  ;;  %v5075_v9 = vadd.f32 %v10718_v25, %v4935_v32  ;;  %v3546_v33 = vsel %vm11782_vm2, %v3096_v26, %v3464_v5  ;;  %v11947_v13 = vld [vmem:[#allocation65_spill] sm:$0xff]  ;;  %v11950_v26 = vld [vmem:[#allocation23_spill] sm:$0xff] }
 0x338   : > { %v5152_v60 = vsel %vm11937_vm7, %v5111_v17, 0.0  ;;  %v3958_v38 = vrot.slane %v10655_v8, 4  ;;  %vm11939_vm10 = vnez %v11938_v2  ;;  %v5114_v29 = vmax.f32 %v5073_v55, 0.0  ;;  %v4955_v28 = vpop.f32.mrb[76].mxu0  ;;  %v11953_v55 = vld [vmem:[#allocation48_spill] sm:$0xff] }
 0x339   : > { %v5153_v4 = vsel %vm11939_vm10, %v5112_v37, 0.0  ;;  %v4785_v18 = vsel %vm11940_vm13, %v4782_v15, %v4784_v53  ;;  %v3594_v30 = vsel %vm11788_vm14, %v3552_v42, %v3546_v33  ;;  %v5192_v52 = vadd.f32 %v5191_v39, %v5152_v60  ;;  %v6066_v50 = vpop.f32.mrb[77].mxu0  ;;  %v11955_v33 = vld [vmem:[#allocation50_spill] sm:$0xff] }
 0x33a   : > { %vm11942_vm9 = vnez %v11941_v51  ;;  %v3960_v0 = vshrl.u32 %v3594_v30, 16  ;;  %v3963_v8 = vshll.u32 %v3594_v30, 16  ;;  %v5115_v10 = vmax.f32 %v5074_v24, 0.0  ;;  %6105 = vmatmul.mubr.bf16.gmra.mrb[116].mxu0 %v4785_v18  ;;  %v4958_v16 = vpop.f32.mrb[78].mxu0 }
 0x33b   : > { %v5154_v46 = vsel %vm11942_vm9, %v5113_v11, 0.0  ;;  %v4940_v34 = vadd.f32 %v10600_v59, %v11943_v31  ;;  %v5193_v57 = vadd.f32 %v5192_v52, %v5153_v4  ;;  %vm11945_vm2 = vnez %v11944_v6  ;;  %6108 = vmatprep.mubr.msk.bf16.mxu0 %vm11588_vm0, %v11587_v47  ;;  %v11948_v59 = vld [vmem:[#allocation66_spill] sm:$0xff]  ;;  %v6067_v11 = vpop.f32.mrb[79].mxu0 }
 0x33c   : > { %v5155_v15 = vsel %vm11945_vm2, %v5114_v29, 0.0  ;;  %v5116_v43 = vmax.f32 %v5075_v9, 0.0  ;;  %v4943_v23 = vadd.f32 %v10625_v62, %v11946_v61  ;;  %v3962_v14 = vrot.slane %v3960_v0, 7  ;;  %v11965_v61 = vld [vmem:[#allocation32_spill] sm:$0xff] }
 0x33d   : > { %v5076_v22 = vadd.f32 %v10718_v25, %v4940_v34  ;;  %v4948_v1 = vadd.f32 %v10782_v21, %v11947_v13  ;;  %v4951_v41 = vadd.f32 %v10804_v3, %v11948_v59  ;;  %v5194_v44 = vadd.f32 %v5193_v57, %v5154_v46  ;;  %v11952_v21 = vld [vmem:[#allocation68_spill] sm:$0xff]  ;;  %v11967_v59 = vld [vmem:[#allocation69_spill] sm:$0xff] }
 0x33e   : > { %v5077_v7 = vadd.f32 %v10718_v25, %v4943_v23  ;;  %v4956_v48 = vadd.f32 %v4955_v28, %v11949_v19  ;;  %v3965_v62 = vor.u32 %v3963_v8, %v3962_v14  ;;  %vm11951_vm14 = vnez %v11950_v26  ;;  %v11968_v19 = vld [vmem:[#allocation70_spill] sm:$0xff] }
 0x33f   : > { %v5156_v36 = vsel %vm11951_vm14, %v5115_v10, 0.0  ;;  %v5117_v49 = vmax.f32 %v5076_v22, 0.0  ;;  %v5078_v17 = vadd.f32 %v10718_v25, %v4948_v1  ;;  %v5195_v32 = vadd.f32 %v5194_v44, %v5155_v15  ;;  %v11962_v10 = vld [vmem:[#allocation25_spill] sm:$0xff] }
 0x340   : > { %v4959_v37 = vadd.f32 %v4958_v16, %v11952_v21  ;;  %v3966_v3 = vsel %vm6716_vm6, %v3958_v38, %v3965_v62  ;;  %vm11954_vm3 = vnez %v11953_v55  ;;  %v5118_v5 = vmax.f32 %v5077_v7, 0.0  ;;  %v11957_v38 = vld [vmem:[#allocation24_spill] sm:$0xff] }
 0x341   : > { %v5157_v24 = vsel %vm11954_vm3, %v5116_v43, 0.0  ;;  %v5079_v39 = vadd.f32 %v10718_v25, %v4951_v41  ;;  %v4048_v12 = vsel %vm8092_vm15, %v3552_v42, %v3966_v3  ;;  %v5196_v60 = vadd.f32 %v5195_v32, %v5156_v36  ;;  %vm11959_vm15 = vmmov %vm11940_vm13  ;;  %v11960_v42 = vld [vmem:[#allocation26_spill] sm:$0xff]  ;;  %v11969_v36 = vld [vmem:[#allocation52_spill] sm:$0xff] }
 0x342   : > { %v5538_v9 = vcombine.low %v4048_v12, %v4048_v12  ;;  %vm11956_vm5 = vnez %v11955_v33  ;;  %v5119_v4 = vmax.f32 %v5078_v17, 0.0  ;;  %v5080_v29 = vadd.f32 %v10718_v25, %v4956_v48  ;;  %v11971_v32 = vld [vmem:[#allocation10_spill] sm:$0xff] }
 0x343   : > { %v5158_v2 = vsel %vm11956_vm5, %v5117_v49, 0.0  ;;  %v5197_v20 = vadd.f32 %v5196_v60, %v5157_v24  ;;  %vm11958_vm6 = vnez %v11957_v38  ;;  %v5120_v30 = vmax.f32 %v5079_v39, 0.0  ;;  %v11973_v39 = vld [vmem:[#allocation71_spill] sm:$0xff] }
 0x344   : > { %v4786_v54 = vrot.slane %v5538_v9, 1  ;;  %v5159_v18 = vsel %vm11958_vm6, %v5118_v5, 0.0  ;;  %v5081_v52 = vadd.f32 %v10718_v25, %v4959_v37  ;;  %vm11961_vm11 = vnez %v11960_v42  ;;  %v10931_v57 = vpop.f32.mrb[92].mxu1  ;;  %v11975_v38 = vld [vmem:[#allocation15_spill] sm:$0xff] }
 0x345   : > { %v5198_v51 = vadd.f32 %v5197_v20, %v5158_v2  ;;  %v5160_v46 = vsel %vm11961_vm11, %v5119_v4, 0.0  ;;  %v5121_v0 = vmax.f32 %v5080_v29, 0.0  ;;  %vm11963_vm1 = vnez %v11962_v10  ;;  %v11974_v2 = vld [vmem:[#allocation72_spill] sm:$0xff] }
 0x346   : > { %v4787_v56 = vsel %vm11959_vm15, %v4784_v53, %v4786_v54  ;;  %v5161_v31 = vsel %vm11963_vm1, %v5120_v30, 0.0  ;;  %v5122_v34 = vmax.f32 %v5081_v52, 0.0  ;;  %v5986_v53 = vpop.f32.mrb[93].mxu1  ;;  %vm11966_vm7 = vnez %v11965_v61  ;;  %v6266_v52 = vld [vmem:[%s11103_s6 + $0x28] sm:$0xff]  }
 0x347   : > { %6109 = vmatmul.mubr.bf16.gmra.mrb[120].mxu0 %v4787_v56  ;;  %v5199_v8 = vadd.f32 %v5198_v51, %v5159_v18  ;;  %v5162_v45 = vsel %vm8158_vm4, %v5121_v0, 0.0  ;;  %v10935_v43 = vpop.f32.mrb[94].mxu1  ;;  %vm11972_vm4 = vnez %v11971_v32  ;;  %vm11976_vm10 = vnez %v11975_v38  ;;  %v11977_v56 = vld [vmem:[#allocation9_spill] sm:$0xff]  ;;  %6127 = vmatpush3.bf16.msra.mxu1 %v6266_v52  ;;  %v11987_v38 = vld [vmem:[#allocation31_spill] sm:$0xff] }
 0x348   : > { %6112 = vmatprep.mubr.msk.bf16.mxu0 %vm11588_vm0, %v11587_v47  ;;  %v5163_v23 = vsel %vm11966_vm7, %v5122_v34, 0.0  ;;  %v5987_v14 = vpop.f32.mrb[95].mxu1  ;;  %vm11970_vm0 = vnez %v11969_v36  ;;  %vm11978_vm13 = vnez %v11977_v56  ;;  %6128 = vmatprep.subr.bf16.mxu1 %v11587_v47  ;;  %vm11988_vm5 = vnez %v11987_v38  ;;  %v11989_v52 = vld [vmem:[#allocation27_spill] sm:$0xff] }
 0x349   : > { %v5200_v58 = vadd.f32 %v5199_v8, %v5160_v46  ;;  %vm11990_vm6 = vnez %v11989_v52  ;;  %v11999_v52 = vld [vmem:[#allocation12_spill] sm:$0xff] }
 0x34b   : > { %v5201_v15 = vadd.f32 %v5200_v58, %v5161_v31 }
 0x34d   : > { %v5202_v22 = vadd.f32 %v5201_v15, %v5162_v45 }
 0x34f   : > { %6113 = vmatmul.mubr.bf16.gmra.mrb[124].mxu0 %v4786_v54  ;;  %v5203_v13 = vadd.f32 %v5202_v22, %v5163_v23  ;;  %v4963_v1 = vpop.f32.mrb[80].mxu0  ;;  %v11979_v22 = vld [vmem:[#allocation33_spill] sm:$0xff] }
 0x350   : > { %v4964_v41 = vadd.f32 %v4963_v1, %v11967_v59  ;;  %v6070_v28 = vpop.f32.mrb[81].mxu0  ;;  %vm11980_vm9 = vnez %v11979_v22 }
 0x351   : > { %v4966_v44 = vpop.f32.mrb[82].mxu0 }
 0x352   : > { %v5082_v7 = vadd.f32 %v10718_v25, %v4964_v41  ;;  %v4967_v48 = vadd.f32 %v4966_v44, %v11968_v19  ;;  %v6071_v50 = vpop.f32.mrb[83].mxu0  ;;  %v11981_v41 = vld [vmem:[#allocation35_spill] sm:$0xff] }
 0x353   : > { %vm11982_vm2 = vnez %v11981_v41 }
 0x354   : > { %v5123_v62 = vmax.f32 %v5082_v7, 0.0  ;;  %v5083_v26 = vadd.f32 %v10718_v25, %v4967_v48 }
 0x356   : > { %v5164_v49 = vsel %vm11970_vm0, %v5123_v62, 0.0  ;;  %v5124_v17 = vmax.f32 %v5083_v26, 0.0  ;;  %vm12000_vm0 = vnez %v11999_v52 }
 0x357   : > { %v5204_v16 = vadd.f32 %v5203_v13, %v5164_v49 }
 0x358   : > { %v5165_v21 = vsel %vm11972_vm4, %v5124_v17, 0.0 }
 0x359   : > { %v5205_v37 = vadd.f32 %v5204_v16, %v5165_v21  ;;  %v6267_v16 = vld [vmem:[%s11103_s6 + $0x30] sm:$0xff]  }
 0x35a   : > { %6129 = vmatpush3.bf16.msra.mxu1 %v6267_v16 }
 0x35b   : > { %6130 = vmatprep.subr.bf16.mxu1 %v11587_v47 }
 0x35e   : > { %v10947_v11 = vpop.f32.mrb[96].mxu1 }
 0x35f   : > { %v5990_v3 = vpop.f32.mrb[97].mxu1 }
 0x360   : > { %v10949_v55 = vpop.f32.mrb[98].mxu1 }
 0x361   : > { %v5991_v24 = vpop.f32.mrb[99].mxu1 }
 0x363   : > { %v4971_v5 = vpop.f32.mrb[84].mxu0 }
 0x364   : > { %v4972_v12 = vadd.f32 %v4971_v5, %v11973_v39  ;;  %v6074_v60 = vpop.f32.mrb[85].mxu0  ;;  %v11985_v5 = vld [vmem:[#allocation40_spill] sm:$0xff] }
 0x365   : > { %v4974_v9 = vpop.f32.mrb[86].mxu0  ;;  %vm11986_vm3 = vnez %v11985_v5 }
 0x366   : > { %v5084_v33 = vadd.f32 %v10718_v25, %v4972_v12  ;;  %v4975_v4 = vadd.f32 %v4974_v9, %v11974_v2  ;;  %v6075_v29 = vpop.f32.mrb[87].mxu0 }
 0x368   : > { %v5125_v20 = vmax.f32 %v5084_v33, 0.0  ;;  %v5085_v54 = vadd.f32 %v10718_v25, %v4975_v4 }
 0x36a   : > { %v5166_v18 = vsel %vm11976_vm10, %v5125_v20, 0.0  ;;  %v5126_v30 = vmax.f32 %v5085_v54, 0.0 }
 0x36b   : > { %v5206_v51 = vadd.f32 %v5205_v37, %v5166_v18  ;;  %v11983_v37 = vld [vmem:[#allocation39_spill] sm:$0xff] }
 0x36c   : > { %v5167_v42 = vsel %vm11978_vm13, %v5126_v30, 0.0  ;;  %vm11984_vm14 = vnez %v11983_v37 }
 0x36d   : > { %v5207_v46 = vadd.f32 %v5206_v51, %v5167_v42 }
 0x370   : > { %v10963_v0 = vpop.f32.mrb[100].mxu1 }
 0x371   : > { %v5994_v8 = vpop.f32.mrb[101].mxu1 }
 0x372   : > { %v10965_v10 = vpop.f32.mrb[102].mxu1 }
 0x373   : > { %v5995_v31 = vpop.f32.mrb[103].mxu1 }
 0x37b   : > { %v4979_v34 = vpop.f32.mrb[88].mxu0 }
 0x37c   : > { %v4980_v58 = vadd.f32 %v4979_v34, %v10757_v40  ;;  %v6078_v6 = vpop.f32.mrb[89].mxu0 }
 0x37d   : > { %v4982_v45 = vpop.f32.mrb[90].mxu0 }
 0x37e   : > { %v5086_v53 = vadd.f32 %v10718_v25, %v4980_v58  ;;  %v4983_v15 = vadd.f32 %v4982_v45, %v10772_v27  ;;  %v6079_v61 = vpop.f32.mrb[91].mxu0 }
 0x380   : > { %v5127_v23 = vmax.f32 %v5086_v53, 0.0  ;;  %v5087_v14 = vadd.f32 %v10718_v25, %v4983_v15 }
 0x382   : > { %v5168_v13 = vsel %vm11980_vm9, %v5127_v23, 0.0  ;;  %v5128_v1 = vmax.f32 %v5087_v14, 0.0  ;;  %v11991_v14 = vld [vmem:[#allocation44_spill] sm:$0xff] }
 0x383   : > { %v5208_v59 = vadd.f32 %v5207_v46, %v5168_v13  ;;  %vm11992_vm15 = vnez %v11991_v14 }
 0x384   : > { %v5169_v28 = vsel %vm11982_vm2, %v5128_v1, 0.0 }
 0x385   : > { %v5209_v44 = vadd.f32 %v5208_v59, %v5169_v28  ;;  %v11993_v59 = vld [vmem:[#allocation43_spill] sm:$0xff] }
 0x386   : > { %vm11994_vm11 = vnez %v11993_v59  ;;  %v12005_v59 = vld [vmem:[#allocation11_spill] sm:$0xff] }
 0x387   : > { %vm12006_vm13 = vnez %v12005_v59 }
 0x38a   : > { %v10975_v40 = vpop.f32.mrb[104].mxu1 }
 0x38b   : > { %v5998_v7 = vpop.f32.mrb[105].mxu1 }
 0x38c   : > { %v10977_v19 = vpop.f32.mrb[106].mxu1 }
 0x38d   : > { %v5999_v48 = vpop.f32.mrb[107].mxu1 }
 0x38e   : > { %v4987_v27 = vpop.f32.mrb[92].mxu0 }
 0x38f   : > { %v4988_v50 = vadd.f32 %v4987_v27, %v10874_v63  ;;  %v6082_v62 = vpop.f32.mrb[93].mxu0 }
 0x390   : > { %v4990_v26 = vpop.f32.mrb[94].mxu0 }
 0x391   : > { %v5088_v36 = vadd.f32 %v10718_v25, %v4988_v50  ;;  %v4991_v49 = vadd.f32 %v4990_v26, %v10888_v35  ;;  %v6083_v17 = vpop.f32.mrb[95].mxu0 }
 0x393   : > { %v5129_v32 = vmax.f32 %v5088_v36, 0.0  ;;  %v5089_v21 = vadd.f32 %v10718_v25, %v4991_v49 }
 0x395   : > { %v5170_v3 = vsel %vm11984_vm14, %v5129_v32, 0.0  ;;  %v5130_v24 = vmax.f32 %v5089_v21, 0.0  ;;  %v11995_v21 = vld [vmem:[#allocation8_spill] sm:$0xff]  ;;  %vm5226_vm14 = vcmask 1043456  }
 0x396   : > { %v5210_v63 = vadd.f32 %v5209_v44, %v5170_v3  ;;  %vm11996_vm1 = vnez %v11995_v21 }
 0x397   : > { %v5171_v39 = vsel %vm11986_vm3, %v5130_v24, 0.0 }
 0x398   : > { %v5211_v35 = vadd.f32 %v5210_v63, %v5171_v39  ;;  %v11997_v39 = vld [vmem:[#allocation19_spill] sm:$0xff] }
 0x399   : > { %vm11998_vm7 = vnez %v11997_v39 }
 0x3a2   : > { %v4995_v12 = vpop.f32.mrb[96].mxu0 }
 0x3a3   : > { %v4996_v60 = vadd.f32 %v4995_v12, %v10931_v57  ;;  %v6086_v9 = vpop.f32.mrb[97].mxu0  ;;  %v6268_v57 = vld [vmem:[%s11103_s6 + $0x38] sm:$0xff]  }
 0x3a4   : > { %v4998_v33 = vpop.f32.mrb[98].mxu0  ;;  %6131 = vmatpush3.bf16.msra.mxu1 %v6268_v57 }
 0x3a5   : > { %v5090_v2 = vadd.f32 %v10718_v25, %v4996_v60  ;;  %v4999_v4 = vadd.f32 %v4998_v33, %v10935_v43  ;;  %v6087_v29 = vpop.f32.mrb[99].mxu0 }
 0x3a7   : > { %v5131_v20 = vmax.f32 %v5090_v2, 0.0  ;;  %v5091_v54 = vadd.f32 %v10718_v25, %v4999_v4 }
 0x3a9   : > { %v5172_v47 = vsel %vm11988_vm5, %v5131_v20, 0.0  ;;  %v5132_v18 = vmax.f32 %v5091_v54, 0.0 }
 0x3aa   : > { %v5212_v30 = vadd.f32 %v5211_v35, %v5172_v47 }
 0x3ab   : > { %v5173_v51 = vsel %vm11990_vm6, %v5132_v18, 0.0 }
 0x3ac   : > { %v5213_v56 = vadd.f32 %v5212_v30, %v5173_v51 }
 0x3b4   : > { %v4613_v42 = vpop.f32.mrb[108].mxu1 }
 0x3b5   : > { %v6002_v43 = vpop.f32.mrb[109].mxu1 }
 0x3b6   : > { %v4616_v46 = vpop.f32.mrb[110].mxu1 }
 0x3b7   : > { %v6003_v8 = vpop.f32.mrb[111].mxu1 }
 0x3b8   : > { %v12001_v8 = vld [vmem:[#allocation38_spill] sm:$0xff] }
 0x3b9   : > { %vm12002_vm4 = vnez %v12001_v8 }
 0x3ba   : > { %v5003_v31 = vpop.f32.mrb[100].mxu0 }
 0x3bb   : > { %v5004_v34 = vadd.f32 %v5003_v31, %v10947_v11  ;;  %v6090_v58 = vpop.f32.mrb[101].mxu0 }
 0x3bc   : > { %v5006_v6 = vpop.f32.mrb[102].mxu0 }
 0x3bd   : > { %v5092_v45 = vadd.f32 %v10718_v25, %v5004_v34  ;;  %v5007_v53 = vadd.f32 %v5006_v6, %v10949_v55  ;;  %v6091_v15 = vpop.f32.mrb[103].mxu0 }
 0x3bf   : > { %v5133_v61 = vmax.f32 %v5092_v45, 0.0  ;;  %v5093_v23 = vadd.f32 %v10718_v25, %v5007_v53 }
 0x3c1   : > { %v5174_v22 = vsel %vm11992_vm15, %v5133_v61, 0.0  ;;  %v5134_v13 = vmax.f32 %v5093_v23, 0.0  ;;  %v12003_v23 = vld [vmem:[#allocation14_spill] sm:$0xff] }
 0x3c2   : > { %v5214_v1 = vadd.f32 %v5213_v56, %v5174_v22  ;;  %vm12004_vm10 = vnez %v12003_v23 }
 0x3c3   : > { %v5175_v41 = vsel %vm11994_vm11, %v5134_v13, 0.0 }
 0x3c4   : > { %v5215_v28 = vadd.f32 %v5214_v1, %v5175_v41 }
 0x3c9   : > { %v4621_v11 = vpop.f32.mrb[112].mxu1 }
 0x3ca   : > { %v6006_v44 = vpop.f32.mrb[113].mxu1 }
 0x3cb   : > { %v4624_v7 = vpop.f32.mrb[114].mxu1 }
 0x3cc   : > { %v6007_v48 = vpop.f32.mrb[115].mxu1 }
 0x3e4   : > { %v5011_v27 = vpop.f32.mrb[104].mxu0 }
 0x3e5   : > { %v5012_v55 = vadd.f32 %v5011_v27, %v10963_v0  ;;  %v6094_v50 = vpop.f32.mrb[105].mxu0 }
 0x3e6   : > { %v5014_v62 = vpop.f32.mrb[106].mxu0 }
 0x3e7   : > { %v5094_v26 = vadd.f32 %v10718_v25, %v5012_v55  ;;  %v5015_v36 = vadd.f32 %v5014_v62, %v10965_v10  ;;  %v6095_v49 = vpop.f32.mrb[107].mxu0 }
 0x3e8   : > { %v4629_v32 = vpop.f32.mrb[116].mxu1 }
 0x3e9   : > { %v5135_v17 = vmax.f32 %v5094_v26, 0.0  ;;  %v5095_v16 = vadd.f32 %v10718_v25, %v5015_v36  ;;  %v6010_v24 = vpop.f32.mrb[117].mxu1 }
 0x3ea   : > { %v4632_v5 = vpop.f32.mrb[118].mxu1 }
 0x3eb   : > { %v5176_v37 = vsel %vm11996_vm1, %v5135_v17, 0.0  ;;  %v5136_v3 = vmax.f32 %v5095_v16, 0.0  ;;  %v6011_v35 = vpop.f32.mrb[119].mxu1  ;;  %v12008_v16 = vld [vmem:[#allocation18_spill] sm:$0xff] }
 0x3ec   : > { %v5216_v63 = vadd.f32 %v5215_v28, %v5176_v37  ;;  %vm12009_vm9 = vnez %v12008_v16 }
 0x3ed   : > { %v5177_v0 = vsel %vm11998_vm7, %v5136_v3, 0.0 }
 0x3ee   : > { %v5217_v12 = vadd.f32 %v5216_v63, %v5177_v0 }
 0x3f0   : > { %v4637_v60 = vpop.f32.mrb[120].mxu1 }
 0x3f1   : > { %v6014_v9 = vpop.f32.mrb[121].mxu1 }
 0x3f2   : > { %v4640_v10 = vpop.f32.mrb[122].mxu1  ;;  %v12010_v9 = vld [vmem:[#allocation22_spill] sm:$0xff] }
 0x3f3   : > { %v6015_v33 = vpop.f32.mrb[123].mxu1  ;;  %vm12011_vm2 = vnez %v12010_v9 }
 0x3fd   : > { %v5019_v2 = vpop.f32.mrb[108].mxu0 }
 0x3fe   : > { %v5020_v4 = vadd.f32 %v5019_v2, %v10975_v40  ;;  %v6098_v29 = vpop.f32.mrb[109].mxu0 }
 0x3ff   : > { %v5022_v20 = vpop.f32.mrb[110].mxu0  ;;  %v12012_v29 = vld [vmem:[#allocation41_spill] sm:$0xff] }
 0x400   : > { %v5096_v54 = vadd.f32 %v10718_v25, %v5020_v4  ;;  %v5023_v38 = vadd.f32 %v5022_v20, %v10977_v19  ;;  %v6099_v47 = vpop.f32.mrb[111].mxu0 }
 0x402   : > { %v5137_v18 = vmax.f32 %v5096_v54, 0.0  ;;  %v5097_v30 = vadd.f32 %v10718_v25, %v5023_v38 }
 0x404   : > { %v5178_v51 = vsel %vm12000_vm0, %v5137_v18, 0.0  ;;  %v5138_v56 = vmax.f32 %v5097_v30, 0.0 }
 0x405   : > { %v5218_v57 = vadd.f32 %v5217_v12, %v5178_v51  ;;  %v5027_v43 = vpop.f32.mrb[112].mxu0 }
 0x406   : > { %v5179_v31 = vsel %vm12002_vm4, %v5138_v56, 0.0  ;;  %v5028_v40 = vadd.f32 %v5027_v43, %v4613_v42  ;;  %v6102_v34 = vpop.f32.mrb[113].mxu0 }
 0x407   : > { %v5219_v58 = vadd.f32 %v5218_v57, %v5179_v31  ;;  %v5030_v6 = vpop.f32.mrb[114].mxu0 }
 0x408   : > { %v5098_v45 = vadd.f32 %v10718_v25, %v5028_v40  ;;  %v5031_v19 = vadd.f32 %v5030_v6, %v4616_v46  ;;  %v6103_v53 = vpop.f32.mrb[115].mxu0 }
 0x40a   : > { %v5139_v15 = vmax.f32 %v5098_v45, 0.0  ;;  %v5099_v61 = vadd.f32 %v10718_v25, %v5031_v19 }
 0x40c   : > { %v5180_v14 = vsel %vm12004_vm10, %v5139_v15, 0.0  ;;  %v5140_v22 = vmax.f32 %v5099_v61, 0.0 }
 0x40d   : > { %v5220_v13 = vadd.f32 %v5219_v58, %v5180_v14  ;;  %v5035_v1 = vpop.f32.mrb[116].mxu0 }
 0x40e   : > { %v5181_v41 = vsel %vm12006_vm13, %v5140_v22, 0.0  ;;  %v5036_v42 = vadd.f32 %v5035_v1, %v4621_v11  ;;  %v6106_v28 = vpop.f32.mrb[117].mxu0 }
 0x40f   : > { %v5221_v44 = vadd.f32 %v5220_v13, %v5181_v41  ;;  %v5038_v48 = vpop.f32.mrb[118].mxu0 }
 0x410   : > { %v5100_v27 = vadd.f32 %v10718_v25, %v5036_v42  ;;  %v5039_v46 = vadd.f32 %v5038_v48, %v4624_v7  ;;  %v6107_v55 = vpop.f32.mrb[119].mxu0 }
 0x412   : > { %v5141_v50 = vmax.f32 %v5100_v27, 0.0  ;;  %v5101_v62 = vadd.f32 %v10718_v25, %v5039_v46 }
 0x414   : > { %v5182_v36 = vsel %vm9026_vm12, %v5141_v50, 0.0  ;;  %v5142_v49 = vmax.f32 %v5101_v62, 0.0  ;;  %vm12013_vm12 = vnez %v12012_v29 }
 0x415   : > { %v5222_v17 = vadd.f32 %v5221_v44, %v5182_v36 }
 0x416   : > { %v5183_v21 = vsel %vm12009_vm9, %v5142_v49, 0.0 }
 0x417   : > { %v5223_v37 = vadd.f32 %v5222_v17, %v5183_v21 }
 0x41a   : > { %v5043_v11 = vpop.f32.mrb[120].mxu0 }
 0x41b   : > { %v5044_v3 = vadd.f32 %v5043_v11, %v4629_v32  ;;  %v6110_v24 = vpop.f32.mrb[121].mxu0 }
 0x41c   : > { %v5046_v63 = vpop.f32.mrb[122].mxu0 }
 0x41d   : > { %v5102_v39 = vadd.f32 %v10718_v25, %v5044_v3  ;;  %v5047_v7 = vadd.f32 %v5046_v63, %v4632_v5  ;;  %v6111_v0 = vpop.f32.mrb[123].mxu0 }
 0x41f   : > { %v5143_v35 = vmax.f32 %v5102_v39, 0.0  ;;  %v5103_v12 = vadd.f32 %v10718_v25, %v5047_v7 }
 0x421   : > { %v5184_v10 = vsel %vm12011_vm2, %v5143_v35, 0.0  ;;  %v5144_v33 = vmax.f32 %v5103_v12, 0.0 }
 0x422   : > { %v5224_v2 = vadd.f32 %v5223_v37, %v5184_v10  ;;  %v5051_v4 = vpop.f32.mrb[124].mxu0 }
 0x423   : > { %v5185_v20 = vsel %vm12013_vm12, %v5144_v33, 0.0  ;;  %v5052_v54 = vadd.f32 %v5051_v4, %v4637_v60  ;;  %v6114_v32 = vpop.f32.mrb[125].mxu0 }
 0x424   : > { %v5225_v38 = vadd.f32 %v5224_v2, %v5185_v20  ;;  %v5054_v47 = vpop.f32.mrb[126].mxu0 }
 0x425   : > { %v5104_v18 = vadd.f32 %v10718_v25, %v5052_v54  ;;  %v6115_v5 = vpop.f32.mrb[127].mxu0  ;;  %v5253_v25 = vld [vmem:[%s11104_s7] sm:$0x1] }
 0x427   : > { %v5145_v30 = vmax.f32 %v5104_v18, 0.0 }
 0x429   : > { %v5186_v51 = vsel %vm9437_vm8, %v5145_v30, 0.0 }
 0x42a   : > { %v5227_v56 = vsel %vm5226_vm14, %v5186_v51, 0.0 }
 0x42b   : > { %v5228_v57 = vadd.f32 %v5227_v56, %v5225_v38 }
 0x42d   : > { %v5229_v43 = vrot.slane %v5228_v57, 4 }
 0x42f   : > { %v5230_v8 = vadd.f32 %v5229_v43, %v5228_v57 }
 0x431   : > { %v5231_v31 = vrot.slane %v5230_v8, 2 }
 0x433   : > { %v5232_v40 = vadd.f32 %v5231_v31, %v5230_v8 }
 0x435   : > { %v5233_v60 = vrot.slane %v5232_v40, 1 }
 0x437   : > { %v5234_v34 = vadd.f32 %v5233_v60, %v5232_v40 }
 0x439   : > { %v5235_v58 = vmul.f32 0.00390625, %v5234_v34 }
 0x43b   : > { %v5236_v6 = vpack.c.bf16 %v5235_v58, %v5235_v58 }
 0x43d   : > { %6133 = vmatmul.mubr.bf16.vlgmr.msra.gmra.mrb[124].mxu1 %v5236_v6 }
 0x510   : > { %v5336_v45 = vpop.f32.mrb[124].mxu1 }
 0x511   : > { %v5337_v19 = vadd.f32 %v5336_v45, %v5253_v25  ;;  %v6134_v53 = vpop.f32.mrb[125].mxu1 }
 0x512   : > { %v5339_v15 = vpop.f32.mrb[126].mxu1 }
 0x513   : > { %5342 = vst [vmem:[%s297_s21] sm:$0x1] %v5337_v19  ;;  %v6135_v61 = vpop.f32.mrb[127].mxu1 }
 0x514   : > { %6310 = shalt.err (!%p6307_p3)
}
 0x515   : > { %s6311_s17 = scalar_lea.hbm %s11055_s25, 16  ;;  %s6315_s20 = scalar_lea.hbm %s11105_s8, 32 }
 0x516   : > { %p6312_p4 = scmp.ne.s32.totalorder %s11055_s25, %s6311_s17  ;;  %p6316_p9 = scmp.lt.u32.totalorder %s11055_s25, %s11105_s8 }
 0x517   : > { %p6317_p10 = scmp.lt.u32.totalorder %s6315_s20, %s6311_s17  ;;  %p6319_p12 = scmp.lt.u32.totalorder %s6311_s17, %s11055_s25 }
 0x518   : > { %p6313_p7 = pnand %p6312_p4, %p6448_p5 }
 0x519   : > { %p6318_p11 = por %p6317_p10, %p6316_p9 }
 0x51a   : > { %p6314_p8 = pneg %p6313_p7 }
 0x51b   : > { %p6320_p13 = por %p6319_p12, %p6318_p11 }
 0x51d   : > { %p6321_p0 = pnand %p6320_p13, %p6314_p8 }
 0x51f   : > { %6324 = shalt.err (!%p6321_p0)
}
 0x520   : > { %6153 = dma.vmem_to_hbm [thread:$0]  (%p6448_p5), %s11057_s22, 16, %s11055_s25, %s5344_s10  }
 0x521 PF: > { %p6159_p1 = scmp.ge.s32.totalorder %s6359_s30, 2  ;;  %s5368_s24 = sand.u32 1, %s6347_s27  }
 0x522   : > { %s5369_s9 = scalar_lea.sflag [#allocation4], %s5368_s24 }
 0x523   : > { %p6156_p2 = pnand %p6159_p1, %p6452_p6 }
 0x525   : > { %6342 = dma.done.wait (!%p6156_p2), %s5369_s9, 16  }
 0x526   : > { %6344 = vsyncadd (!%p6156_p2), %s5369_s9, 4294967280  ;;  %p18_p3 = scmp.ge.s32.totalorder %s6435_s11, 4   ;;  %s12015_s27 = smov %s6351_s28 }
 0x527   : > { %s12016_s28 = smov %s6355_s29  ;;  %s12017_s29 = smov %s6446_s14 }
 0x528   : > { %s12018_s30 = smov %s6435_s11  ;;  %20 = sbr.rel (!%p18_p3) target bundleno = 3 (0x3), region = 87 }
 0x52f   :  { %5373 = vsyncpa [#allocation4], 1 }
 0x530   :  { %5375 = vsyncpa [#allocation4 + $0x1], 1 }

</bundles_post_ra>
